<compile_context>
chip_gen: v6e
topology: v6e:2x2x1
jax: 0.10.0
libtpu: 0.0.40
codegen_flags: <defaults>
</compile_context>

<pallas_src>
import jax
import jax.numpy as jnp
from jax.experimental import pallas as pl
from jax.experimental.pallas import tpu as pltpu


_PARALLEL = pltpu.CompilerParams(dimension_semantics=("parallel",))


# ---------------------------------------------------------------------------
# Pallas kernels
# ---------------------------------------------------------------------------
def _conv_kernel(p_ref, w1_ref, b1_ref, w2_ref, b2_ref, o_ref):
    """conv1 + bias + ReLU + 2x2/2 max-pool + conv2 + bias + ReLU, one image.

    p_ref : (1, 576, 25) bf16  -- im2col patches, pooling-phase major
    w1_ref: (25, 10)     bf16
    b1_ref: (1, 10)      f32
    w2_ref: (9, 10, 20)  bf16  -- [ki*3+kj, cin, cout]
    b2_ref: (1, 20)      f32
    o_ref : (1, 120, 20) bf16  -- rows = ph*12 + pw'; pw' in {10,11} is garbage
    """
    # conv1: one MXU push for all 4 pooling phases (M = 576).
    y = jnp.dot(p_ref[0], w1_ref[...], preferred_element_type=jnp.float32)
    # max-pool = elementwise max of the 4 phase slabs (8-aligned row slices).
    m = jnp.maximum(jnp.maximum(y[0:144], y[144:288]),
                    jnp.maximum(y[288:432], y[432:576]))          # (144, 10)
    # bias + ReLU commute with the max, so apply them once on the pooled map.
    pooled = jnp.maximum(m + b1_ref[...], 0.0).astype(jnp.bfloat16)
    # pad 8 zero rows so the shifted slices below never run off the end
    # (the rows that touch the pad only feed garbage output columns).
    pooled = jnp.concatenate(
        [pooled, jnp.zeros((8, 10), jnp.bfloat16)], axis=0)       # (152, 10)

    # conv2 as 9 shifted matmuls into an f32 accumulator (no im2col tensor).
    acc = jnp.zeros((120, 20), jnp.float32)
    for t in range(9):                       # t = ki*3 + kj, static unroll
        off = (t // 3) * 12 + (t % 3)
        acc = acc + jnp.dot(pooled[off:off + 120, :], w2_ref[t],
                            preferred_element_type=jnp.float32)
    y2 = jnp.maximum(acc + b2_ref[...], 0.0)
    o_ref[0] = y2.astype(o_ref.dtype)


def _mlp_kernel(x_ref, w1_ref, b1_ref, w2_ref, b2_ref, o_ref):
    """fc1 + ReLU + fc2 + log_softmax, fully fused (hidden stays in VMEM).

    x_ref : (1, 1, 2000) bf16 ; w1_ref: (2000, 500) bf16 ; b1_ref: (1, 500) f32
    w2_ref: (500, 10) bf16 ; b2_ref: (1, 10) f32 ; o_ref: (1, 1, 10) f32
    """
    h = jnp.dot(x_ref[0], w1_ref[...], preferred_element_type=jnp.float32)
    h = jnp.maximum(h + b1_ref[...], 0.0)
    y = jnp.dot(h.astype(jnp.bfloat16), w2_ref[...],
                preferred_element_type=jnp.float32)
    y = y + b2_ref[...]
    mx = jnp.max(y, axis=-1, keepdims=True)
    e = jnp.exp(y - mx)
    o_ref[0] = y - mx - jnp.log(jnp.sum(e, axis=-1, keepdims=True))


# ---------------------------------------------------------------------------
# im2col glue for conv1 (plain XLA slicing; ~60 KB at this scale)
# ---------------------------------------------------------------------------
def _conv1_patches(x):
    """x: (N,1,28,28) f32 -> (N, 576, 25) bf16, rows ordered (q, ph, pw)."""
    n = x.shape[0]
    xs = x[:, 0]
    taps = [xs[:, ki:ki + 24, kj:kj + 24] for ki in range(5) for kj in range(5)]
    p = jnp.stack(taps, axis=-1)             # (N, 24, 24, 25); feat = ki*5+kj
    p = p.reshape(n, 12, 2, 12, 2, 25)       # oh=(ph,qi), ow=(pw,qj)
    p = p.transpose(0, 2, 4, 1, 3, 5)        # (N, qi, qj, ph, pw, 25)
    return p.reshape(n, 576, 25).astype(jnp.bfloat16)


# ---------------------------------------------------------------------------
# Offline weight repack (bf16 cast + layout permutations -> no runtime transposes)
# ---------------------------------------------------------------------------
def prepare_params(params):
    w1, b1, w2, b2, fw1, fb1, fw2, fb2 = params
    w1p = w1.reshape(10, 25).T.astype(jnp.bfloat16)                  # (25, 10)
    b1p = b1.reshape(1, 10).astype(jnp.float32)
    # OIHW -> (kh, kw, cin, cout) -> (9, 10, 20): one (cin,cout) slab per tap.
    w2p = w2.transpose(2, 3, 1, 0).reshape(9, 10, 20).astype(jnp.bfloat16)
    b2p = b2.reshape(1, 20).astype(jnp.float32)
    # PyTorch fc1 expects NCHW-flattened (c,h,w) features; our conv2 output is
    # NHWC-flattened (h,w,c).  Permute the weight columns once, offline.
    fw1p = (fw1.reshape(500, 20, 10, 10).transpose(0, 2, 3, 1)
            .reshape(500, 2000).T.astype(jnp.bfloat16))              # (2000, 500)
    fb1p = fb1.reshape(1, 500).astype(jnp.float32)
    fw2p = fw2.T.astype(jnp.bfloat16)                                # (500, 10)
    fb2p = fb2.reshape(1, 10).astype(jnp.float32)
    return (w1p, b1p, w2p, b2p, fw1p, fb1p, fw2p, fb2p)


# ---------------------------------------------------------------------------
# Forward pass
# ---------------------------------------------------------------------------
def digit_forward(x, prep):
    (w1p, b1p, w2p, b2p, fw1p, fb1p, fw2p, fb2p) = prep
    n = x.shape[0]

    # --- fused conv1 + pool + conv2 kernel, grid over batch (parallel) ------
    p1 = _conv1_patches(x)                                   # (N, 576, 25)
    feats = pl.pallas_call(
        _conv_kernel,
        out_shape=jax.ShapeDtypeStruct((n, 120, 20), jnp.bfloat16),
        grid=(n,),
        in_specs=[
            pl.BlockSpec((1, 576, 25), lambda i: (i, 0, 0)),
            pl.BlockSpec((25, 10), lambda i: (0, 0)),
            pl.BlockSpec((1, 10), lambda i: (0, 0)),
            pl.BlockSpec((9, 10, 20), lambda i: (0, 0, 0)),
            pl.BlockSpec((1, 20), lambda i: (0, 0)),
        ],
        out_specs=pl.BlockSpec((1, 120, 20), lambda i: (i, 0, 0)),
        compiler_params=_PARALLEL,
    )(p1, w1p, b1p, w2p, b2p)

    # Drop the garbage columns (pw' = 10, 11) and flatten NHWC -> 2000 feats.
    flat = (feats.reshape(n, 10, 12, 20)[:, :, :10, :]
            .reshape(n, 1, 2000))

    # --- fused fc1 + ReLU + fc2 + log_softmax, grid over batch (parallel) ---
    # fc weights use constant index_maps -> DMA'd once and kept VMEM-resident
    # across grid steps; two steps at batch 2 let v7x use both TensorCores.
    out = pl.pallas_call(
        _mlp_kernel,
        out_shape=jax.ShapeDtypeStruct((n, 1, 10), jnp.float32),
        grid=(n,),
        in_specs=[
            pl.BlockSpec((1, 1, 2000), lambda i: (i, 0, 0)),
            pl.BlockSpec((2000, 500), lambda i: (0, 0)),
            pl.BlockSpec((1, 500), lambda i: (0, 0)),
            pl.BlockSpec((500, 10), lambda i: (0, 0)),
            pl.BlockSpec((1, 10), lambda i: (0, 0)),
        ],
        out_specs=pl.BlockSpec((1, 1, 10), lambda i: (i, 0, 0)),
        compiler_params=_PARALLEL,
    )(flat, fw1p, fb1p, fw2p, fb2p)
    return out.reshape(n, 10)


# ---------------------------------------------------------------------------
# Pure-JAX reference (f32, HIGHEST precision)
# ---------------------------------------------------------------------------
def reference_forward(x, params):
    (w1, b1, w2, b2, fw1, fb1, fw2, fb2) = params
    dn = ("NCHW", "OIHW", "NCHW")
    hp = jax.lax.Precision.HIGHEST
    y = jax.lax.conv_general_dilated(x, w1, (1, 1), "VALID",
                                     dimension_numbers=dn, precision=hp)
    y = jax.nn.relu(y + b1[None, :, None, None])
    y = jax.lax.reduce_window(y, -jnp.inf, jax.lax.max,
                              (1, 1, 2, 2), (1, 1, 2, 2), "VALID")
    y = jax.lax.conv_general_dilated(y, w2, (1, 1), "VALID",
                                     dimension_numbers=dn, precision=hp)
    y = jax.nn.relu(y + b2[None, :, None, None])
    y = y.reshape(x.shape[0], -1)
    y = jax.nn.relu(y @ fw1.T + fb1)
    y = y @ fw2.T + fb2
    return jax.nn.log_softmax(y, axis=1)


if __name__ == "__main__":
    key = jax.random.PRNGKey(0)
    ks = jax.random.split(key, 9)
    scale = 0.05
    w1 = jax.random.normal(ks[0], (10, 1, 5, 5), jnp.float32) * scale
    b1 = jax.random.normal(ks[1], (10,), jnp.float32) * scale
    w2 = jax.random.normal(ks[2], (20, 10, 3, 3), jnp.float32) * scale
    b2 = jax.random.normal(ks[3], (20,), jnp.float32) * scale
    fw1 = jax.random.normal(ks[4], (500, 2000), jnp.float32) * scale
    fb1 = jax.random.normal(ks[5], (500,), jnp.float32) * scale
    fw2 = jax.random.normal(ks[6], (10, 500), jnp.float32) * scale
    fb2 = jax.random.normal(ks[7], (10,), jnp.float32) * scale
    params = (w1, b1, w2, b2, fw1, fb1, fw2, fb2)

    # MNIST-sized input implied by fc1's 20*10*10 = 2000 features -> 28x28.
    x = jax.random.normal(ks[8], (2, 1, 28, 28), jnp.float32)

    prep = prepare_params(params)            # one-time offline weight repack
    out = jax.jit(digit_forward)(x, prep)
    out = jax.block_until_ready(out)

    ref = reference_forward(x, params)
    assert out.shape == (2, 10)
    assert jnp.allclose(out, ref, atol=5e-2, rtol=5e-2)

    print("KERNEL_OK")
</pallas_src>

<mosaic_0001>
module attributes {stable_mosaic.version = 11 : i64} {
  func.func @_conv_kernel(%arg0: i32, %arg1: memref<1x576x25xbf16, #tpu.memory_space<vmem>>, %arg2: memref<25x10xbf16, #tpu.memory_space<vmem>>, %arg3: memref<1x10xf32, #tpu.memory_space<vmem>>, %arg4: memref<9x10x20xbf16, #tpu.memory_space<vmem>>, %arg5: memref<1x20xf32, #tpu.memory_space<vmem>>, %arg6: memref<1x120x20xbf16, #tpu.memory_space<vmem>>) attributes {dimension_semantics = [#tpu.dimension_semantics<parallel>], iteration_bounds = array<i64: 2>, scalar_prefetch = 0 : i64, scratch_operands = 0 : i64, tpu.core_type = #tpu.core_type<tc>, window_params = [{transform_indices = @transform_0, window_bounds = array<i64: 1, 576, 25>}, {pipeline_mode = #tpu.pipeline_mode<synchronous>, transform_indices = @transform_1, window_bounds = array<i64: 25, 10>}, {pipeline_mode = #tpu.pipeline_mode<synchronous>, transform_indices = @transform_2, window_bounds = array<i64: 1, 10>}, {pipeline_mode = #tpu.pipeline_mode<synchronous>, transform_indices = @transform_3, window_bounds = array<i64: 9, 10, 20>}, {pipeline_mode = #tpu.pipeline_mode<synchronous>, transform_indices = @transform_4, window_bounds = array<i64: 1, 20>}, {transform_indices = @transform_5, window_bounds = array<i64: 1, 120, 20>}]} {
    %c0 = arith.constant 0 : index
    %c0_0 = arith.constant 0 : index
    %c0_1 = arith.constant 0 : index
    %0 = vector.load %arg1[%c0, %c0_0, %c0_1] : memref<1x576x25xbf16, #tpu.memory_space<vmem>>, vector<1x576x25xbf16>
    %1 = vector.shape_cast %0 : vector<1x576x25xbf16> to vector<576x25xbf16>
    %c0_2 = arith.constant 0 : index
    %c0_3 = arith.constant 0 : index
    %2 = vector.load %arg2[%c0_2, %c0_3] : memref<25x10xbf16, #tpu.memory_space<vmem>>, vector<25x10xbf16>
    %cst = arith.constant dense<0.000000e+00> : vector<576x10xf32>
    %3 = tpu.matmul %1, %2, %cst {dimension_numbers = #tpu.dot_dimension_numbers<[1], [0], [0], [1], [0, 0, 1, 1], [], []>} : vector<576x25xbf16>, vector<25x10xbf16>, vector<576x10xf32> -> vector<576x10xf32>
    %4 = vector.extract_strided_slice %3 {offsets = [0, 0], sizes = [144, 10], strides = [1, 1]} : vector<576x10xf32> to vector<144x10xf32>
    %5 = vector.extract_strided_slice %3 {offsets = [144, 0], sizes = [144, 10], strides = [1, 1]} : vector<576x10xf32> to vector<144x10xf32>
    %6 = arith.maximumf %4, %5 : vector<144x10xf32>
    %7 = vector.extract_strided_slice %3 {offsets = [288, 0], sizes = [144, 10], strides = [1, 1]} : vector<576x10xf32> to vector<144x10xf32>
    %8 = vector.extract_strided_slice %3 {offsets = [432, 0], sizes = [144, 10], strides = [1, 1]} : vector<576x10xf32> to vector<144x10xf32>
    %9 = arith.maximumf %7, %8 : vector<144x10xf32>
    %10 = arith.maximumf %6, %9 : vector<144x10xf32>
    %c0_4 = arith.constant 0 : index
    %c0_5 = arith.constant 0 : index
    %11 = vector.load %arg3[%c0_4, %c0_5] : memref<1x10xf32, #tpu.memory_space<vmem>>, vector<1x10xf32>
    %12 = vector.broadcast %11 : vector<1x10xf32> to vector<144x10xf32>
    %13 = arith.addf %10, %12 : vector<144x10xf32>
    %cst_6 = arith.constant 0.000000e+00 : f32
    %14 = vector.broadcast %cst_6 : f32 to vector<144x10xf32>
    %15 = arith.maximumf %13, %14 : vector<144x10xf32>
    %16 = arith.truncf %15 : vector<144x10xf32> to vector<144x10xbf16>
    %cst_7 = arith.constant 0.000000e+00 : bf16
    %17 = vector.broadcast %cst_7 : bf16 to vector<8x10xbf16>
    %18 = tpu.concatenate %16, %17 in 0 : vector<144x10xbf16>, vector<8x10xbf16> -> vector<152x10xbf16>
    %cst_8 = arith.constant 0.000000e+00 : f32
    %19 = vector.broadcast %cst_8 : f32 to vector<120x20xf32>
    %20 = vector.extract_strided_slice %18 {offsets = [0, 0], sizes = [120, 10], strides = [1, 1]} : vector<152x10xbf16> to vector<120x10xbf16>
    %c0_9 = arith.constant 0 : index
    %c0_10 = arith.constant 0 : index
    %c0_11 = arith.constant 0 : index
    %21 = vector.load %arg4[%c0_9, %c0_10, %c0_11] : memref<9x10x20xbf16, #tpu.memory_space<vmem>>, vector<1x10x20xbf16>
    %22 = vector.shape_cast %21 : vector<1x10x20xbf16> to vector<10x20xbf16>
    %cst_12 = arith.constant dense<0.000000e+00> : vector<120x20xf32>
    %23 = tpu.matmul %20, %22, %cst_12 {dimension_numbers = #tpu.dot_dimension_numbers<[1], [0], [0], [1], [0, 0, 1, 1], [], []>} : vector<120x10xbf16>, vector<10x20xbf16>, vector<120x20xf32> -> vector<120x20xf32>
    %24 = arith.addf %19, %23 : vector<120x20xf32>
    %25 = vector.extract_strided_slice %18 {offsets = [1, 0], sizes = [120, 10], strides = [1, 1]} : vector<152x10xbf16> to vector<120x10xbf16>
    %c1 = arith.constant 1 : index
    %c0_13 = arith.constant 0 : index
    %c0_14 = arith.constant 0 : index
    %26 = vector.load %arg4[%c1, %c0_13, %c0_14] : memref<9x10x20xbf16, #tpu.memory_space<vmem>>, vector<1x10x20xbf16>
    %27 = vector.shape_cast %26 : vector<1x10x20xbf16> to vector<10x20xbf16>
    %cst_15 = arith.constant dense<0.000000e+00> : vector<120x20xf32>
    %28 = tpu.matmul %25, %27, %cst_15 {dimension_numbers = #tpu.dot_dimension_numbers<[1], [0], [0], [1], [0, 0, 1, 1], [], []>} : vector<120x10xbf16>, vector<10x20xbf16>, vector<120x20xf32> -> vector<120x20xf32>
    %29 = arith.addf %24, %28 : vector<120x20xf32>
    %30 = vector.extract_strided_slice %18 {offsets = [2, 0], sizes = [120, 10], strides = [1, 1]} : vector<152x10xbf16> to vector<120x10xbf16>
    %c2 = arith.constant 2 : index
    %c0_16 = arith.constant 0 : index
    %c0_17 = arith.constant 0 : index
    %31 = vector.load %arg4[%c2, %c0_16, %c0_17] : memref<9x10x20xbf16, #tpu.memory_space<vmem>>, vector<1x10x20xbf16>
    %32 = vector.shape_cast %31 : vector<1x10x20xbf16> to vector<10x20xbf16>
    %cst_18 = arith.constant dense<0.000000e+00> : vector<120x20xf32>
    %33 = tpu.matmul %30, %32, %cst_18 {dimension_numbers = #tpu.dot_dimension_numbers<[1], [0], [0], [1], [0, 0, 1, 1], [], []>} : vector<120x10xbf16>, vector<10x20xbf16>, vector<120x20xf32> -> vector<120x20xf32>
    %34 = arith.addf %29, %33 : vector<120x20xf32>
    %35 = vector.extract_strided_slice %18 {offsets = [12, 0], sizes = [120, 10], strides = [1, 1]} : vector<152x10xbf16> to vector<120x10xbf16>
    %c3 = arith.constant 3 : index
    %c0_19 = arith.constant 0 : index
    %c0_20 = arith.constant 0 : index
    %36 = vector.load %arg4[%c3, %c0_19, %c0_20] : memref<9x10x20xbf16, #tpu.memory_space<vmem>>, vector<1x10x20xbf16>
    %37 = vector.shape_cast %36 : vector<1x10x20xbf16> to vector<10x20xbf16>
    %cst_21 = arith.constant dense<0.000000e+00> : vector<120x20xf32>
    %38 = tpu.matmul %35, %37, %cst_21 {dimension_numbers = #tpu.dot_dimension_numbers<[1], [0], [0], [1], [0, 0, 1, 1], [], []>} : vector<120x10xbf16>, vector<10x20xbf16>, vector<120x20xf32> -> vector<120x20xf32>
    %39 = arith.addf %34, %38 : vector<120x20xf32>
    %40 = vector.extract_strided_slice %18 {offsets = [13, 0], sizes = [120, 10], strides = [1, 1]} : vector<152x10xbf16> to vector<120x10xbf16>
    %c4 = arith.constant 4 : index
    %c0_22 = arith.constant 0 : index
    %c0_23 = arith.constant 0 : index
    %41 = vector.load %arg4[%c4, %c0_22, %c0_23] : memref<9x10x20xbf16, #tpu.memory_space<vmem>>, vector<1x10x20xbf16>
    %42 = vector.shape_cast %41 : vector<1x10x20xbf16> to vector<10x20xbf16>
    %cst_24 = arith.constant dense<0.000000e+00> : vector<120x20xf32>
    %43 = tpu.matmul %40, %42, %cst_24 {dimension_numbers = #tpu.dot_dimension_numbers<[1], [0], [0], [1], [0, 0, 1, 1], [], []>} : vector<120x10xbf16>, vector<10x20xbf16>, vector<120x20xf32> -> vector<120x20xf32>
    %44 = arith.addf %39, %43 : vector<120x20xf32>
    %45 = vector.extract_strided_slice %18 {offsets = [14, 0], sizes = [120, 10], strides = [1, 1]} : vector<152x10xbf16> to vector<120x10xbf16>
    %c5 = arith.constant 5 : index
    %c0_25 = arith.constant 0 : index
    %c0_26 = arith.constant 0 : index
    %46 = vector.load %arg4[%c5, %c0_25, %c0_26] : memref<9x10x20xbf16, #tpu.memory_space<vmem>>, vector<1x10x20xbf16>
    %47 = vector.shape_cast %46 : vector<1x10x20xbf16> to vector<10x20xbf16>
    %cst_27 = arith.constant dense<0.000000e+00> : vector<120x20xf32>
    %48 = tpu.matmul %45, %47, %cst_27 {dimension_numbers = #tpu.dot_dimension_numbers<[1], [0], [0], [1], [0, 0, 1, 1], [], []>} : vector<120x10xbf16>, vector<10x20xbf16>, vector<120x20xf32> -> vector<120x20xf32>
    %49 = arith.addf %44, %48 : vector<120x20xf32>
    %50 = vector.extract_strided_slice %18 {offsets = [24, 0], sizes = [120, 10], strides = [1, 1]} : vector<152x10xbf16> to vector<120x10xbf16>
    %c6 = arith.constant 6 : index
    %c0_28 = arith.constant 0 : index
    %c0_29 = arith.constant 0 : index
    %51 = vector.load %arg4[%c6, %c0_28, %c0_29] : memref<9x10x20xbf16, #tpu.memory_space<vmem>>, vector<1x10x20xbf16>
    %52 = vector.shape_cast %51 : vector<1x10x20xbf16> to vector<10x20xbf16>
    %cst_30 = arith.constant dense<0.000000e+00> : vector<120x20xf32>
    %53 = tpu.matmul %50, %52, %cst_30 {dimension_numbers = #tpu.dot_dimension_numbers<[1], [0], [0], [1], [0, 0, 1, 1], [], []>} : vector<120x10xbf16>, vector<10x20xbf16>, vector<120x20xf32> -> vector<120x20xf32>
    %54 = arith.addf %49, %53 : vector<120x20xf32>
    %55 = vector.extract_strided_slice %18 {offsets = [25, 0], sizes = [120, 10], strides = [1, 1]} : vector<152x10xbf16> to vector<120x10xbf16>
    %c7 = arith.constant 7 : index
    %c0_31 = arith.constant 0 : index
    %c0_32 = arith.constant 0 : index
    %56 = vector.load %arg4[%c7, %c0_31, %c0_32] : memref<9x10x20xbf16, #tpu.memory_space<vmem>>, vector<1x10x20xbf16>
    %57 = vector.shape_cast %56 : vector<1x10x20xbf16> to vector<10x20xbf16>
    %cst_33 = arith.constant dense<0.000000e+00> : vector<120x20xf32>
    %58 = tpu.matmul %55, %57, %cst_33 {dimension_numbers = #tpu.dot_dimension_numbers<[1], [0], [0], [1], [0, 0, 1, 1], [], []>} : vector<120x10xbf16>, vector<10x20xbf16>, vector<120x20xf32> -> vector<120x20xf32>
    %59 = arith.addf %54, %58 : vector<120x20xf32>
    %60 = vector.extract_strided_slice %18 {offsets = [26, 0], sizes = [120, 10], strides = [1, 1]} : vector<152x10xbf16> to vector<120x10xbf16>
    %c8 = arith.constant 8 : index
    %c0_34 = arith.constant 0 : index
    %c0_35 = arith.constant 0 : index
    %61 = vector.load %arg4[%c8, %c0_34, %c0_35] : memref<9x10x20xbf16, #tpu.memory_space<vmem>>, vector<1x10x20xbf16>
    %62 = vector.shape_cast %61 : vector<1x10x20xbf16> to vector<10x20xbf16>
    %cst_36 = arith.constant dense<0.000000e+00> : vector<120x20xf32>
    %63 = tpu.matmul %60, %62, %cst_36 {dimension_numbers = #tpu.dot_dimension_numbers<[1], [0], [0], [1], [0, 0, 1, 1], [], []>} : vector<120x10xbf16>, vector<10x20xbf16>, vector<120x20xf32> -> vector<120x20xf32>
    %64 = arith.addf %59, %63 : vector<120x20xf32>
    %c0_37 = arith.constant 0 : index
    %c0_38 = arith.constant 0 : index
    %65 = vector.load %arg5[%c0_37, %c0_38] : memref<1x20xf32, #tpu.memory_space<vmem>>, vector<1x20xf32>
    %66 = vector.broadcast %65 : vector<1x20xf32> to vector<120x20xf32>
    %67 = arith.addf %64, %66 : vector<120x20xf32>
    %cst_39 = arith.constant 0.000000e+00 : f32
    %68 = vector.broadcast %cst_39 : f32 to vector<120x20xf32>
    %69 = arith.maximumf %67, %68 : vector<120x20xf32>
    %70 = arith.truncf %69 : vector<120x20xf32> to vector<120x20xbf16>
    %c0_40 = arith.constant 0 : index
    %c0_41 = arith.constant 0 : index
    %c0_42 = arith.constant 0 : index
    %71 = vector.load %arg6[%c0_40, %c0_41, %c0_42] : memref<1x120x20xbf16, #tpu.memory_space<vmem>>, vector<1x120x20xbf16>
    %72 = vector.shape_cast %71 : vector<1x120x20xbf16> to vector<120x20xbf16>
    %73 = vector.shape_cast %70 : vector<120x20xbf16> to vector<1x120x20xbf16>
    tpu.vector_store %arg6[%c0_40, %c0_41, %c0_42], %73 {strides = array<i32>} : memref<1x120x20xbf16, #tpu.memory_space<vmem>>, vector<1x120x20xbf16>,
    return
  }
  func.func @transform_0(%arg0: i32) -> (i32, i32, i32) {
    %c0_i32 = arith.constant 0 : i32
    %c0_i32_0 = arith.constant 0 : i32
    %c0_i32_1 = arith.constant 0 : i32
    return %arg0, %c0_i32, %c0_i32_0 : i32, i32, i32
  }
  func.func @transform_1(%arg0: i32) -> (i32, i32) {
    %c0_i32 = arith.constant 0 : i32
    %c0_i32_0 = arith.constant 0 : i32
    %c0_i32_1 = arith.constant 0 : i32
    return %c0_i32, %c0_i32_0 : i32, i32
  }
  func.func @transform_2(%arg0: i32) -> (i32, i32) {
    %c0_i32 = arith.constant 0 : i32
    %c0_i32_0 = arith.constant 0 : i32
    %c0_i32_1 = arith.constant 0 : i32
    return %c0_i32, %c0_i32_0 : i32, i32
  }
  func.func @transform_3(%arg0: i32) -> (i32, i32, i32) {
    %c0_i32 = arith.constant 0 : i32
    %c0_i32_0 = arith.constant 0 : i32
    %c0_i32_1 = arith.constant 0 : i32
    %c0_i32_2 = arith.constant 0 : i32
    return %c0_i32, %c0_i32_0, %c0_i32_1 : i32, i32, i32
  }
  func.func @transform_4(%arg0: i32) -> (i32, i32) {
    %c0_i32 = arith.constant 0 : i32
    %c0_i32_0 = arith.constant 0 : i32
    %c0_i32_1 = arith.constant 0 : i32
    return %c0_i32, %c0_i32_0 : i32, i32
  }
  func.func @transform_5(%arg0: i32) -> (i32, i32, i32) {
    %c0_i32 = arith.constant 0 : i32
    %c0_i32_0 = arith.constant 0 : i32
    %c0_i32_1 = arith.constant 0 : i32
    return %arg0, %c0_i32, %c0_i32_0 : i32, i32, i32
  }
}

module attributes {stable_mosaic.version = 11 : i64} {
  func.func @_mlp_kernel(%arg0: i32, %arg1: memref<1x1x2000xbf16, #tpu.memory_space<vmem>>, %arg2: memref<2000x500xbf16, #tpu.memory_space<vmem>>, %arg3: memref<1x500xf32, #tpu.memory_space<vmem>>, %arg4: memref<500x10xbf16, #tpu.memory_space<vmem>>, %arg5: memref<1x10xf32, #tpu.memory_space<vmem>>, %arg6: memref<1x1x10xf32, #tpu.memory_space<vmem>>) attributes {dimension_semantics = [#tpu.dimension_semantics<parallel>], iteration_bounds = array<i64: 2>, scalar_prefetch = 0 : i64, scratch_operands = 0 : i64, tpu.core_type = #tpu.core_type<tc>, window_params = [{transform_indices = @transform_0, window_bounds = array<i64: 1, 1, 2000>}, {pipeline_mode = #tpu.pipeline_mode<synchronous>, transform_indices = @transform_1, window_bounds = array<i64: 2000, 500>}, {pipeline_mode = #tpu.pipeline_mode<synchronous>, transform_indices = @transform_2, window_bounds = array<i64: 1, 500>}, {pipeline_mode = #tpu.pipeline_mode<synchronous>, transform_indices = @transform_3, window_bounds = array<i64: 500, 10>}, {pipeline_mode = #tpu.pipeline_mode<synchronous>, transform_indices = @transform_4, window_bounds = array<i64: 1, 10>}, {transform_indices = @transform_5, window_bounds = array<i64: 1, 1, 10>}]} {
    %c0 = arith.constant 0 : index
    %c0_0 = arith.constant 0 : index
    %c0_1 = arith.constant 0 : index
    %0 = vector.load %arg1[%c0, %c0_0, %c0_1] : memref<1x1x2000xbf16, #tpu.memory_space<vmem>>, vector<1x1x2000xbf16>
    %1 = vector.shape_cast %0 : vector<1x1x2000xbf16> to vector<1x2000xbf16>
    %c0_2 = arith.constant 0 : index
    %c0_3 = arith.constant 0 : index
    %2 = vector.load %arg2[%c0_2, %c0_3] : memref<2000x500xbf16, #tpu.memory_space<vmem>>, vector<2000x500xbf16>
    %cst = arith.constant dense<0.000000e+00> : vector<1x500xf32>
    %3 = tpu.matmul %1, %2, %cst {dimension_numbers = #tpu.dot_dimension_numbers<[1], [0], [0], [1], [0, 0, 1, 1], [], []>} : vector<1x2000xbf16>, vector<2000x500xbf16>, vector<1x500xf32> -> vector<1x500xf32>
    %c0_4 = arith.constant 0 : index
    %c0_5 = arith.constant 0 : index
    %4 = vector.load %arg3[%c0_4, %c0_5] : memref<1x500xf32, #tpu.memory_space<vmem>>, vector<1x500xf32>
    %5 = arith.addf %3, %4 : vector<1x500xf32>
    %cst_6 = arith.constant 0.000000e+00 : f32
    %6 = vector.broadcast %cst_6 : f32 to vector<1x500xf32>
    %7 = arith.maximumf %5, %6 : vector<1x500xf32>
    %8 = arith.truncf %7 : vector<1x500xf32> to vector<1x500xbf16>
    %c0_7 = arith.constant 0 : index
    %c0_8 = arith.constant 0 : index
    %9 = vector.load %arg4[%c0_7, %c0_8] : memref<500x10xbf16, #tpu.memory_space<vmem>>, vector<500x10xbf16>
    %cst_9 = arith.constant dense<0.000000e+00> : vector<1x10xf32>
    %10 = tpu.matmul %8, %9, %cst_9 {dimension_numbers = #tpu.dot_dimension_numbers<[1], [0], [0], [1], [0, 0, 1, 1], [], []>} : vector<1x500xbf16>, vector<500x10xbf16>, vector<1x10xf32> -> vector<1x10xf32>
    %c0_10 = arith.constant 0 : index
    %c0_11 = arith.constant 0 : index
    %11 = vector.load %arg5[%c0_10, %c0_11] : memref<1x10xf32, #tpu.memory_space<vmem>>, vector<1x10xf32>
    %12 = arith.addf %10, %11 : vector<1x10xf32>
    %cst_12 = arith.constant dense<0xFF800000> : vector<1xf32>
    %13 = vector.multi_reduction <maximumf>, %12, %cst_12 [1] : vector<1x10xf32> to vector<1xf32>
    %14 = vector.shape_cast %13 : vector<1xf32> to vector<1x1xf32>
    %15 = vector.broadcast %14 : vector<1x1xf32> to vector<1x10xf32>
    %16 = arith.subf %12, %15 : vector<1x10xf32>
    %17 = math.exp %16 : vector<1x10xf32>
    %18 = vector.broadcast %14 : vector<1x1xf32> to vector<1x10xf32>
    %19 = arith.subf %12, %18 : vector<1x10xf32>
    %cst_13 = arith.constant dense<0.000000e+00> : vector<1xf32>
    %20 = vector.multi_reduction <add>, %17, %cst_13 [1] : vector<1x10xf32> to vector<1xf32>
    %21 = vector.shape_cast %20 : vector<1xf32> to vector<1x1xf32>
    %22 = math.log %21 : vector<1x1xf32>
    %23 = vector.broadcast %22 : vector<1x1xf32> to vector<1x10xf32>
    %24 = arith.subf %19, %23 : vector<1x10xf32>
    %c0_14 = arith.constant 0 : index
    %c0_15 = arith.constant 0 : index
    %c0_16 = arith.constant 0 : index
    %25 = vector.load %arg6[%c0_14, %c0_15, %c0_16] : memref<1x1x10xf32, #tpu.memory_space<vmem>>, vector<1x1x10xf32>
    %26 = vector.shape_cast %25 : vector<1x1x10xf32> to vector<1x10xf32>
    %27 = vector.shape_cast %24 : vector<1x10xf32> to vector<1x1x10xf32>
    tpu.vector_store %arg6[%c0_14, %c0_15, %c0_16], %27 {strides = array<i32>} : memref<1x1x10xf32, #tpu.memory_space<vmem>>, vector<1x1x10xf32>,
    return
  }
  func.func @transform_0(%arg0: i32) -> (i32, i32, i32) {
    %c0_i32 = arith.constant 0 : i32
    %c0_i32_0 = arith.constant 0 : i32
    %c0_i32_1 = arith.constant 0 : i32
    return %arg0, %c0_i32, %c0_i32_0 : i32, i32, i32
  }
  func.func @transform_1(%arg0: i32) -> (i32, i32) {
    %c0_i32 = arith.constant 0 : i32
    %c0_i32_0 = arith.constant 0 : i32
    %c0_i32_1 = arith.constant 0 : i32
    return %c0_i32, %c0_i32_0 : i32, i32
  }
  func.func @transform_2(%arg0: i32) -> (i32, i32) {
    %c0_i32 = arith.constant 0 : i32
    %c0_i32_0 = arith.constant 0 : i32
    %c0_i32_1 = arith.constant 0 : i32
    return %c0_i32, %c0_i32_0 : i32, i32
  }
  func.func @transform_3(%arg0: i32) -> (i32, i32) {
    %c0_i32 = arith.constant 0 : i32
    %c0_i32_0 = arith.constant 0 : i32
    %c0_i32_1 = arith.constant 0 : i32
    return %c0_i32, %c0_i32_0 : i32, i32
  }
  func.func @transform_4(%arg0: i32) -> (i32, i32) {
    %c0_i32 = arith.constant 0 : i32
    %c0_i32_0 = arith.constant 0 : i32
    %c0_i32_1 = arith.constant 0 : i32
    return %c0_i32, %c0_i32_0 : i32, i32
  }
  func.func @transform_5(%arg0: i32) -> (i32, i32, i32) {
    %c0_i32 = arith.constant 0 : i32
    %c0_i32_0 = arith.constant 0 : i32
    %c0_i32_1 = arith.constant 0 : i32
    return %arg0, %c0_i32, %c0_i32_0 : i32, i32, i32
  }
}

</mosaic_0001>

<bundles_post_ra>
// kernel: digit_forward.2
= control target key start
LH: loop header
LB: loop body
LE: loop exit
PB: predicated region body
PF: predicated region fallthrough
CT: control target
= control target key end

     0   :  { %s3396_s18 = smov 0   ;;  %s4431_s0 = inlined_call_operand.vmem [shape: bf16[2,576,25], index: 0, kind: input, shape index: {}]   ;;  %s4432_s1 = inlined_call_operand.vmem [shape: bf16[25,10], index: 1, kind: input, shape index: {}]   ;;  %s4433_s2 = inlined_call_operand.vmem [shape: f32[1,10], index: 2, kind: input, shape index: {}]   ;;  %s4434_s3 = inlined_call_operand.vmem [shape: bf16[9,10,20], index: 3, kind: input, shape index: {}]   ;;  %s4435_s4 = inlined_call_operand.vmem [shape: f32[1,20], index: 4, kind: input, shape index: {}]   ;;  %s4436_s5 = inlined_call_operand.vmem [shape: bf16[2,120,20], index: 5, kind: output, shape index: {}]  }
   0x1 LB: > { %s2719_s19 = sadd.s32 4294967295, %s3362_s18   ;;  %p2723_p0 = scmp.ge.s32.totalorder %s3362_s18, 1  ;;  %s3362_s18 = sphi %s3396_s18, %s15_s18  }
   0x2   : > { %p187_p1 = scmp.lt.s32.totalorder %s3362_s18, 3 }
   0x4   : > { %p188_p2 = pnand %p2723_p0, %p187_p1 }
   0x6   : > { %191 = sbr.rel (%p188_p2) target bundleno = 779 (0x30b), region = 40 }
   0xb   : > { %v3309_v0 = vld [vmem:[%s4432_s1 + $0x8] sm:$0x1f]   ;;  %vm602_vm0 = vcmask 1043456   ;;  %vm603_vm1 = vcmask 1044480   ;;  %v3364_v1 = vmov 65535   ;;  %p215_p3 = scmp.lt.s32.totalorder %s2719_s19, 1 }
   0xc   : > { %v604_v2 = vsel %vm602_vm0, 4294967295, %v3364_v1  ;;  %v3310_v5 = vld [vmem:[%s4432_s1] sm:$0xff]   ;;  %vm493_vm2 = vcmask 203776   ;;  %v3347_v43 = vld [vmem:[%s4434_s3 + $0x28] sm:$0x1f]   ;;  %vm1879_vm3 = vcmask 1040384  }
   0xd   : > { %v605_v3 = vsel %vm603_vm1, %v604_v2, 0  ;;  %s4508_s19 = smov (!%p215_p3, %s2719_s19), 1  ;;  %v1927_v45 = vsel %vm603_vm1, %v3347_v43, 0  ;;  %v3348_v46 = vld [vmem:[%s4434_s3 + $0x8] sm:$0x1f]   ;;  %vm1110_vm4 = vcmask 80896  }
   0xe   : > { %v607_v4 = vand.u32 %v3309_v0, %v605_v3  ;;  %s3297_s24 = smul.u32 288, %s4508_s19  ;;  %3288 = vmatprep.subr.msk.bf16.mxu1 %vm603_vm1, %v3348_v46  ;;  %v1136_v48 = vsel %vm603_vm1, %v3348_v46, 0  ;;  %v3523_v55 = vld [vmem:[%s4434_s3] sm:$0x1f]   ;;  %v3547_v2 = vld [vmem:[%s4434_s3 + $0x38] sm:$0x1f]  }
   0xf   : > { %3127 = vmatpush3.bf16.msra.mxu1 %v1136_v48  ;;  %vm1041_vm5 = vsmask.f32 7424  ;;  %vm2205_vm6 = vsmask.f32 3328  ;;  %vm1365_vm7 = vcmask 1046528   ;;  %vm1528_vm8 = vcmask 1041408  }
  0x10   : > { %3050 = vmatprep.subr.bf16.mxu0 %v607_v4  ;;  %s3418_s27 = scalar_lea.vmem %s4431_s0, %s3297_s24  ;;  %3289 = vmatprep.subr.msk.bf16.mxu1 %vm603_vm1, %v3523_v55  ;;  %vm1692_vm9 = vsmask.f32 1280  ;;  %vm2389_vm10 = vcmask 1042432   ;;  %vm2648_vm11 = vcmask 158720  }
  0x11   : > { %3051 = vmatpush3.bf16.msra.mxu0 %v607_v4  ;;  %v3311_v6 = vld [vmem:[%s3418_s27] sm:$0xff]   ;;  %v3312_v7 = vld [vmem:[%s3418_s27 + $0x8] sm:$0xff]   ;;  %v3313_v8 = vld [vmem:[%s3418_s27 + $0x10] sm:$0xff]  }
  0x12   : > { %3052 = vmatprep.subr.bf16.mxu0 %v3310_v5  ;;  %3054 = vmatprep.mubr.msk.bf16.mxu0 %vm493_vm2, %v3311_v6  ;;  %v3314_v9 = vld [vmem:[%s3418_s27 + $0x18] sm:$0xff]   ;;  %v3315_v10 = vld [vmem:[%s3418_s27 + $0x20] sm:$0xff]   ;;  %v3316_v11 = vld [vmem:[%s3418_s27 + $0x28] sm:$0xff]  }
  0x13   : > { %v3317_v12 = vld [vmem:[%s3418_s27 + $0x30] sm:$0xff]   ;;  %v3318_v13 = vld [vmem:[%s3418_s27 + $0x38] sm:$0xff]   ;;  %v3319_v14 = vld [vmem:[%s3418_s27 + $0x40] sm:$0xff]  }
  0x14   : > { %v3320_v15 = vld [vmem:[%s3418_s27 + $0x48] sm:$0xff]   ;;  %v3321_v16 = vld [vmem:[%s3418_s27 + $0x50] sm:$0xff]   ;;  %v3322_v17 = vld [vmem:[%s3418_s27 + $0x58] sm:$0xff]  }
  0x15   : > { %3053 = vmatpush3.bf16.msra.mxu0 %v3310_v5  ;;  %v3323_v18 = vld [vmem:[%s3418_s27 + $0x60] sm:$0xff]   ;;  %v3324_v19 = vld [vmem:[%s3418_s27 + $0x68] sm:$0xff]   ;;  %v3325_v20 = vld [vmem:[%s3418_s27 + $0x70] sm:$0xff]  }
  0x16   : > { %v3326_v21 = vld [vmem:[%s3418_s27 + $0x78] sm:$0xff]   ;;  %v3327_v22 = vld [vmem:[%s3418_s27 + $0x80] sm:$0xff]   ;;  %v3328_v23 = vld [vmem:[%s3418_s27 + $0x88] sm:$0xff]   ;;  %3293 = vmatprep.subr.msk.bf16.mxu0 %vm603_vm1, %v3347_v43 }
  0x17   : > { %v3329_v24 = vld [vmem:[%s3418_s27 + $0x90] sm:$0xff]   ;;  %v3330_v25 = vld [vmem:[%s3418_s27 + $0x98] sm:$0xff]   ;;  %v3331_v26 = vld [vmem:[%s3418_s27 + $0xa0] sm:$0xff]  }
  0x18   : > { %3055 = vmatmul.mubr.msk.bf16.vlgmr.msra.gmra.mxu0 %vm493_vm2, %v3312_v7  ;;  %v3332_v27 = vld [vmem:[%s3418_s27 + $0xa8] sm:$0xff]   ;;  %v3333_v28 = vld [vmem:[%s3418_s27 + $0xb0] sm:$0xff]   ;;  %v3334_v29 = vld [vmem:[%s3418_s27 + $0xb8] sm:$0xff]  }
  0x19   : > { %3058 = vmatprep.mubr.msk.bf16.mxu0 %vm493_vm2, %v3313_v8  ;;  %v3335_v30 = vld [vmem:[%s3418_s27 + $0xc0] sm:$0xff]   ;;  %v3336_v31 = vld [vmem:[%s3418_s27 + $0xc8] sm:$0xff]   ;;  %v3337_v32 = vld [vmem:[%s3418_s27 + $0xd0] sm:$0xff]   ;;  %3217 = vmatpush3.bf16.msra.mxu0 %v1927_v45 }
  0x1a   : > { %v3338_v33 = vld [vmem:[%s3418_s27 + $0xd8] sm:$0xff]   ;;  %v3339_v34 = vld [vmem:[%s3418_s27 + $0xe0] sm:$0xff]   ;;  %v3340_v35 = vld [vmem:[%s3418_s27 + $0xe8] sm:$0xff]   ;;  %3295 = vmatprep.subr.msk.bf16.mxu0 %vm603_vm1, %v3547_v2 }
  0x1b   : > { %v3341_v36 = vld [vmem:[%s3418_s27 + $0xf0] sm:$0xff]   ;;  %v3342_v37 = vld [vmem:[%s3418_s27 + $0xf8] sm:$0xff]   ;;  %v3343_v38 = vld [vmem:[%s3418_s27 + $0x100] sm:$0xff]  }
  0x1c   : > { %v3344_v39 = vld [vmem:[%s3418_s27 + $0x108] sm:$0xff]   ;;  %v3345_v40 = vld [vmem:[%s3418_s27 + $0x110] sm:$0xff]   ;;  %v3346_v41 = vld [vmem:[%s3418_s27 + $0x118] sm:$0xff]   ;;  %s3298_s27 = smul.u32 60, %s4508_s19 }
  0x1e   : > { %s4349_s29 = scalar_lea.vmem %s4436_s5, %s3298_s27 }
  0x20   : > { %3059 = vmatmul.mubr.msk.bf16.gmra.mxu0 %vm493_vm2, %v3314_v9 }
  0x21   : > { %3062 = vmatprep.mubr.msk.bf16.mxu0 %vm493_vm2, %v3315_v10 }
  0x28   : > { %3063 = vmatmul.mubr.msk.bf16.gmra.mxu0 %vm493_vm2, %v3316_v11 }
  0x29   : > { %3066 = vmatprep.mubr.msk.bf16.mxu0 %vm493_vm2, %v3317_v12 }
  0x30   : > { %3067 = vmatmul.mubr.msk.bf16.gmra.mxu0 %vm493_vm2, %v3318_v13 }
  0x31   : > { %3070 = vmatprep.mubr.msk.bf16.mxu0 %vm493_vm2, %v3319_v14 }
  0x38   : > { %3071 = vmatmul.mubr.msk.bf16.gmra.mxu0 %vm493_vm2, %v3320_v15 }
  0x39   : > { %3074 = vmatprep.mubr.msk.bf16.mxu0 %vm493_vm2, %v3321_v16 }
  0x40   : > { %3075 = vmatmul.mubr.msk.bf16.gmra.mxu0 %vm493_vm2, %v3322_v17 }
  0x41   : > { %3078 = vmatprep.mubr.msk.bf16.mxu0 %vm493_vm2, %v3323_v18 }
  0x48   : > { %3079 = vmatmul.mubr.msk.bf16.gmra.mxu0 %vm493_vm2, %v3324_v19 }
  0x49   : > { %3082 = vmatprep.mubr.msk.bf16.mxu0 %vm493_vm2, %v3325_v20 }
  0x50   : > { %3083 = vmatmul.mubr.msk.bf16.gmra.mxu0 %vm493_vm2, %v3326_v21  ;;  %v3641_v21 = vld [vmem:[%s4433_s2] ss:$0 sm:$0xff] }
  0x51   : > { %3086 = vmatprep.mubr.msk.bf16.mxu0 %vm493_vm2, %v3327_v22 }
  0x58   : > { %3087 = vmatmul.mubr.msk.bf16.gmra.mxu0 %vm493_vm2, %v3328_v23 }
  0x59   : > { %3090 = vmatprep.mubr.msk.bf16.mxu0 %vm493_vm2, %v3329_v24 }
  0x60   : > { %3091 = vmatmul.mubr.msk.bf16.gmra.mxu0 %vm493_vm2, %v3330_v25 }
  0x61   : > { %3094 = vmatprep.mubr.msk.bf16.mxu0 %vm493_vm2, %v3331_v26 }
  0x68   : > { %3095 = vmatmul.mubr.msk.bf16.gmra.mxu0 %vm493_vm2, %v3332_v27 }
  0x69   : > { %3098 = vmatprep.mubr.msk.bf16.mxu0 %vm493_vm2, %v3333_v28 }
  0x70   : > { %3099 = vmatmul.mubr.msk.bf16.gmra.mxu0 %vm493_vm2, %v3334_v29 }
  0x71   : > { %3102 = vmatprep.mubr.msk.bf16.mxu0 %vm493_vm2, %v3335_v30 }
  0x78   : > { %3103 = vmatmul.mubr.msk.bf16.gmra.mxu0 %vm493_vm2, %v3336_v31 }
  0x79   : > { %3106 = vmatprep.mubr.msk.bf16.mxu0 %vm493_vm2, %v3337_v32 }
  0x80   : > { %3107 = vmatmul.mubr.msk.bf16.gmra.mxu0 %vm493_vm2, %v3338_v33 }
  0x81   : > { %3110 = vmatprep.mubr.msk.bf16.mxu0 %vm493_vm2, %v3339_v34 }
  0x88   : > { %3111 = vmatmul.mubr.msk.bf16.gmra.mxu0 %vm493_vm2, %v3340_v35 }
  0x89   : > { %3114 = vmatprep.mubr.msk.bf16.mxu0 %vm493_vm2, %v3341_v36 }
  0x90   : > { %3115 = vmatmul.mubr.msk.bf16.gmra.mxu0 %vm493_vm2, %v3342_v37 }
  0x91   : > { %3118 = vmatprep.mubr.msk.bf16.mxu0 %vm493_vm2, %v3343_v38 }
  0x98   : > { %3119 = vmatmul.mubr.msk.bf16.gmra.mxu0 %vm493_vm2, %v3344_v39 }
  0x99   : > { %3122 = vmatprep.mubr.msk.bf16.mxu0 %vm493_vm2, %v3345_v40 }
  0xa0   : > { %3123 = vmatmul.mubr.msk.bf16.gmra.mxu0 %vm493_vm2, %v3346_v41 }
  0xd8   : > { %v3492_v42 = vpop.f32.mrf.mxu0 }
  0xda   : > { %v3497_v44 = vpop.f32.mrf.mxu0 }
  0xdc   : > { %v3504_v47 = vpop.f32.mrf.mxu0 }
  0xde   : > { %v3508_v49 = vpop.f32.mrf.mxu0 }
  0xe0   : > { %v3510_v50 = vpop.f32.mrf.mxu0 }
  0xe2   : > { %v3512_v51 = vpop.f32.mrf.mxu0 }
  0xe4   : > { %v3514_v52 = vpop.f32.mrf.mxu0 }
  0xe6   : > { %v3516_v53 = vpop.f32.mrf.mxu0 }
  0xe8   : > { %v3518_v54 = vpop.f32.mrf.mxu0 }
  0xea   : > { %v3525_v56 = vpop.f32.mrf.mxu0 }
  0xec   : > { %v3529_v57 = vpop.f32.mrf.mxu0 }
  0xee   : > { %v3531_v58 = vpop.f32.mrf.mxu0 }
  0xf0   : > { %v3533_v59 = vpop.f32.mrf.mxu0 }
  0xf2   : > { %v3535_v60 = vpop.f32.mrf.mxu0 }
  0xf4   : > { %v3537_v61 = vpop.f32.mrf.mxu0 }
  0xf5   : > { %4441 = vst [vmem:[#allocation2_spill] sm:$0xff] %v3537_v61 }
  0xf6   : > { %v3539_v62 = vpop.f32.mrf.mxu0 }
  0xf8   : > { %v3072_v63 = vpop.f32.mrf.mxu0 }
  0xf9   : > { %v930_v0 = vmax.f32 %v3497_v44, %v3072_v63 }
  0xfa   : > { %v3542_v1 = vpop.f32.mrf.mxu0 }
  0xfc   : > { %v3073_v3 = vpop.f32.mrf.mxu0 }
  0xfd   : > { %v931_v4 = vmax.f32 %v3508_v49, %v3073_v3 }
  0xfe   : > { %v3552_v5 = vpop.f32.mrf.mxu0 }
  0xff   : > { %4442 = vst [vmem:[#allocation3_spill] sm:$0xff] %v3552_v5 }
 0x100   : > { %v3554_v6 = vpop.f32.mrf.mxu0 }
 0x102   : > { %v3558_v8 = vpop.f32.mrf.mxu0 }
 0x104   : > { %v3562_v10 = vpop.f32.mrf.mxu0 }
 0x106   : > { %v3566_v12 = vpop.f32.mrf.mxu0 }
 0x108   : > { %v3570_v14 = vpop.f32.mrf.mxu0 }
 0x10a   : > { %v3574_v16 = vpop.f32.mrf.mxu0 }
 0x10c   : > { %v3578_v18 = vpop.f32.mrf.mxu0 }
 0x10e   : > { %v3582_v20 = vpop.f32.mrf.mxu0 }
 0x110   : > { %v3586_v22 = vpop.f32.mrf.mxu0 }
 0x112   : > { %v3590_v24 = vpop.f32.mrf.mxu0 }
 0x114   : > { %v3594_v26 = vpop.f32.mrf.mxu0 }
 0x116   : > { %v3598_v28 = vpop.f32.mrf.mxu0 }
 0x118   : > { %v3602_v30 = vpop.f32.mrf.mxu0 }
 0x11a   : > { %v3606_v32 = vpop.f32.mrf.mxu0 }
 0x11c   : > { %v3610_v34 = vpop.f32.mrf.mxu0 }
 0x11d   : > { %4443 = vst [vmem:[#allocation4_spill] sm:$0xff] %v3610_v34 }
 0x11e   : > { %v3614_v36 = vpop.f32.mrf.mxu0 }
 0x11f   : > { %4444 = vst [vmem:[#allocation5_spill] sm:$0xff] %v3614_v36 }
 0x120   : > { %v3092_v38 = vpop.f32.mrf.mxu0 }
 0x122   : > { %v787_v39 = vpop.f32.mrf.mxu0 }
 0x124   : > { %v3093_v40 = vpop.f32.mrf.mxu0 }
 0x126   : > { %v790_v41 = vpop.f32.mrf.mxu0 }
 0x128   : > { %v3618_v43 = vpop.f32.mrf.mxu0 }
 0x12a   : > { %v803_v44 = vpop.f32.mrf.mxu0 }
 0x12c   : > { %v3620_v45 = vpop.f32.mrf.mxu0 }
 0x12e   : > { %v806_v46 = vpop.f32.mrf.mxu0 }
 0x130   : > { %v3622_v48 = vpop.f32.mrf.mxu0 }
 0x132   : > { %v819_v49 = vpop.f32.mrf.mxu0 }
 0x134   : > { %v3624_v63 = vpop.f32.mrf.mxu0 }
 0x136   : > { %v3626_v3 = vpop.f32.mrf.mxu0 }
 0x138   : > { %v3628_v35 = vpop.f32.mrf.mxu0 }
 0x13a   : > { %v3630_v37 = vpop.f32.mrf.mxu0 }
 0x13c   : > { %v3632_v33 = vpop.f32.mrf.mxu0 }
 0x13d   : > { %4445 = vst [vmem:[#allocation6_spill] sm:$0xff] %v3632_v33 }
 0x13e   : > { %v3634_v31 = vpop.f32.mrf.mxu0 }
 0x140   : > { %v3108_v29 = vpop.f32.mrf.mxu0 }
 0x141   : > { %v948_v27 = vmax.f32 %v787_v39, %v3108_v29 }
 0x142   : > { %v3636_v25 = vpop.f32.mrf.mxu0 }
 0x143   : > { %v966_v23 = vmax.f32 %v930_v0, %v948_v27  ;;  %v4446_v0 = vmax.f32 %v3512_v51, %v3554_v6  ;;  %v4448_v51 = vmax.f32 %v3516_v53, %v3562_v10  ;;  %v4449_v10 = vmax.f32 %v3504_v47, %v3566_v12 }
 0x144   : > { %v3109_v19 = vpop.f32.mrf.mxu0  ;;  %v4450_v47 = vmax.f32 %v3525_v56, %v3570_v14 }
 0x145   : > { %v949_v17 = vmax.f32 %v790_v41, %v3109_v19  ;;  %v991_v13 = vadd.f32 %v3641_v21, %v966_v23  ;;  %v4447_v19 = vmax.f32 %v3492_v42, %v3558_v8 }
 0x146   : > { %v3643_v15 = vpop.f32.mrf.mxu0 }
 0x147   : > { %v967_v11 = vmax.f32 %v931_v4, %v949_v17  ;;  %v1009_v39 = vmax.f32 %v991_v13, 0.0 }
 0x148   : > { %v3112_v9 = vpop.f32.mrf.mxu0 }
 0x149   : > { %v992_v7 = vadd.f32 %v3641_v21, %v967_v11  ;;  %v952_v36 = vmax.f32 %v803_v44, %v3112_v9  ;;  %v3658_v9 = vld [vmem:[%s4434_s3 + $0x10] sm:$0x1f]  }
 0x14a   : > { %v867_v29 = vpop.f32.mrf.mxu0 }
 0x14b   : > { %v1010_v61 = vmax.f32 %v992_v7, 0.0  ;;  %v970_v27 = vmax.f32 %v4446_v0, %v952_v36  ;;  %v950_v33 = vmax.f32 %v3092_v38, %v867_v29  ;;  %v3681_v38 = vsel %vm603_vm1, %v3658_v9, 0 }
 0x14c   : > { %v3113_v34 = vpop.f32.mrf.mxu0 }
 0x14d   : > { %v3650_v5 = vpack.c.bf16 %v1010_v61, %v1009_v39  ;;  %v968_v23 = vmax.f32 %v4447_v19, %v950_v33  ;;  %v953_v4 = vmax.f32 %v806_v46, %v3113_v34  ;;  %v995_v7 = vadd.f32 %v3641_v21, %v970_v27 }
 0x14e   : > { %v870_v11 = vpop.f32.mrf.mxu0  ;;  %v3666_v61 = vsel %vm603_vm1, %v3523_v55, 0  ;;  %v3673_v34 = vsel %vm603_vm1, %v3547_v2, 0 }
 0x14f   : > { %v971_v6 = vmax.f32 %v4448_v51, %v953_v4  ;;  %v951_v13 = vmax.f32 %v3093_v40, %v870_v11  ;;  %v993_v42 = vadd.f32 %v3641_v21, %v968_v23  ;;  %v1043_v17 = vshrl.u32 %v3650_v5, 16 }
 0x150   : > { %v3116_v8 = vpop.f32.mrf.mxu0  ;;  %v1045_v33 = vshll.u32 %v3650_v5, 16  ;;  %v1013_v40 = vmax.f32 %v995_v7, 0.0  ;;  %v1880_v19 = vrot.slane %v3650_v5, 7  ;;  %v4451_v51 = vmax.f32 %v3510_v50, %v3574_v16 }
 0x151   : > { %v996_v53 = vadd.f32 %v3641_v21, %v971_v6  ;;  %v969_v36 = vmax.f32 %v4449_v10, %v951_v13  ;;  %v956_v55 = vmax.f32 %v819_v49, %v3116_v8  ;;  %v3683_v46 = vrot.slane %v1043_v17, 6 }
 0x152   : > { %v883_v41 = vpop.f32.mrf.mxu0  ;;  %v1047_v44 = vrot.slane %v1045_v33, 1  ;;  %v3685_v29 = vrot.slane %v1045_v33, 7  ;;  %v1011_v0 = vmax.f32 %v993_v42, 0.0  ;;  %v1366_v13 = vrot.slane %v3650_v5, 1 }
 0x153   : > { %v1014_v2 = vmax.f32 %v996_v53, 0.0  ;;  %v994_v39 = vadd.f32 %v3641_v21, %v969_v36  ;;  %v974_v12 = vmax.f32 %v4450_v47, %v956_v55  ;;  %v954_v49 = vmax.f32 %v3618_v43, %v883_v41 }
 0x154   : > { %v3117_v27 = vpop.f32.mrf.mxu0  ;;  %v1695_v23 = vor.u32 %v3685_v29, %v3683_v46  ;;  %v1048_v6 = vor.u32 %v1047_v44, %v1043_v17  ;;  %v1529_v42 = vrot.slane %v3650_v5, 6  ;;  %v4452_v36 = vmax.f32 %v3531_v58, %v3578_v18 }
 0x155   : > { %v3695_v4 = vpack.c.bf16 %v1014_v2, %v1013_v40  ;;  %v1012_v7 = vmax.f32 %v994_v39, 0.0  ;;  %v999_v11 = vadd.f32 %v3641_v21, %v974_v12  ;;  %v972_v56 = vmax.f32 %v4451_v51, %v954_v49 }
 0x156   : > { %v957_v14 = vmax.f32 %v3626_v3, %v3117_v27  ;;  %v886_v43 = vpop.f32.mrf.mxu0  ;;  %v4453_v41 = vmax.f32 %v3514_v52, %v3582_v20  ;;  %v4454_v52 = vmax.f32 %v3535_v60, %v3586_v22  ;;  %v4455_v60 = vmax.f32 %v3518_v54, %v3590_v24 }
 0x157   : > { %v3704_v8 = vpack.c.bf16 %v1012_v7, %v1011_v0  ;;  %v1017_v33 = vmax.f32 %v999_v11, 0.0  ;;  %v997_v53 = vadd.f32 %v3641_v21, %v972_v56  ;;  %v955_v10 = vmax.f32 %v3620_v45, %v886_v43 }
 0x158   : > { %v975_v50 = vmax.f32 %v4452_v36, %v957_v14  ;;  %v3120_v16 = vpop.f32.mrf.mxu0  ;;  %v1883_v3 = vrot.slane %v3695_v4, 7  ;;  %v3713_v17 = vshll.u32 %v3695_v4, 16  ;;  %v3716_v55 = vshrl.u32 %v3695_v4, 16 }
 0x159   : > { %v1015_v40 = vmax.f32 %v997_v53, 0.0  ;;  %v973_v44 = vmax.f32 %v4453_v41, %v955_v10  ;;  %v960_v45 = vmax.f32 %v3630_v37, %v3120_v16  ;;  %v1881_v2 = vrot.slane %v3704_v8, 7 }
 0x15a   : > { %v1000_v58 = vadd.f32 %v3641_v21, %v975_v50  ;;  %v899_v18 = vpop.f32.mrf.mxu0  ;;  %v3725_v39 = vshll.u32 %v3704_v8, 16  ;;  %v3728_v47 = vshrl.u32 %v3704_v8, 16  ;;  %v1060_v12 = vrot.slane %v3713_v17, 1 }
 0x15b   : > { %v998_v49 = vadd.f32 %v3641_v21, %v973_v44  ;;  %v978_v20 = vmax.f32 %v4454_v52, %v960_v45  ;;  %v958_v37 = vmax.f32 %v3622_v48, %v899_v18  ;;  %v1882_v0 = vsel %vm1879_vm3, %v1880_v19, %v1881_v2 }
 0x15c   : > { %v1018_v27 = vmax.f32 %v1000_v58, 0.0  ;;  %v3121_v7 = vpop.f32.mrf.mxu0  ;;  %3218 = vmatprep.mubr.msk.bf16.mxu0 %vm1110_vm4, %v1882_v0  ;;  %v1884_v11 = vsel %vm1879_vm3, %v1881_v2, %v1883_v3  ;;  %v1052_v51 = vrot.slane %v3725_v39, 1  ;;  %v1064_v56 = vor.u32 %v3716_v55, %v1060_v12 }
 0x15d   : > { %v1016_v14 = vmax.f32 %v998_v49, 0.0  ;;  %v1003_v43 = vadd.f32 %v3641_v21, %v978_v20  ;;  %v976_v22 = vmax.f32 %v4455_v60, %v958_v37  ;;  %v961_v48 = vmax.f32 %v3634_v31, %v3121_v7  ;;  %3219 = vmatmul.mubr.msk.bf16.vlgmr.msra.gmra.mxu0 %vm1110_vm4, %v1884_v11 }
 0x15e   : > { %v3747_v19 = vpack.c.bf16 %v1018_v27, %v1017_v33  ;;  %v902_v53 = vpop.f32.mrf.mxu0  ;;  %v1053_v10 = vsel %vm1041_vm5, %v1048_v6, %v1052_v51  ;;  %v1056_v36 = vor.u32 %v3728_v47, %v1052_v51  ;;  %v2206_v50 = vrot.slane %v3728_v47, 4  ;;  %3253 = vmatpush3.bf16.msra.mxu0 %v3673_v34 }
 0x15f   : > { %v3753_v16 = vpack.c.bf16 %v1016_v14, %v1015_v40  ;;  %v1021_v41 = vmax.f32 %v1003_v43, 0.0  ;;  %v1001_v54 = vadd.f32 %v3641_v21, %v976_v22  ;;  %v4456_v24 = vmax.f32 %v3539_v62, %v3594_v26  ;;  %3128 = vmatprep.mubr.msk.bf16.mxu1 %vm1110_vm4, %v1053_v10  ;;  %v4460_v10 = vld [vmem:[#allocation3_spill] sm:$0xff] }
 0x160   : > { %v959_v33 = vmax.f32 %v3624_v63, %v902_v53  ;;  %v3124_v6 = vpop.f32.mrf.mxu0  ;;  %v1061_v44 = vsel %vm1041_vm5, %v1056_v36, %v1060_v12  ;;  %v1887_v45 = vrot.slane %v3747_v19, 7  ;;  %v3764_v34 = vshll.u32 %v3747_v19, 16  ;;  %v4461_v36 = vld [vmem:[#allocation4_spill] sm:$0xff] }
 0x161   : > { %v979_v31 = vmax.f32 %v4456_v24, %v961_v48  ;;  %v1019_v40 = vmax.f32 %v1001_v54, 0.0  ;;  %v964_v58 = vmax.f32 %v3636_v25, %v3124_v6  ;;  %3129 = vmatmul.mubr.msk.bf16.vlgmr.msra.gmra.mxu1 %vm1110_vm4, %v1061_v44  ;;  %v1885_v62 = vrot.slane %v3753_v16, 7  ;;  %v4464_v44 = vld [vmem:[#allocation2_spill] sm:$0xff] }
 0x162   : > { %v4457_v26 = vmax.f32 %v3529_v57, %v3598_v28  ;;  %3145 = vmatpush3.bf16.msra.mxu1 %v3666_v61  ;;  %v915_v18 = vpop.f32.mrf.mxu0  ;;  %v3775_v12 = vshll.u32 %v3753_v16, 16  ;;  %v3778_v49 = vshrl.u32 %v3753_v16, 16  ;;  %v1076_v52 = vrot.slane %v3764_v34, 1 }
 0x163   : > { %v1004_v2 = vadd.f32 %v3641_v21, %v979_v31  ;;  %v4458_v20 = vmax.f32 %v3542_v1, %v3602_v30  ;;  %v962_v0 = vmax.f32 %v3628_v35, %v915_v18  ;;  %v1886_v57 = vsel %vm1879_vm3, %v1883_v3, %v1885_v62  ;;  %3290 = vmatprep.subr.msk.bf16.mxu1 %vm603_vm1, %v3658_v9 }
 0x164   : > { %v977_v63 = vmax.f32 %v4457_v26, %v959_v33  ;;  %v3125_v61 = vpop.f32.mrf.mxu0  ;;  %3222 = vmatprep.mubr.msk.bf16.mxu0 %vm1110_vm4, %v1886_v57  ;;  %v1888_v27 = vsel %vm1879_vm3, %v1885_v62, %v1887_v45  ;;  %v1068_v7 = vrot.slane %v3775_v12, 1  ;;  %v3793_v11 = vshrl.u32 %v3747_v19, 16 }
 0x165   : > { %v1022_v25 = vmax.f32 %v1004_v2, 0.0  ;;  %v982_v37 = vmax.f32 %v4458_v20, %v964_v58  ;;  %v4459_v35 = vmax.f32 %v3533_v59, %v3606_v32  ;;  %v965_v3 = vmax.f32 %v3643_v15, %v3125_v61  ;;  %3223 = vmatmul.mubr.msk.bf16.gmra.mxu0 %vm1110_vm4, %v1888_v27  ;;  %v4465_v2 = vld [vmem:[#allocation5_spill] sm:$0xff] }
 0x166   : > { %v1002_v28 = vadd.f32 %v3641_v21, %v977_v63  ;;  %v918_v14 = vpop.f32.mrf.mxu0  ;;  %v1069_v43 = vsel %vm1041_vm5, %v1064_v56, %v1068_v7  ;;  %v1072_v60 = vor.u32 %v3778_v49, %v1068_v7  ;;  %v1080_v22 = vor.u32 %v3793_v11, %v1076_v52 }
 0x167   : > { %v3795_v1 = vpack.c.bf16 %v1022_v25, %v1021_v41  ;;  %v1007_v30 = vadd.f32 %v3641_v21, %v982_v37  ;;  %v980_v9 = vmax.f32 %v4459_v35, %v962_v0  ;;  %v4462_v59 = vmax.f32 %v4460_v10, %v4461_v36  ;;  %v4463_v41 = vld [vmem:[#allocation6_spill] sm:$0xff]  ;;  %3132 = vmatprep.mubr.msk.bf16.mxu1 %vm1110_vm4, %v1069_v43 }
 0x168   : > { %v1020_v51 = vmax.f32 %v1002_v28, 0.0  ;;  %v963_v15 = vmax.f32 %v4463_v41, %v918_v14  ;;  %v1077_v56 = vsel %vm1041_vm5, %v1072_v60, %v1076_v52  ;;  %v4466_v58 = vmax.f32 %v4464_v44, %v4465_v2 }
 0x169   : > { %v1025_v48 = vmax.f32 %v1007_v30, 0.0  ;;  %v1005_v53 = vadd.f32 %v3641_v21, %v980_v9  ;;  %v983_v32 = vmax.f32 %v4462_v59, %v965_v3  ;;  %v1891_v24 = vrot.slane %v3795_v1, 7  ;;  %3133 = vmatmul.mubr.msk.bf16.gmra.mxu1 %vm1110_vm4, %v1077_v56 }
 0x16a   : > { %v3812_v54 = vpack.c.bf16 %v1020_v51, %v1019_v40  ;;  %v3817_v31 = vshll.u32 %v3795_v1, 16  ;;  %v981_v62 = vmax.f32 %v4466_v58, %v963_v15  ;;  %v3825_v26 = vshrl.u32 %v3795_v1, 16 }
 0x16b   : > { %v1023_v33 = vmax.f32 %v1005_v53, 0.0  ;;  %v1008_v6 = vadd.f32 %v3641_v21, %v983_v32  ;;  %v2207_v37 = vrot.slane %v3725_v39, 5  ;;  %v2209_v0 = vrot.slane %v3716_v55, 4 }
 0x16c   : > { %v1889_v40 = vrot.slane %v3812_v54, 7  ;;  %v3829_v63 = vshll.u32 %v3812_v54, 16  ;;  %v3832_v18 = vshrl.u32 %v3812_v54, 16  ;;  %v1092_v52 = vrot.slane %v3817_v31, 1 }
 0x16d   : > { %v1026_v25 = vmax.f32 %v1008_v6, 0.0  ;;  %v1006_v20 = vadd.f32 %v3641_v21, %v981_v62  ;;  %v2208_v21 = vor.u32 %v2207_v37, %v2206_v50  ;;  %v2210_v35 = vrot.slane %v3713_v17, 5 }
 0x16e   : > { %v1890_v57 = vsel %vm1879_vm3, %v1887_v45, %v1889_v40  ;;  %v1892_v28 = vsel %vm1879_vm3, %v1889_v40, %v1891_v24  ;;  %v1084_v61 = vrot.slane %v3829_v63, 1  ;;  %v1096_v27 = vor.u32 %v3825_v26, %v1092_v52 }
 0x16f   : > { %v3842_v7 = vpack.c.bf16 %v1026_v25, %v1025_v48  ;;  %v1024_v30 = vmax.f32 %v1006_v20, 0.0  ;;  %3226 = vmatprep.mubr.msk.bf16.mxu0 %vm1110_vm4, %v1890_v57  ;;  %v2213_v3 = vrot.slane %v3778_v49, 4  ;;  %v2214_v51 = vrot.slane %v3775_v12, 5 }
 0x170   : > { %3227 = vmatmul.mubr.msk.bf16.gmra.mxu0 %vm1110_vm4, %v1892_v28  ;;  %v1085_v45 = vsel %vm1041_vm5, %v1080_v22, %v1084_v61  ;;  %v1088_v9 = vor.u32 %v3832_v18, %v1084_v61  ;;  %v2211_v50 = vor.u32 %v2210_v35, %v2209_v0  ;;  %v2217_v60 = vrot.slane %v3793_v11, 4 }
 0x171   : > { %v3853_v14 = vpack.c.bf16 %v1024_v30, %v1023_v33  ;;  %3136 = vmatprep.mubr.msk.bf16.mxu1 %vm1110_vm4, %v1085_v45  ;;  %v1895_v43 = vrot.slane %v3842_v7, 7  ;;  %v2215_v53 = vor.u32 %v2214_v51, %v2213_v3  ;;  %v2218_v22 = vrot.slane %v3764_v34, 5 }
 0x172   : > { %v1093_v48 = vsel %vm1041_vm5, %v1088_v9, %v1092_v52  ;;  %v2221_v10 = vrot.slane %v3832_v18, 4  ;;  %v2212_v32 = vsel %vm2205_vm6, %v2208_v21, %v2211_v50  ;;  %v2222_v33 = vrot.slane %v3829_v63, 5 }
 0x173   : > { %3137 = vmatmul.mubr.msk.bf16.gmra.mxu1 %vm1110_vm4, %v1093_v48  ;;  %v1893_v36 = vrot.slane %v3853_v14, 7  ;;  %v3864_v59 = vshll.u32 %v3853_v14, 16  ;;  %v3868_v41 = vshrl.u32 %v3853_v14, 16  ;;  %v2216_v15 = vsel %vm2205_vm6, %v2211_v50, %v2215_v53 }
 0x174   : > { %v2219_v56 = vor.u32 %v2218_v22, %v2217_v60  ;;  %v2225_v6 = vrot.slane %v3825_v26, 4  ;;  %v2226_v62 = vrot.slane %v3817_v31, 5  ;;  %v2223_v52 = vor.u32 %v2222_v33, %v2221_v10 }
 0x175   : > { %v1894_v44 = vsel %vm1879_vm3, %v1891_v24, %v1893_v36  ;;  %v1896_v2 = vsel %vm1879_vm3, %v1893_v36, %v1895_v43  ;;  %v1100_v58 = vrot.slane %v3864_v59, 1  ;;  %v2229_v25 = vrot.slane %v3868_v41, 4 }
 0x176   : > { %3230 = vmatprep.mubr.msk.bf16.mxu0 %vm1110_vm4, %v1894_v44  ;;  %v2220_v40 = vsel %vm2205_vm6, %v2215_v53, %v2219_v56  ;;  %v2230_v20 = vrot.slane %v3864_v59, 5  ;;  %v2227_v24 = vor.u32 %v2226_v62, %v2225_v6  ;;  %v1725_v57 = vshrl.u32 %v3842_v7, 16 }
 0x177   : > { %v1101_v37 = vsel %vm1041_vm5, %v1096_v27, %v1100_v58  ;;  %v1104_v0 = vor.u32 %v3868_v41, %v1100_v58  ;;  %v3887_v28 = vsel %vm2205_vm6, %v2219_v56, %v2223_v52  ;;  %v1728_v30 = vshll.u32 %v3842_v7, 16 }
 0x178   : > { %3231 = vmatmul.mubr.msk.bf16.gmra.mxu0 %vm1110_vm4, %v1896_v2  ;;  %3140 = vmatprep.mubr.msk.bf16.mxu1 %vm1110_vm4, %v1101_v37  ;;  %v2231_v61 = vor.u32 %v2230_v20, %v2229_v25  ;;  %v1367_v21 = vrot.slane %v3704_v8, 1  ;;  %v3893_v27 = vsel %vm2205_vm6, %v2223_v52, %v2227_v24  ;;  %v2233_v35 = vrot.slane %v1725_v57, 4 }
 0x179   : > { %3254 = vmatprep.mubr.msk.bf16.mxu0 %vm1110_vm4, %v2212_v32  ;;  %v1369_v45 = vrot.slane %v3695_v4, 1  ;;  %v1371_v9 = vrot.slane %v3753_v16, 1  ;;  %v2234_v51 = vrot.slane %v1728_v30, 5  ;;  %v1373_v50 = vrot.slane %v3747_v19, 1 }
 0x17a   : > { %v3900_v3 = vsel %vm2205_vm6, %v2227_v24, %v2231_v61  ;;  %v3907_v43 = vsel %vm1365_vm7, %v1366_v13, %v1367_v21  ;;  %v1375_v53 = vrot.slane %v3812_v54, 1  ;;  %v1377_v22 = vrot.slane %v3795_v1, 1 }
 0x17b   : > { %3141 = vmatmul.mubr.msk.bf16.gmra.mxu1 %vm1110_vm4, %v1104_v0  ;;  %v3912_v60 = vsel %vm1365_vm7, %v1367_v21, %v1369_v45  ;;  %v3915_v48 = vsel %vm1365_vm7, %v1369_v45, %v1371_v9  ;;  %v3921_v10 = vor.u32 %v2234_v51, %v2233_v35  ;;  %v3924_v13 = vsel %vm1365_vm7, %v1371_v9, %v1373_v50 }
 0x17c   : > { %3146 = vmatprep.mubr.msk.bf16.mxu1 %vm1110_vm4, %v3650_v5  ;;  %v1379_v36 = vrot.slane %v3853_v14, 1  ;;  %v1530_v32 = vrot.slane %v3704_v8, 6  ;;  %v3929_v56 = vsel %vm1365_vm7, %v1373_v50, %v1375_v53  ;;  %v3932_v33 = vsel %vm1365_vm7, %v1375_v53, %v1377_v22 }
 0x17d   : > { %v1532_v6 = vrot.slane %v3695_v4, 6  ;;  %v1534_v44 = vrot.slane %v3753_v16, 6  ;;  %v3938_v2 = vsel %vm2205_vm6, %v2231_v61, %v3921_v10  ;;  %v1536_v20 = vrot.slane %v3747_v19, 6  ;;  %v3967_v61 = vld [vmem:[%s4434_s3 + $0x18] sm:$0x1f]  }
 0x17e   : > { %v3943_v58 = vsel %vm1365_vm7, %v1377_v22, %v1379_v36  ;;  %v3948_v62 = vsel %vm1528_vm8, %v1529_v42, %v1530_v32  ;;  %v1538_v37 = vrot.slane %v3812_v54, 6  ;;  %v1540_v0 = vrot.slane %v3795_v1, 6 }
 0x17f   : > { %v3951_v52 = vsel %vm1528_vm8, %v1530_v32, %v1532_v6  ;;  %v3954_v25 = vsel %vm1528_vm8, %v1532_v6, %v1534_v44  ;;  %v1542_v5 = vrot.slane %v3853_v14, 6  ;;  %v1544_v42 = vrot.slane %v3842_v7, 6 }
 0x180   : > { %3255 = vmatmul.mubr.msk.bf16.vlgmr.msra.gmra.mxu0 %vm1110_vm4, %v2216_v15  ;;  %v1696_v24 = vrot.slane %v3728_v47, 6  ;;  %v3970_v21 = vsel %vm1528_vm8, %v1534_v44, %v1536_v20  ;;  %v3973_v15 = vsel %vm1528_vm8, %v1536_v20, %v1538_v37  ;;  %v1697_v35 = vrot.slane %v3725_v39, 7 }
 0x181   : > { %3258 = vmatprep.mubr.msk.bf16.mxu0 %vm1110_vm4, %v2220_v40  ;;  %v1700_v45 = vrot.slane %v3716_v55, 6  ;;  %v3978_v9 = vsel %vm1528_vm8, %v1538_v37, %v1540_v0  ;;  %v3981_v47 = vsel %vm1528_vm8, %v1540_v0, %v1542_v5  ;;  %v3984_v40 = vsel %vm1528_vm8, %v1542_v5, %v1544_v42 }
 0x182   : > { %v1701_v51 = vrot.slane %v3713_v17, 7  ;;  %v3365_v50 = vmov 0   ;;  %v1698_v39 = vor.u32 %v1697_v35, %v1696_v24  ;;  %v1704_v55 = vrot.slane %v3778_v49, 6 }
 0x183   : > { %3147 = vmatmul.mubr.msk.bf16.vlgmr.msra.gmra.mxu1 %vm1110_vm4, %v3704_v8  ;;  %v3989_v53 = vrot.slane %v3365_v50, 5  ;;  %v1705_v22 = vrot.slane %v3775_v12, 7  ;;  %v1708_v6 = vrot.slane %v3793_v11, 6  ;;  %v1709_v17 = vrot.slane %v3764_v34, 7 }
 0x184   : > { %3163 = vmatpush3.bf16.msra.mxu1 %v3681_v38  ;;  %3150 = vmatprep.mubr.msk.bf16.mxu1 %vm1110_vm4, %v3695_v4  ;;  %v1702_v32 = vor.u32 %v1701_v51, %v1700_v45  ;;  %v1712_v44 = vrot.slane %v3832_v18, 6  ;;  %v4005_v12 = vsel %vm1692_vm9, %v1695_v23, %v1698_v39  ;;  %v1713_v49 = vrot.slane %v3829_v63, 7 }
 0x185   : > { %3291 = vmatprep.subr.msk.bf16.mxu1 %vm603_vm1, %v3967_v61  ;;  %v1706_v38 = vor.u32 %v1705_v22, %v1704_v55  ;;  %v1716_v20 = vrot.slane %v3825_v26, 6  ;;  %v1710_v34 = vor.u32 %v1709_v17, %v1708_v6  ;;  %v1717_v18 = vrot.slane %v3817_v31, 7 }
 0x186   : > { %v4010_v11 = vsel %vm1692_vm9, %v1698_v39, %v1702_v32  ;;  %v1720_v37 = vrot.slane %v3868_v41, 6  ;;  %v1714_v46 = vor.u32 %v1713_v49, %v1712_v44  ;;  %v1721_v29 = vrot.slane %v3864_v59, 7 }
 0x187   : > { %v4015_v0 = vsel %vm1692_vm9, %v1702_v32, %v1706_v38  ;;  %v1727_v23 = vrot.slane %v1725_v57, 6  ;;  %v4023_v26 = vsel %vm1692_vm9, %v1706_v38, %v1710_v34  ;;  %v1718_v63 = vor.u32 %v1717_v18, %v1716_v20 }
 0x188   : > { %3259 = vmatmul.mubr.msk.bf16.gmra.mxu0 %vm1110_vm4, %v3887_v28  ;;  %v1730_v31 = vrot.slane %v1728_v30, 7  ;;  %v2044_v41 = vrot.slane %v3704_v8, 4  ;;  %v4031_v59 = vsel %vm1692_vm9, %v1710_v34, %v1714_v46  ;;  %v1722_v5 = vor.u32 %v1721_v29, %v1720_v37 }
 0x189   : > { %3262 = vmatprep.mubr.msk.bf16.mxu0 %vm1110_vm4, %v3893_v27  ;;  %v2045_v57 = vrot.slane %v3695_v4, 4  ;;  %v2047_v28 = vrot.slane %v3753_v16, 4  ;;  %v4036_v42 = vsel %vm1692_vm9, %v1714_v46, %v1718_v63  ;;  %v2049_v35 = vrot.slane %v3747_v19, 4 }
 0x18a   : > { %v1731_v24 = vor.u32 %v1730_v31, %v1727_v23  ;;  %v4042_v30 = vsel %vm1692_vm9, %v1718_v63, %v1722_v5  ;;  %v2051_v51 = vrot.slane %v3812_v54, 4  ;;  %v2053_v55 = vrot.slane %v3795_v1, 4 }
 0x18b   : > { %3151 = vmatmul.mubr.msk.bf16.gmra.mxu1 %vm1110_vm4, %v3753_v16  ;;  %v4045_v27 = vsel %vm602_vm0, %v2044_v41, %v2045_v57  ;;  %v4048_v45 = vsel %vm602_vm0, %v2045_v57, %v2047_v28  ;;  %v4057_v39 = vsel %vm602_vm0, %v2047_v28, %v2049_v35  ;;  %v2055_v22 = vrot.slane %v3853_v14, 4 }
 0x18c   : > { %3154 = vmatprep.mubr.msk.bf16.mxu1 %vm1110_vm4, %v3747_v19  ;;  %v4054_v50 = vsel %vm1692_vm9, %v1722_v5, %v1731_v24  ;;  %v4062_v32 = vsel %vm602_vm0, %v2049_v35, %v2051_v51  ;;  %v2057_v6 = vrot.slane %v3842_v7, 4  ;;  %v2390_v17 = vrot.slane %v3704_v8, 5 }
 0x18d   : > { %v2391_v44 = vrot.slane %v3695_v4, 5  ;;  %v4068_v38 = vsel %vm602_vm0, %v2051_v51, %v2053_v55  ;;  %v4071_v49 = vsel %vm602_vm0, %v2053_v55, %v2055_v22  ;;  %v2393_v20 = vrot.slane %v3753_v16, 5 }
 0x18e   : > { %v2395_v34 = vrot.slane %v3747_v19, 5  ;;  %v4078_v18 = vsel %vm602_vm0, %v2055_v22, %v2057_v6  ;;  %v2397_v4 = vrot.slane %v3812_v54, 5  ;;  %v2399_v8 = vrot.slane %v3795_v1, 5 }
 0x18f   : > { %v4081_v37 = vsel %vm2389_vm10, %v2390_v17, %v2391_v44  ;;  %v4088_v46 = vsel %vm2389_vm10, %v2391_v44, %v2393_v20  ;;  %v2401_v16 = vrot.slane %v3853_v14, 5  ;;  %v2403_v29 = vrot.slane %v3842_v7, 5 }
 0x190   : > { %3263 = vmatmul.mubr.msk.bf16.gmra.mxu0 %vm1110_vm4, %v3900_v3  ;;  %v4091_v19 = vsel %vm2389_vm10, %v2393_v20, %v2395_v34  ;;  %v4098_v23 = vsel %vm2389_vm10, %v2395_v34, %v2397_v4  ;;  %v4101_v63 = vsel %vm2389_vm10, %v2397_v4, %v2399_v8  ;;  %v1576_v5 = vsel %vm603_vm1, %v3967_v61, 0 }
 0x191   : > { %3266 = vmatprep.mubr.msk.bf16.mxu0 %vm1110_vm4, %v3938_v2  ;;  %v4104_v3 = vsel %vm2389_vm10, %v2399_v8, %v2401_v16  ;;  %v4107_v31 = vsel %vm2389_vm10, %v2401_v16, %v2403_v29  ;;  %v4111_v41 = vsel %vm2389_vm10, %v2403_v29, %v3989_v53  ;;  %v2241_v2 = vsel %vm2205_vm6, %v3921_v10, %v3989_v53 }
 0x193   : > { %3155 = vmatmul.mubr.msk.bf16.gmra.mxu1 %vm1110_vm4, %v3812_v54  ;;  %v3353_v54 = vld [vmem:[%s4434_s3 + $0x20] sm:$0x1f]  }
 0x194   : > { %3158 = vmatprep.mubr.msk.bf16.mxu1 %vm1110_vm4, %v3795_v1  ;;  %v1763_v1 = vsel %vm603_vm1, %v3353_v54, 0 }
 0x198   : > { %3267 = vmatmul.mubr.msk.bf16.gmra.mxu0 %vm1110_vm4, %v2241_v2 }
 0x19b   : > { %3159 = vmatmul.mubr.msk.bf16.gmra.mxu1 %vm1110_vm4, %v3853_v14 }
 0x19c   : > { %3164 = vmatprep.mubr.msk.bf16.mxu1 %vm1110_vm4, %v3907_v43  ;;  %v3354_v43 = vld [vmem:[%s4434_s3 + $0x30] sm:$0x1f]  }
 0x19d   : > { %v2089_v14 = vsel %vm603_vm1, %v3354_v43, 0 }
 0x1a3   : > { %3165 = vmatmul.mubr.msk.bf16.vlgmr.msra.gmra.mxu1 %vm1110_vm4, %v3912_v60  ;;  %v3355_v60 = vld [vmem:[%s4434_s3 + $0x40] sm:$0x1f]  }
 0x1a4   : > { %3181 = vmatpush3.bf16.msra.mxu1 %v1576_v5  ;;  %3168 = vmatprep.mubr.msk.bf16.mxu1 %vm1110_vm4, %v3915_v48  ;;  %v2437_v48 = vsel %vm603_vm1, %v3355_v60, 0 }
 0x1a5   : > { %3292 = vmatprep.subr.msk.bf16.mxu1 %vm603_vm1, %v3353_v54 }
 0x1ab   : > { %3169 = vmatmul.mubr.msk.bf16.gmra.mxu1 %vm1110_vm4, %v3924_v13 }
 0x1ac   : > { %3172 = vmatprep.mubr.msk.bf16.mxu1 %vm1110_vm4, %v3929_v56 }
 0x1b3   : > { %3173 = vmatmul.mubr.msk.bf16.gmra.mxu1 %vm1110_vm4, %v3932_v33 }
 0x1b4   : > { %3176 = vmatprep.mubr.msk.bf16.mxu1 %vm1110_vm4, %v3943_v58 }
 0x1bb   : > { %3177 = vmatmul.mubr.msk.bf16.gmra.mxu1 %vm1110_vm4, %v1379_v36 }
 0x1bc   : > { %3182 = vmatprep.mubr.msk.bf16.mxu1 %vm1110_vm4, %v3948_v62 }
 0x1c3   : > { %3183 = vmatmul.mubr.msk.bf16.vlgmr.msra.gmra.mxu1 %vm1110_vm4, %v3951_v52 }
 0x1c4   : > { %3199 = vmatpush3.bf16.msra.mxu1 %v1763_v1  ;;  %3186 = vmatprep.mubr.msk.bf16.mxu1 %vm1110_vm4, %v3954_v25 }
 0x1c5   : > { %3294 = vmatprep.subr.msk.bf16.mxu1 %vm603_vm1, %v3354_v43 }
 0x1cb   : > { %3187 = vmatmul.mubr.msk.bf16.gmra.mxu1 %vm1110_vm4, %v3970_v21 }
 0x1cc   : > { %3190 = vmatprep.mubr.msk.bf16.mxu1 %vm1110_vm4, %v3973_v15 }
 0x1d3   : > { %3191 = vmatmul.mubr.msk.bf16.gmra.mxu1 %vm1110_vm4, %v3978_v9 }
 0x1d4   : > { %3194 = vmatprep.mubr.msk.bf16.mxu1 %vm1110_vm4, %v3981_v47 }
 0x1db   : > { %3195 = vmatmul.mubr.msk.bf16.gmra.mxu1 %vm1110_vm4, %v3984_v40 }
 0x1dc   : > { %3200 = vmatprep.mubr.msk.bf16.mxu1 %vm1110_vm4, %v4005_v12 }
 0x1e3   : > { %3201 = vmatmul.mubr.msk.bf16.vlgmr.msra.gmra.mxu1 %vm1110_vm4, %v4010_v11 }
 0x1e4   : > { %3235 = vmatpush3.bf16.msra.mxu1 %v2089_v14  ;;  %3204 = vmatprep.mubr.msk.bf16.mxu1 %vm1110_vm4, %v4015_v0 }
 0x1e5   : > { %3296 = vmatprep.subr.msk.bf16.mxu1 %vm603_vm1, %v3355_v60 }
 0x1eb   : > { %3205 = vmatmul.mubr.msk.bf16.gmra.mxu1 %vm1110_vm4, %v4023_v26 }
 0x1ec   : > { %3208 = vmatprep.mubr.msk.bf16.mxu1 %vm1110_vm4, %v4031_v59 }
 0x1f3   : > { %3209 = vmatmul.mubr.msk.bf16.gmra.mxu1 %vm1110_vm4, %v4036_v42 }
 0x1f4   : > { %3212 = vmatprep.mubr.msk.bf16.mxu1 %vm1110_vm4, %v4042_v30 }
 0x1fb   : > { %3213 = vmatmul.mubr.msk.bf16.gmra.mxu1 %vm1110_vm4, %v4054_v50 }
 0x1fc   : > { %3236 = vmatprep.mubr.msk.bf16.mxu1 %vm1110_vm4, %v4045_v27 }
 0x203   : > { %3237 = vmatmul.mubr.msk.bf16.vlgmr.msra.gmra.mxu1 %vm1110_vm4, %v4048_v45 }
 0x204   : > { %3271 = vmatpush3.bf16.msra.mxu1 %v2437_v48  ;;  %3240 = vmatprep.mubr.msk.bf16.mxu1 %vm1110_vm4, %v4057_v39 }
 0x20b   : > { %3241 = vmatmul.mubr.msk.bf16.gmra.mxu1 %vm1110_vm4, %v4062_v32 }
 0x20c   : > { %3244 = vmatprep.mubr.msk.bf16.mxu1 %vm1110_vm4, %v4068_v38 }
 0x213   : > { %3245 = vmatmul.mubr.msk.bf16.gmra.mxu1 %vm1110_vm4, %v4071_v49 }
 0x214   : > { %3248 = vmatprep.mubr.msk.bf16.mxu1 %vm1110_vm4, %v4078_v18 }
 0x21b   : > { %3249 = vmatmul.mubr.msk.bf16.gmra.mxu1 %vm1110_vm4, %v2057_v6 }
 0x21c   : > { %3272 = vmatprep.mubr.msk.bf16.mxu1 %vm1110_vm4, %v4081_v37 }
 0x21d   : > { %v4208_v10 = vpop.f32.mrf.mxu0 }
 0x21f   : > { %v4210_v13 = vpop.f32.mrf.mxu0 }
 0x221   : > { %v3130_v36 = vpop.f32.mrf.mxu1  ;;  %v4214_v56 = vpop.f32.mrf.mxu0 }
 0x223   : > { %3273 = vmatmul.mubr.msk.bf16.vlgmr.msra.gmra.mxu1 %vm1110_vm4, %v4088_v46  ;;  %v1172_v33 = vpop.f32.mrf.mxu1  ;;  %v4218_v7 = vpop.f32.mrf.mxu0 }
 0x224   : > { %3276 = vmatprep.mubr.msk.bf16.mxu1 %vm1110_vm4, %v4091_v19 }
 0x225   : > { %v3131_v58 = vpop.f32.mrf.mxu1  ;;  %v4220_v62 = vpop.f32.mrf.mxu0 }
 0x227   : > { %v1175_v52 = vpop.f32.mrf.mxu1  ;;  %v4222_v25 = vpop.f32.mrf.mxu0 }
 0x229   : > { %v3134_v61 = vpop.f32.mrf.mxu1  ;;  %v4226_v21 = vpop.f32.mrf.mxu0 }
 0x22b   : > { %3277 = vmatmul.mubr.msk.bf16.gmra.mxu1 %vm1110_vm4, %v4098_v23  ;;  %v1188_v15 = vpop.f32.mrf.mxu1  ;;  %v4230_v9 = vpop.f32.mrf.mxu0 }
 0x22c   : > { %3280 = vmatprep.mubr.msk.bf16.mxu1 %vm1110_vm4, %v4101_v63 }
 0x22d   : > { %v3135_v47 = vpop.f32.mrf.mxu1 }
 0x22f   : > { %v1191_v53 = vpop.f32.mrf.mxu1 }
 0x230   : > { %v4232_v40 = vpop.f32.mrf.mxu0 }
 0x232   : > { %v4234_v12 = vpop.f32.mrf.mxu0 }
 0x233   : > { %v3138_v11 = vpop.f32.mrf.mxu1  ;;  %3281 = vmatmul.mubr.msk.bf16.gmra.mxu1 %vm1110_vm4, %v4104_v3 }
 0x234   : > { %v4238_v0 = vpop.f32.mrf.mxu0  ;;  %3284 = vmatprep.mubr.msk.bf16.mxu1 %vm1110_vm4, %v4107_v31 }
 0x235   : > { %4467 = vst [vmem:[#allocation3_spill] sm:$0xff] %v4238_v0  ;;  %v1204_v26 = vpop.f32.mrf.mxu1 }
 0x236   : > { %v4242_v59 = vpop.f32.mrf.mxu0 }
 0x237   : > { %4468 = vst [vmem:[#allocation4_spill] sm:$0xff] %v4242_v59  ;;  %v3139_v57 = vpop.f32.mrf.mxu1 }
 0x238   : > { %v4244_v28 = vpop.f32.mrf.mxu0 }
 0x239   : > { %4469 = vst [vmem:[#allocation6_spill] sm:$0xff] %v4244_v28  ;;  %v1207_v42 = vpop.f32.mrf.mxu1 }
 0x23a   : > { %v4246_v24 = vpop.f32.mrf.mxu0 }
 0x23b   : > { %4470 = vst [vmem:[#allocation2_spill] sm:$0xff] %v4246_v24  ;;  %v3142_v35 = vpop.f32.mrf.mxu1  ;;  %3285 = vmatmul.mubr.msk.bf16.gmra.mxu1 %vm1110_vm4, %v4111_v41 }
 0x23c   : > { %v3233_v30 = vpop.f32.mrf.mxu0 }
 0x23d   : > { %v1220_v27 = vpop.f32.mrf.mxu1 }
 0x23e   : > { %v4250_v45 = vpop.f32.mrf.mxu0 }
 0x23f   : > { %4471 = vst [vmem:[#allocation5_spill] sm:$0xff] %v4250_v45  ;;  %v3143_v51 = vpop.f32.mrf.mxu1 }
 0x240   : > { %v4252_v50 = vpop.f32.mrf.mxu0 }
 0x241   : > { %v1223_v39 = vpop.f32.mrf.mxu1 }
 0x242   : > { %v4254_v55 = vpop.f32.mrf.mxu0 }
 0x243   : > { %v3148_v22 = vpop.f32.mrf.mxu1 }
 0x244   : > { %v1301_v32 = vadd.f32 %v3148_v22, %v3130_v36  ;;  %v4256_v6 = vpop.f32.mrf.mxu0 }
 0x245   : > { %v1292_v17 = vpop.f32.mrf.mxu1 }
 0x246   : > { %v1293_v44 = vadd.f32 %v1292_v17, %v1172_v33  ;;  %v4258_v38 = vpop.f32.mrf.mxu0 }
 0x247   : > { %v3149_v49 = vpop.f32.mrf.mxu1 }
 0x248   : > { %v1304_v20 = vadd.f32 %v3149_v49, %v3131_v58  ;;  %v4260_v34 = vpop.f32.mrf.mxu0 }
 0x249   : > { %v1295_v18 = vpop.f32.mrf.mxu1 }
 0x24a   : > { %v1296_v37 = vadd.f32 %v1295_v18, %v1175_v52  ;;  %v4262_v4 = vpop.f32.mrf.mxu0 }
 0x24b   : > { %v3152_v8 = vpop.f32.mrf.mxu1 }
 0x24c   : > { %v1317_v46 = vadd.f32 %v3152_v8, %v3134_v61  ;;  %v4264_v19 = vpop.f32.mrf.mxu0 }
 0x24d   : > { %v1308_v16 = vpop.f32.mrf.mxu1 }
 0x24e   : > { %v1309_v29 = vadd.f32 %v1308_v16, %v1188_v15  ;;  %v4266_v23 = vpop.f32.mrf.mxu0 }
 0x24f   : > { %4472 = vst [vmem:[#allocation7_spill] sm:$0xff] %v4266_v23  ;;  %v3153_v63 = vpop.f32.mrf.mxu1 }
 0x250   : > { %v1320_v3 = vadd.f32 %v3153_v63, %v3135_v47  ;;  %v4268_v31 = vpop.f32.mrf.mxu0 }
 0x251   : > { %4473 = vst [vmem:[#allocation8_spill] sm:$0xff] %v4268_v31  ;;  %v1311_v41 = vpop.f32.mrf.mxu1 }
 0x252   : > { %v1312_v2 = vadd.f32 %v1311_v41, %v1191_v53  ;;  %v4270_v5 = vpop.f32.mrf.mxu0 }
 0x253   : > { %4474 = vst [vmem:[#allocation9_spill] sm:$0xff] %v4270_v5  ;;  %v3156_v54 = vpop.f32.mrf.mxu1 }
 0x254   : > { %v1333_v1 = vadd.f32 %v3156_v54, %v3138_v11  ;;  %v4272_v43 = vpop.f32.mrf.mxu0 }
 0x255   : > { %4475 = vst [vmem:[#allocation10_spill] sm:$0xff] %v4272_v43  ;;  %v1324_v14 = vpop.f32.mrf.mxu1 }
 0x256   : > { %v1325_v60 = vadd.f32 %v1324_v14, %v1204_v26  ;;  %v4274_v48 = vpop.f32.mrf.mxu0 }
 0x257   : > { %4476 = vst [vmem:[#allocation11_spill] sm:$0xff] %v4274_v48  ;;  %v3157_v36 = vpop.f32.mrf.mxu1 }
 0x258   : > { %v1336_v33 = vadd.f32 %v3157_v36, %v3139_v57  ;;  %v4276_v58 = vpop.f32.mrf.mxu0 }
 0x259   : > { %4477 = vst [vmem:[#allocation12_spill] sm:$0xff] %v4276_v58  ;;  %v1327_v52 = vpop.f32.mrf.mxu1 }
 0x25a   : > { %v1328_v61 = vadd.f32 %v1327_v52, %v1207_v42  ;;  %v4278_v15 = vpop.f32.mrf.mxu0 }
 0x25b   : > { %4478 = vst [vmem:[#allocation13_spill] sm:$0xff] %v4278_v15  ;;  %v3160_v47 = vpop.f32.mrf.mxu1 }
 0x25c   : > { %v1349_v53 = vadd.f32 %v3160_v47, %v3142_v35  ;;  %v3269_v30 = vpop.f32.mrf.mxu0 }
 0x25d   : > { %v1340_v51 = vpop.f32.mrf.mxu1 }
 0x25e   : > { %v1341_v22 = vadd.f32 %v1340_v51, %v1220_v27 }
 0x25f   : > { %v3161_v11 = vpop.f32.mrf.mxu1 }
 0x261   : > { %v1343_v17 = vpop.f32.mrf.mxu1 }
 0x262   : > { %v1344_v49 = vadd.f32 %v1343_v17, %v1223_v39 }
 0x263   : > { %v3166_v18 = vpop.f32.mrf.mxu1 }
 0x264   : > { %v1511_v26 = vadd.f32 %v3166_v18, %v1301_v32 }
 0x265   : > { %v1447_v8 = vpop.f32.mrf.mxu1 }
 0x266   : > { %v1509_v16 = vadd.f32 %v1447_v8, %v1293_v44 }
 0x267   : > { %v3167_v63 = vpop.f32.mrf.mxu1 }
 0x268   : > { %v1512_v57 = vadd.f32 %v3167_v63, %v1304_v20 }
 0x269   : > { %v1450_v41 = vpop.f32.mrf.mxu1 }
 0x26a   : > { %v1510_v54 = vadd.f32 %v1450_v41, %v1296_v37 }
 0x26b   : > { %v3170_v14 = vpop.f32.mrf.mxu1 }
 0x26c   : > { %v1515_v42 = vadd.f32 %v3170_v14, %v1317_v46 }
 0x26d   : > { %v1463_v36 = vpop.f32.mrf.mxu1 }
 0x26e   : > { %v1513_v52 = vadd.f32 %v1463_v36, %v1309_v29 }
 0x26f   : > { %v3171_v15 = vpop.f32.mrf.mxu1 }
 0x270   : > { %v1516_v35 = vadd.f32 %v3171_v15, %v1320_v3 }
 0x271   : > { %v1466_v47 = vpop.f32.mrf.mxu1 }
 0x272   : > { %v1514_v30 = vadd.f32 %v1466_v47, %v1312_v2 }
 0x273   : > { %v3174_v27 = vpop.f32.mrf.mxu1 }
 0x274   : > { %v1519_v51 = vadd.f32 %v3174_v27, %v1333_v1 }
 0x275   : > { %v1479_v11 = vpop.f32.mrf.mxu1 }
 0x276   : > { %v1517_v39 = vadd.f32 %v1479_v11, %v1325_v60 }
 0x277   : > { %v3175_v17 = vpop.f32.mrf.mxu1 }
 0x278   : > { %v1520_v32 = vadd.f32 %v3175_v17, %v1336_v33 }
 0x279   : > { %v1482_v18 = vpop.f32.mrf.mxu1 }
 0x27a   : > { %v1518_v44 = vadd.f32 %v1482_v18, %v1328_v61 }
 0x27b   : > { %v3178_v8 = vpop.f32.mrf.mxu1 }
 0x27c   : > { %v1523_v20 = vadd.f32 %v3178_v8, %v1349_v53 }
 0x27d   : > { %v1495_v63 = vpop.f32.mrf.mxu1 }
 0x27e   : > { %v1521_v37 = vadd.f32 %v1495_v63, %v1341_v22 }
 0x27f   : > { %v3179_v41 = vpop.f32.mrf.mxu1 }
 0x281   : > { %v1498_v46 = vpop.f32.mrf.mxu1 }
 0x282   : > { %v1522_v14 = vadd.f32 %v1498_v46, %v1344_v49 }
 0x283   : > { %v3184_v29 = vpop.f32.mrf.mxu1 }
 0x284   : > { %v1676_v36 = vadd.f32 %v3184_v29, %v1511_v26 }
 0x285   : > { %v1612_v3 = vpop.f32.mrf.mxu1 }
 0x286   : > { %v1674_v15 = vadd.f32 %v1612_v3, %v1509_v16 }
 0x287   : > { %v3185_v2 = vpop.f32.mrf.mxu1 }
 0x288   : > { %v1677_v47 = vadd.f32 %v3185_v2, %v1512_v57 }
 0x289   : > { %v1615_v1 = vpop.f32.mrf.mxu1 }
 0x28a   : > { %v1675_v27 = vadd.f32 %v1615_v1, %v1510_v54 }
 0x28b   : > { %v3188_v60 = vpop.f32.mrf.mxu1 }
 0x28c   : > { %v1680_v11 = vadd.f32 %v3188_v60, %v1515_v42 }
 0x28d   : > { %v1628_v33 = vpop.f32.mrf.mxu1 }
 0x28e   : > { %v1678_v17 = vadd.f32 %v1628_v33, %v1513_v52 }
 0x28f   : > { %v3189_v61 = vpop.f32.mrf.mxu1 }
 0x290   : > { %v4280_v18 = vadd.f32 %v3189_v61, %v1516_v35 }
 0x291   : > { %v1631_v53 = vpop.f32.mrf.mxu1 }
 0x292   : > { %v4282_v22 = vadd.f32 %v1631_v53, %v1514_v30 }
 0x293   : > { %v3192_v8 = vpop.f32.mrf.mxu1 }
 0x294   : > { %v4284_v49 = vadd.f32 %v3192_v8, %v1519_v51 }
 0x295   : > { %v1644_v26 = vpop.f32.mrf.mxu1 }
 0x296   : > { %v4286_v63 = vadd.f32 %v1644_v26, %v1517_v39 }
 0x297   : > { %v3193_v16 = vpop.f32.mrf.mxu1 }
 0x298   : > { %v4288_v57 = vadd.f32 %v3193_v16, %v1520_v32 }
 0x299   : > { %v1647_v54 = vpop.f32.mrf.mxu1 }
 0x29a   : > { %v4290_v41 = vadd.f32 %v1647_v54, %v1518_v44 }
 0x29b   : > { %v3196_v42 = vpop.f32.mrf.mxu1 }
 0x29c   : > { %v4292_v52 = vadd.f32 %v3196_v42, %v1523_v20 }
 0x29d   : > { %v1660_v35 = vpop.f32.mrf.mxu1 }
 0x29e   : > { %4479 = vst [vmem:[#allocation14_spill] sm:$0xff] %v4292_v52  ;;  %v4294_v46 = vadd.f32 %v1660_v35, %v1521_v37 }
 0x29f   : > { %v3197_v30 = vpop.f32.mrf.mxu1 }
 0x2a0   : > { %4480 = vst [vmem:[#allocation15_spill] sm:$0xff] %v4294_v46 }
 0x2a1   : > { %v1663_v29 = vpop.f32.mrf.mxu1 }
 0x2a2   : > { %v4296_v3 = vadd.f32 %v1663_v29, %v1522_v14 }
 0x2a3   : > { %v3202_v51 = vpop.f32.mrf.mxu1 }
 0x2a4   : > { %4481 = vst [vmem:[#allocation16_spill] sm:$0xff] %v4296_v3  ;;  %v1863_v5 = vadd.f32 %v3202_v51, %v1676_v36 }
 0x2a5   : > { %v1799_v2 = vpop.f32.mrf.mxu1 }
 0x2a6   : > { %v2027_v59 = vadd.f32 %v4208_v10, %v1863_v5 }
 0x2a7   : > { %v3203_v39 = vpop.f32.mrf.mxu1 }
 0x2a9   : > { %v1802_v1 = vpop.f32.mrf.mxu1 }
 0x2aa   : > { %v1862_v46 = vadd.f32 %v1802_v1, %v1675_v27 }
 0x2ab   : > { %v3206_v60 = vpop.f32.mrf.mxu1 }
 0x2ad   : > { %v1815_v32 = vpop.f32.mrf.mxu1 }
 0x2ae   : > { %v1865_v36 = vadd.f32 %v1815_v32, %v1678_v17 }
 0x2af   : > { %v3207_v33 = vpop.f32.mrf.mxu1 }
 0x2b0   : > { %v1868_v5 = vadd.f32 %v3207_v33, %v4280_v18 }
 0x2b1   : > { %v1818_v61 = vpop.f32.mrf.mxu1 }
 0x2b2   : > { %v1866_v17 = vadd.f32 %v1818_v61, %v4282_v22 }
 0x2b3   : > { %v3210_v44 = vpop.f32.mrf.mxu1 }
 0x2b4   : > { %v2030_v32 = vadd.f32 %v4230_v9, %v1866_v17 }
 0x2b5   : > { %v1831_v53 = vpop.f32.mrf.mxu1 }
 0x2b6   : > { %v1869_v1 = vadd.f32 %v1831_v53, %v4286_v63 }
 0x2b7   : > { %v4298_v8 = vpop.f32.mrf.mxu1 }
 0x2b9   : > { %v4300_v20 = vpop.f32.mrf.mxu1 }
 0x2bb   : > { %v4302_v37 = vpop.f32.mrf.mxu1 }
 0x2bc   : > { %4482 = vst [vmem:[#allocation17_spill] sm:$0xff] %v4302_v37  ;;  %v1867_v37 = vadd.f32 %v3206_v60, %v1680_v11 }
 0x2bd   : > { %v4304_v26 = vpop.f32.mrf.mxu1 }
 0x2be   : > { %4483 = vst [vmem:[#allocation18_spill] sm:$0xff] %v4304_v26 }
 0x2bf   : > { %v3215_v14 = vpop.f32.mrf.mxu1 }
 0x2c0   : > { %v1861_v14 = vadd.f32 %v1799_v2, %v1674_v15  ;;  %v2032_v2 = vadd.f32 %v4226_v21, %v1868_v5 }
 0x2c1   : > { %v4306_v16 = vpop.f32.mrf.mxu1 }
 0x2c2   : > { %4484 = vst [vmem:[#allocation19_spill] sm:$0xff] %v4306_v16  ;;  %v1864_v16 = vadd.f32 %v3203_v39, %v1677_v47  ;;  %v2025_v0 = vadd.f32 %v4210_v13, %v1861_v14  ;;  %v2026_v47 = vadd.f32 %v4218_v7, %v1862_v46  ;;  %v4332_v13 = vld [vmem:[%s4435_s4] ss:$0 sm:$0xff]  ;;  %v2029_v7 = vadd.f32 %v4222_v25, %v1865_v36 }
 0x2c3   : > { %v3238_v54 = vpop.f32.mrf.mxu1  ;;  %v1871_v46 = vadd.f32 %v3210_v44, %v4284_v49  ;;  %v4488_v14 = vld [vmem:[#allocation17_spill] sm:$0xff] }
 0x2c4   : > { %v2189_v23 = vadd.f32 %v3238_v54, %v2027_v59  ;;  %v2031_v59 = vadd.f32 %v4220_v62, %v1867_v37  ;;  %v1870_v54 = vadd.f32 %v4300_v20, %v4290_v41  ;;  %v4490_v20 = vld [vmem:[#allocation3_spill] sm:$0xff] }
 0x2c5   : > { %v2125_v42 = vpop.f32.mrf.mxu1  ;;  %v2035_v9 = vadd.f32 %v4232_v40, %v1871_v46 }
 0x2c6   : > { %v2372_v10 = vadd.f32 %v4252_v50, %v2189_v23 }
 0x2c7   : > { %v3239_v35 = vpop.f32.mrf.mxu1 }
 0x2c9   : > { %v2128_v30 = vpop.f32.mrf.mxu1 }
 0x2cb   : > { %v3242_v29 = vpop.f32.mrf.mxu1 }
 0x2cd   : > { %v2141_v58 = vpop.f32.mrf.mxu1 }
 0x2cf   : > { %v3243_v45 = vpop.f32.mrf.mxu1 }
 0x2d0   : > { %v2194_v60 = vadd.f32 %v3243_v45, %v2032_v2  ;;  %v1872_v45 = vadd.f32 %v4298_v8, %v4288_v57 }
 0x2d1   : > { %v2144_v48 = vpop.f32.mrf.mxu1 }
 0x2d2   : > { %v2377_v40 = vadd.f32 %v4264_v19, %v2194_v60 }
 0x2d3   : > { %v4308_v43 = vpop.f32.mrf.mxu1 }
 0x2d5   : > { %v4310_v24 = vpop.f32.mrf.mxu1 }
 0x2d6   : > { %4485 = vst [vmem:[#allocation20_spill] sm:$0xff] %v4310_v24  ;;  %v2187_v24 = vadd.f32 %v2125_v42, %v2025_v0  ;;  %v2197_v42 = vadd.f32 %v4308_v43, %v2035_v9  ;;  %v2036_v43 = vadd.f32 %v4490_v20, %v1872_v45 }
 0x2d7   : > { %v4312_v3 = vpop.f32.mrf.mxu1 }
 0x2d8   : > { %4486 = vst [vmem:[#allocation21_spill] sm:$0xff] %v4312_v3  ;;  %v2028_v3 = vadd.f32 %v4214_v56, %v1864_v16  ;;  %v2188_v56 = vadd.f32 %v2128_v30, %v2026_v47  ;;  %v2370_v11 = vadd.f32 %v4254_v55, %v2187_v24 }
 0x2d9   : > { %v4314_v28 = vpop.f32.mrf.mxu1 }
 0x2da   : > { %v2190_v15 = vadd.f32 %v3239_v35, %v2028_v3  ;;  %v2191_v3 = vadd.f32 %v2141_v58, %v2029_v7  ;;  %v2371_v25 = vadd.f32 %v4258_v38, %v2188_v56  ;;  %v2192_v38 = vadd.f32 %v2144_v48, %v2030_v32  ;;  %v4492_v56 = vld [vmem:[#allocation15_spill] sm:$0xff]  ;;  %v4495_v7 = vld [vmem:[#allocation4_spill] sm:$0xff] }
 0x2db   : > { %v4316_v31 = vpop.f32.mrf.mxu1  ;;  %v2033_v48 = vadd.f32 %v4234_v12, %v1869_v1  ;;  %v4491_v12 = vld [vmem:[#allocation7_spill] sm:$0xff]  ;;  %v4498_v1 = vld [vmem:[#allocation9_spill] sm:$0xff] }
 0x2dc   : > { %v2373_v18 = vadd.f32 %v4256_v6, %v2190_v15  ;;  %v2374_v44 = vadd.f32 %v4262_v4, %v2191_v3 }
 0x2dd   : > { %v4319_v26 = vpop.f32.mrf.mxu1  ;;  %v4489_v15 = vld [vmem:[#allocation20_spill] sm:$0xff] }
 0x2de   : > { %v2195_v41 = vadd.f32 %v4489_v15, %v2033_v48  ;;  %v4503_v48 = vld [vmem:[#allocation11_spill] sm:$0xff] }
 0x2df   : > { %v3251_v52 = vpop.f32.mrf.mxu1  ;;  %v4494_v17 = vld [vmem:[#allocation21_spill] sm:$0xff] }
 0x2e0   : > { %v2193_v52 = vadd.f32 %v3242_v29, %v2031_v59  ;;  %v4487_v29 = vld [vmem:[#allocation14_spill] sm:$0xff]  ;;  %v2378_v60 = vadd.f32 %v4498_v1, %v2195_v41 }
 0x2e1   : > { %v4323_v51 = vpop.f32.mrf.mxu1  ;;  %v1875_v36 = vadd.f32 %v4488_v14, %v4487_v29  ;;  %v4505_v14 = vld [vmem:[#allocation12_spill] sm:$0xff] }
 0x2e2   : > { %v2376_v6 = vadd.f32 %v4260_v34, %v2193_v52  ;;  %v2198_v52 = vadd.f32 %v4494_v17, %v2036_v43 }
 0x2e3   : > { %v3274_v27 = vpop.f32.mrf.mxu1 }
 0x2e4   : > { %v2537_v0 = vadd.f32 %v3274_v27, %v2372_v10  ;;  %v2375_v10 = vadd.f32 %v4491_v12, %v2192_v38  ;;  %v4501_v38 = vld [vmem:[#allocation2_spill] sm:$0xff]  ;;  %v4506_v12 = vld [vmem:[#allocation13_spill] sm:$0xff] }
 0x2e5   : > { %v2473_v50 = vpop.f32.mrf.mxu1 }
 0x2e6   : > { %v2559_v23 = vadd.f32 %v4332_v13, %v2537_v0  ;;  %v2535_v62 = vadd.f32 %v2473_v50, %v2370_v11  ;;  %v4493_v0 = vld [vmem:[#allocation18_spill] sm:$0xff]  ;;  %v2034_v50 = vadd.f32 %v4495_v7, %v1870_v54 }
 0x2e7   : > { %v3275_v39 = vpop.f32.mrf.mxu1  ;;  %v1873_v11 = vadd.f32 %v4493_v0, %v4492_v56 }
 0x2e8   : > { %v2574_v24 = vmax.f32 %v2559_v23, 0.0  ;;  %v2557_v55 = vadd.f32 %v4332_v13, %v2535_v62  ;;  %v2538_v22 = vadd.f32 %v3275_v39, %v2373_v18  ;;  %v4496_v62 = vld [vmem:[#allocation8_spill] sm:$0xff] }
 0x2e9   : > { %v2476_v21 = vpop.f32.mrf.mxu1  ;;  %v2380_v18 = vadd.f32 %v4496_v62, %v2197_v42 }
 0x2ea   : > { %v2918_v58 = vpack.c.bf16 %v2574_v24, %v2574_v24  ;;  %v2572_v49 = vmax.f32 %v2557_v55, 0.0  ;;  %v2560_v33 = vadd.f32 %v4332_v13, %v2538_v22  ;;  %v2536_v61 = vadd.f32 %v2476_v21, %v2371_v25  ;;  %v4497_v55 = vld [vmem:[#allocation6_spill] sm:$0xff] }
 0x2eb   : > { %v3278_v63 = vpop.f32.mrf.mxu1  ;;  %v2196_v24 = vadd.f32 %v4314_v28, %v2034_v50  ;;  %v2039_v22 = vadd.f32 %v4497_v55, %v1875_v36  ;;  %v2037_v28 = vadd.f32 %v4501_v38, %v1873_v11 }
 0x2ec   : > { %2651 = vst.msk [vmem:[%s4349_s29 + $0x8] sm:$0xf] %vm2648_vm11, %v2918_v58  ;;  %v2916_v53 = vpack.c.bf16 %v2572_v49, %v2572_v49  ;;  %v2575_v37 = vmax.f32 %v2560_v33, 0.0  ;;  %v2558_v34 = vadd.f32 %v4332_v13, %v2536_v61  ;;  %v2541_v16 = vadd.f32 %v3278_v63, %v2376_v6  ;;  %v4499_v49 = vld [vmem:[#allocation16_spill] sm:$0xff]  ;;  %v4500_v33 = vld [vmem:[#allocation19_spill] sm:$0xff]  ;;  %v4502_v63 = vld [vmem:[#allocation10_spill] sm:$0xff] }
 0x2ed   : > { %v2489_v57 = vpop.f32.mrf.mxu1  ;;  %v1874_v61 = vadd.f32 %v4500_v33, %v4499_v49  ;;  %v2201_v45 = vadd.f32 %v4316_v31, %v2039_v22  ;;  %v2199_v54 = vadd.f32 %v4319_v26, %v2037_v28 }
 0x2ee   : > { %2649 = vst.msk [vmem:[%s4349_s29] sm:$0xf] %vm2648_vm11, %v2916_v53  ;;  %v2919_v4 = vpack.c.bf16 %v2575_v37, %v2575_v37  ;;  %v2573_v8 = vmax.f32 %v2558_v34, 0.0  ;;  %v2563_v35 = vadd.f32 %v4332_v13, %v2541_v16  ;;  %v2539_v30 = vadd.f32 %v2489_v57, %v2374_v44 }
 0x2ef   : > { %v3279_v47 = vpop.f32.mrf.mxu1  ;;  %v2381_v44 = vadd.f32 %v4502_v63, %v2198_v52  ;;  %v2379_v57 = vadd.f32 %v4503_v48, %v2196_v24  ;;  %v2384_v36 = vadd.f32 %v4505_v14, %v2201_v45  ;;  %v2359_v52 = vpop.f32.mrf.mxu0 }
 0x2f0   : > { %2652 = vst.msk [vmem:[%s4349_s29 + $0xc] sm:$0xf] %vm2648_vm11, %v2919_v4  ;;  %v2917_v19 = vpack.c.bf16 %v2573_v8, %v2573_v8  ;;  %v2578_v5 = vmax.f32 %v2563_v35, 0.0  ;;  %v2561_v59 = vadd.f32 %v4332_v13, %v2539_v30  ;;  %v2542_v27 = vadd.f32 %v3279_v47, %v2377_v40  ;;  %v4504_v35 = vld [vmem:[#allocation5_spill] sm:$0xff] }
 0x2f1   : > { %v2492_v23 = vpop.f32.mrf.mxu1  ;;  %v2038_v30 = vadd.f32 %v4504_v35, %v1874_v61 }
 0x2f2   : > { %2650 = vst.msk [vmem:[%s4349_s29 + $0x4] sm:$0xf] %vm2648_vm11, %v2917_v19  ;;  %v2922_v46 = vpack.c.bf16 %v2578_v5, %v2578_v5  ;;  %v2576_v3 = vmax.f32 %v2561_v59, 0.0  ;;  %v2564_v2 = vadd.f32 %v4332_v13, %v2542_v27  ;;  %v2540_v39 = vadd.f32 %v2492_v23, %v2375_v10 }
 0x2f3   : > { %v3282_v25 = vpop.f32.mrf.mxu1  ;;  %v2200_v43 = vadd.f32 %v4323_v51, %v2038_v30  ;;  %v2382_v10 = vadd.f32 %v4506_v12, %v2199_v54 }
 0x2f4   : > { %2655 = vst.msk [vmem:[%s4349_s29 + $0x18] sm:$0xf] %vm2648_vm11, %v2922_v46  ;;  %v2920_v32 = vpack.c.bf16 %v2576_v3, %v2576_v3  ;;  %v2579_v21 = vmax.f32 %v2564_v2, 0.0  ;;  %v2562_v6 = vadd.f32 %v4332_v13, %v2540_v39  ;;  %v2545_v58 = vadd.f32 %v3282_v25, %v2380_v18 }
 0x2f5   : > { %v2505_v9 = vpop.f32.mrf.mxu1  ;;  %v2383_v18 = vadd.f32 %v2359_v52, %v2200_v43 }
 0x2f6   : > { %2653 = vst.msk [vmem:[%s4349_s29 + $0x10] sm:$0xf] %vm2648_vm11, %v2920_v32  ;;  %v2923_v53 = vpack.c.bf16 %v2579_v21, %v2579_v21  ;;  %v2577_v37 = vmax.f32 %v2562_v6, 0.0  ;;  %v2567_v34 = vadd.f32 %v4332_v13, %v2545_v58  ;;  %v2543_v16 = vadd.f32 %v2505_v9, %v2378_v60 }
 0x2f7   : > { %v3283_v42 = vpop.f32.mrf.mxu1 }
 0x2f8   : > { %2656 = vst.msk [vmem:[%s4349_s29 + $0x1c] sm:$0xf] %vm2648_vm11, %v2923_v53  ;;  %v2921_v31 = vpack.c.bf16 %v2577_v37, %v2577_v37  ;;  %v2582_v40 = vmax.f32 %v2567_v34, 0.0  ;;  %v2565_v4 = vadd.f32 %v4332_v13, %v2543_v16  ;;  %v2546_v8 = vadd.f32 %v3283_v42, %v2381_v44 }
 0x2f9   : > { %v2508_v29 = vpop.f32.mrf.mxu1 }
 0x2fa   : > { %2654 = vst.msk [vmem:[%s4349_s29 + $0x14] sm:$0xf] %vm2648_vm11, %v2921_v31  ;;  %v2926_v26 = vpack.c.bf16 %v2582_v40, %v2582_v40  ;;  %v2580_v15 = vmax.f32 %v2565_v4, 0.0  ;;  %v2568_v41 = vadd.f32 %v4332_v13, %v2546_v8  ;;  %v2544_v20 = vadd.f32 %v2508_v29, %v2379_v57 }
 0x2fb   : > { %v3286_v47 = vpop.f32.mrf.mxu1 }
 0x2fc   : > { %2659 = vst.msk [vmem:[%s4349_s29 + $0x28] sm:$0xf] %vm2648_vm11, %v2926_v26  ;;  %v2924_v19 = vpack.c.bf16 %v2580_v15, %v2580_v15  ;;  %v2583_v5 = vmax.f32 %v2568_v41, 0.0  ;;  %v2566_v59 = vadd.f32 %v4332_v13, %v2544_v20  ;;  %v2549_v27 = vadd.f32 %v3286_v47, %v2384_v36 }
 0x2fd   : > { %v2521_v56 = vpop.f32.mrf.mxu1 }
 0x2fe   : > { %2657 = vst.msk [vmem:[%s4349_s29 + $0x20] sm:$0xf] %vm2648_vm11, %v2924_v19  ;;  %v2927_v0 = vpack.c.bf16 %v2583_v5, %v2583_v5  ;;  %v2581_v11 = vmax.f32 %v2566_v59, 0.0  ;;  %v2571_v51 = vadd.f32 %v4332_v13, %v2549_v27  ;;  %v2547_v17 = vadd.f32 %v2521_v56, %v2382_v10 }
 0x2ff   : > { %v3287_v7 = vpop.f32.mrf.mxu1 }
 0x300   : > { %2660 = vst.msk [vmem:[%s4349_s29 + $0x2c] sm:$0xf] %vm2648_vm11, %v2927_v0  ;;  %v2925_v50 = vpack.c.bf16 %v2581_v11, %v2581_v11  ;;  %v2586_v23 = vmax.f32 %v2571_v51, 0.0  ;;  %v2569_v62 = vadd.f32 %v4332_v13, %v2547_v17 }
 0x301   : > { %v2524_v46 = vpop.f32.mrf.mxu1 }
 0x302   : > { %2658 = vst.msk [vmem:[%s4349_s29 + $0x24] sm:$0xf] %vm2648_vm11, %v2925_v50  ;;  %v2930_v3 = vpack.c.bf16 %v2586_v23, %v2586_v23  ;;  %v2584_v2 = vmax.f32 %v2569_v62, 0.0  ;;  %v2548_v39 = vadd.f32 %v2524_v46, %v2383_v18 }
 0x304   : > { %2663 = vst.msk [vmem:[%s4349_s29 + $0x38] sm:$0xf] %vm2648_vm11, %v2930_v3  ;;  %v2928_v24 = vpack.c.bf16 %v2584_v2, %v2584_v2  ;;  %v2570_v55 = vadd.f32 %v4332_v13, %v2548_v39 }
 0x306   : > { %2661 = vst.msk [vmem:[%s4349_s29 + $0x30] sm:$0xf] %vm2648_vm11, %v2928_v24  ;;  %v2585_v22 = vmax.f32 %v2570_v55, 0.0 }
 0x308   : > { %v2929_v25 = vpack.c.bf16 %v2585_v22, %v2585_v22 }
 0x30a   : > { %2662 = vst.msk [vmem:[%s4349_s29 + $0x34] sm:$0xf] %vm2648_vm11, %v2929_v25 }
 0x30b PF: > { %s15_s18 = sadd.s32 1, %s3362_s18  }
 0x30c   : > { %p12_p4 = scmp.ge.s32.totalorder %s15_s18, 4  }
 0x30e   :  { %14 = sbr.rel (!%p12_p4) target bundleno = 1 (0x1), region = 78 }

// kernel: digit_forward.3
= control target key start
LH: loop header
LB: loop body
LE: loop exit
PB: predicated region body
PF: predicated region fallthrough
CT: control target
= control target key end

     0   :  { %10 = vsyncpa [#allocation3], 0  ;;  %s7810_s0 = inlined_call_operand.vmem [shape: bf16[2,1,2000], index: 0, kind: input, shape index: {}]   ;;  %s7811_s1 = inlined_call_operand.vmem [shape: bf16[2000,500], index: 1, kind: input, shape index: {}]   ;;  %s7812_s2 = inlined_call_operand.vmem [shape: f32[1,500], index: 2, kind: input, shape index: {}]   ;;  %s7813_s3 = inlined_call_operand.vmem [shape: bf16[500,10], index: 3, kind: input, shape index: {}]   ;;  %s7814_s4 = inlined_call_operand.vmem [shape: f32[1,10], index: 4, kind: input, shape index: {}]   ;;  %s7815_s5 = inlined_call_operand.hbm [shape: f32[2,1,10], index: 5, kind: output, shape index: {}]  }
   0x1   :  { %12 = vsyncpa [#allocation3 + $0x1], 0  ;;  %s5961_s18 = smov 0   ;;  %s5963_s19 = smov 0  }
   0x2   :  { %s5965_s20 = smov 0   ;;  %s5967_s21 = smov 0  }
   0x3 LB: > { %s5982_s22 = sadd.s32 4294967295, %s5927_s21   ;;  %s4450_s23 = sadd.s32 4294967294, %s5927_s21   ;;  %s5927_s21 = sphi %s5967_s21, %s7821_s21   ;;  %s5923_s20 = sphi %s5965_s20, %s7820_s20   ;;  %s5919_s19 = sphi %s5963_s19, %s7819_s19   ;;  %s5915_s18 = sphi %s5961_s18, %s7818_s18  }
   0x4   : > { %s5986_s24 = sadd.s32 1, %s5927_s21   ;;  %s135_s25 = sadd.s32 1, %s5923_s20 }
   0x5   : > { %s132_s26 = ssub.s32 %s5927_s21, %s5986_s24  ;;  %p145_p0 = scmp.ne.s32.totalorder %s5923_s20, %s5919_s19 }
   0x6   : > { %p133_p1 = scmp.eq.s32.totalorder %s132_s26, 0  ;;  %p146_p2 = scmp.eq.s32.totalorder %s5982_s22, 1 }
   0x7   : > { %p151_p3 = scmp.ne.s32.totalorder %s5919_s19, %s5915_s18  ;;  %p152_p4 = scmp.eq.s32.totalorder %s4450_s23, 1 }
   0x8   : > { %s5997_s27 = scalar_select %p133_p1, %s5923_s20, %s135_s25  }
   0x9   : > { %p5999_p5 = por %p146_p2, %p145_p0  ;;  %p6003_p6 = por %p152_p4, %p151_p3 }
   0xa   : > { %p4453_p7 = scmp.ge.s32.totalorder %s5927_s21, 1  ;;  %p189_p8 = scmp.lt.s32.totalorder %s5927_s21, 3 }
   0xc   : > { %p190_p9 = pnand %p4453_p7, %p189_p8 }
   0xd   : > { %p215_p10 = scmp.lt.s32.totalorder (!%p190_p9), %s5982_s22, 1  ;;  %s213_s25 = sand.u32 (!%p190_p9), 1, %s5919_s19  }
   0xe   : > { %193 = sbr.rel (%p190_p9) target bundleno = 1251 (0x4e3), region = 40  ;;  %s4990_s26 = sshll.u32 (!%p190_p9), %s5982_s22, 4 }
   0xf   : > { %s214_s30 = scalar_lea.vmem (!%p190_p9), [#allocation2], %s213_s25  ;;  %s4393_s9 = scalar_lea.hbm (!%p190_p9), %s7815_s5, %s4990_s26 }
  0x10   : > { %s4395_s6 = sshll.u32 (!%p190_p9), %s214_s30, 4  ;;  %s4383_s10 = scalar_lea.sflag (!%p190_p9), [#allocation3], %s213_s25  ;;  %s4396_s6 = int_to_ptr.vmem [resolvable:$true] %s4395_s6 }
  0x11   : > { %s5867_s11 = scalar_lea.vmem (!%p190_p9), %s4396_s6, 16  ;;  %s5930_s12 = smov (!%p190_p9), [#allocation2]  }
  0x12   : > { %p5868_p11 = scmp.ne.s32.totalorder (!%p190_p9), %s4396_s6, %s5867_s11  ;;  %s5871_s13 = sshll.u32 (!%p190_p9), %s5930_s12, 4  ;;  %s5872_s13 = int_to_ptr.vmem [resolvable:$false] %s5871_s13 }
  0x13   : > { %v5078_v0 = vld [vmem:[%s7811_s1 + $0xe4] ss:$16 sps:$4 sm:$0xff]   ;;  %v5082_v2 = vld [vmem:[%s7811_s1 + $0xe0] ss:$16 sps:$4 sm:$0xff]   ;;  %v5929_v36 = vmov 1966171168   ;;  %v729_v38 = vlaneseq  ;;  %p5874_p0 = scmp.lt.s32.totalorder %s4396_s6, %s5872_s13 }
  0x14   : > { %v5080_v1 = vld [vmem:[%s7811_s1 + $0x2e4] ss:$16 sps:$4 sm:$0xff]   ;;  %3363 = vmatprep.subr.bf16.mxu0 %v5078_v0  ;;  %v5083_v3 = vld [vmem:[%s7811_s1 + $0x2e0] ss:$16 sps:$4 sm:$0xff]   ;;  %v727_v37 = vunpack.c.l.s4 %v5929_v36  ;;  %s216_s15 = scalar_select %p215_p10, %s5982_s22, 1  ;;  %vm3359_vm0 = vcmask 654336  }
  0x15   : > { %3404 = vmatprep.subr.bf16.mxu1 %v5080_v1  ;;  %v5084_v4 = vld [vmem:[%s7811_s1 + $0xc4] ss:$16 sps:$4 sm:$0xff]   ;;  %3364 = vmatpush1.bf16.msra.mxu0 %v5082_v2  ;;  %v5088_v6 = vld [vmem:[%s7811_s1 + $0xc0] ss:$16 sps:$4 sm:$0xff]   ;;  %v6128_v43 = vshrl.u32 %v729_v38, 7  ;;  %vm4284_vm1 = vcmask 1041408   ;;  %p5869_p12 = pnand %p5868_p11, %p5999_p5 }
  0x16   : > { %3405 = vmatpush1.bf16.msra.mxu1 %v5083_v3  ;;  %v5086_v5 = vld [vmem:[%s7811_s1 + $0x2c4] ss:$16 sps:$4 sm:$0xff]   ;;  %3365 = vmatprep.subr.bf16.mxu0 %v5084_v4  ;;  %v5089_v7 = vld [vmem:[%s7811_s1 + $0x2c0] ss:$16 sps:$4 sm:$0xff]   ;;  %v728_v42 = vunpack.c.0.s8 %v727_v37  ;;  %s4454_s8 = sshll.u32 %s216_s15, 4  ;;  %vm4280_vm2 = vcmask 949248  }
  0x17   : > { %3406 = vmatprep.subr.bf16.mxu1 %v5086_v5  ;;  %v5090_v8 = vld [vmem:[%s7811_s1 + $0xa4] ss:$16 sps:$4 sm:$0xff]   ;;  %v5094_v10 = vld [vmem:[%s7811_s1 + $0xa0] ss:$16 sps:$4 sm:$0xff]   ;;  %s6148_s23 = scalar_lea.vmem %s7810_s0, %s4454_s8  ;;  %vm4368_vm3 = vcmask 73728   ;;  %p5870_p13 = pneg %p5869_p12 }
  0x18   : > { %v5092_v9 = vld [vmem:[%s7811_s1 + $0x2a4] ss:$16 sps:$4 sm:$0xff]   ;;  %v5095_v11 = vld [vmem:[%s7811_s1 + $0x2a0] ss:$16 sps:$4 sm:$0xff]   ;;  %v6151_v49 = vsub.s32 %v728_v42, %v6128_v43  ;;  %s5873_s22 = scalar_lea.vmem %s5872_s13, 32 }
  0x19   : > { %3366 = vmatpush1.bf16.msra.mxu0 %v5088_v6  ;;  %v5096_v12 = vld [vmem:[%s7811_s1 + $0x84] ss:$16 sps:$4 sm:$0xff]   ;;  %v5100_v14 = vld [vmem:[%s7811_s1 + $0x80] ss:$16 sps:$4 sm:$0xff]   ;;  %p5875_p1 = scmp.lt.s32.totalorder %s5873_s22, %s5867_s11 }
  0x1a   : > { %3407 = vmatpush1.bf16.msra.mxu1 %v5089_v7  ;;  %3367 = vmatprep.subr.bf16.mxu0 %v5090_v8  ;;  %v5098_v13 = vld [vmem:[%s7811_s1 + $0x284] ss:$16 sps:$4 sm:$0xff]   ;;  %v5101_v15 = vld [vmem:[%s7811_s1 + $0x280] ss:$16 sps:$4 sm:$0xff]  }
  0x1b   : > { %3408 = vmatprep.subr.bf16.mxu1 %v5092_v9  ;;  %v5102_v16 = vld [vmem:[%s7811_s1 + $0x64] ss:$16 sps:$4 sm:$0xff]   ;;  %v5106_v18 = vld [vmem:[%s7811_s1 + $0x60] ss:$16 sps:$4 sm:$0xff]   ;;  %p5876_p2 = por %p5875_p1, %p5874_p0 }
  0x1c   : > { %v5104_v17 = vld [vmem:[%s7811_s1 + $0x264] ss:$16 sps:$4 sm:$0xff]   ;;  %v5107_v19 = vld [vmem:[%s7811_s1 + $0x260] ss:$16 sps:$4 sm:$0xff]  }
  0x1d   : > { %3368 = vmatpush1.bf16.msra.mxu0 %v5094_v10  ;;  %v5108_v20 = vld [vmem:[%s7811_s1 + $0x44] ss:$16 sps:$4 sm:$0xff]   ;;  %v5112_v22 = vld [vmem:[%s7811_s1 + $0x40] ss:$16 sps:$4 sm:$0xff]   ;;  %p5877_p3 = pnand %p5876_p2, %p5870_p13 }
  0x1e   : > { %3409 = vmatpush1.bf16.msra.mxu1 %v5095_v11  ;;  %3369 = vmatprep.subr.bf16.mxu0 %v5096_v12  ;;  %v5110_v21 = vld [vmem:[%s7811_s1 + $0x244] ss:$16 sps:$4 sm:$0xff]   ;;  %v5113_v23 = vld [vmem:[%s7811_s1 + $0x240] ss:$16 sps:$4 sm:$0xff]  }
  0x1f   : > { %3410 = vmatprep.subr.bf16.mxu1 %v5098_v13  ;;  %v5114_v24 = vld [vmem:[%s7811_s1 + $0x24] ss:$16 sps:$4 sm:$0xff]   ;;  %v5118_v26 = vld [vmem:[%s7811_s1 + $0x20] ss:$16 sps:$4 sm:$0xff]  }
  0x20   : > { %v5116_v25 = vld [vmem:[%s7811_s1 + $0x224] ss:$16 sps:$4 sm:$0xff]   ;;  %v5119_v27 = vld [vmem:[%s7811_s1 + $0x220] ss:$16 sps:$4 sm:$0xff]  }
  0x21   : > { %3370 = vmatpush1.bf16.msra.mxu0 %v5100_v14  ;;  %v5120_v28 = vld [vmem:[%s7811_s1 + $0x4] ss:$16 sps:$4 sm:$0xff]   ;;  %v5124_v30 = vld [vmem:[%s7811_s1] ss:$16 sps:$4 sm:$0xff]  }
  0x22   : > { %3411 = vmatpush1.bf16.msra.mxu1 %v5101_v15  ;;  %3371 = vmatprep.subr.bf16.mxu0 %v5102_v16  ;;  %v5122_v29 = vld [vmem:[%s7811_s1 + $0x204] ss:$16 sps:$4 sm:$0xff]   ;;  %v5125_v31 = vld [vmem:[%s7811_s1 + $0x200] ss:$16 sps:$4 sm:$0xff]  }
  0x23   : > { %3412 = vmatprep.subr.bf16.mxu1 %v5104_v17  ;;  %v5126_v32 = vld [vmem:[%s7811_s1 + $0x1e4] ss:$16 sps:$4 sm:$0xff]   ;;  %v5130_v34 = vld [vmem:[%s7811_s1 + $0x1e0] ss:$16 sps:$4 sm:$0xff]  }
  0x24   : > { %v5128_v33 = vld [vmem:[%s7811_s1 + $0x3e4] ss:$16 sps:$4 sm:$0xff]   ;;  %v5131_v35 = vld [vmem:[%s7811_s1 + $0x3e0] ss:$16 sps:$4 sm:$0xff]  }
  0x25   : > { %3372 = vmatpush1.bf16.msra.mxu0 %v5106_v18  ;;  %v5132_v39 = vld [vmem:[%s7811_s1 + $0x1c4] ss:$16 sps:$4 sm:$0xff]   ;;  %v5136_v41 = vld [vmem:[%s7811_s1 + $0x1c0] ss:$16 sps:$4 sm:$0xff]  }
  0x26   : > { %3413 = vmatpush1.bf16.msra.mxu1 %v5107_v19  ;;  %3373 = vmatprep.subr.bf16.mxu0 %v5108_v20  ;;  %v5134_v40 = vld [vmem:[%s7811_s1 + $0x3c4] ss:$16 sps:$4 sm:$0xff]   ;;  %v5137_v44 = vld [vmem:[%s7811_s1 + $0x3c0] ss:$16 sps:$4 sm:$0xff]  }
  0x27   : > { %3414 = vmatprep.subr.bf16.mxu1 %v5110_v21  ;;  %v5138_v45 = vld [vmem:[%s7811_s1 + $0x1a4] ss:$16 sps:$4 sm:$0xff]   ;;  %v5142_v47 = vld [vmem:[%s7811_s1 + $0x1a0] ss:$16 sps:$4 sm:$0xff]  }
  0x28   : > { %v5140_v46 = vld [vmem:[%s7811_s1 + $0x3a4] ss:$16 sps:$4 sm:$0xff]   ;;  %v5143_v48 = vld [vmem:[%s7811_s1 + $0x3a0] ss:$16 sps:$4 sm:$0xff]  }
  0x29   : > { %3374 = vmatpush1.bf16.msra.mxu0 %v5112_v22  ;;  %v5144_v50 = vld [vmem:[%s7811_s1 + $0x184] ss:$16 sps:$4 sm:$0xff]   ;;  %v5148_v53 = vld [vmem:[%s7811_s1 + $0x180] ss:$16 sps:$4 sm:$0xff]  }
  0x2a   : > { %3415 = vmatpush1.bf16.msra.mxu1 %v5113_v23  ;;  %3375 = vmatprep.subr.bf16.mxu0 %v5114_v24  ;;  %v5146_v51 = vld [vmem:[%s7811_s1 + $0x384] ss:$16 sps:$4 sm:$0xff]   ;;  %v5149_v55 = vld [vmem:[%s7811_s1 + $0x380] ss:$16 sps:$4 sm:$0xff]  }
  0x2b   : > { %3416 = vmatprep.subr.bf16.mxu1 %v5116_v25  ;;  %v220_v52 = vld [vmem:[%s6148_s23] sm:$0xff] }
  0x2c   : > { %v732_v54 = vrot.slane %v220_v52, %v6151_v49  ;;  %v5150_v56 = vld [vmem:[%s7811_s1 + $0x164] ss:$16 sps:$4 sm:$0xff]   ;;  %v5154_v59 = vld [vmem:[%s7811_s1 + $0x160] ss:$16 sps:$4 sm:$0xff]   ;;  %v725_v1 = vcombine.high %v220_v52, %v220_v52 }
  0x2d   : > { %3376 = vmatpush1.bf16.msra.mxu0 %v5118_v26  ;;  %v5152_v57 = vld [vmem:[%s7811_s1 + $0x364] ss:$16 sps:$4 sm:$0xff]   ;;  %v5155_v61 = vld [vmem:[%s7811_s1 + $0x360] ss:$16 sps:$4 sm:$0xff]  }
  0x2e   : > { %3417 = vmatpush1.bf16.msra.mxu1 %v5119_v27  ;;  %3377 = vmatprep.subr.bf16.mxu0 %v5120_v28  ;;  %v740_v58 = vcombine.high %v732_v54, %v732_v54  ;;  %v5156_v62 = vld [vmem:[%s7811_s1 + $0x144] ss:$16 sps:$4 sm:$0xff]   ;;  %v5160_v2 = vld [vmem:[%s7811_s1 + $0x140] ss:$16 sps:$4 sm:$0xff]   ;;  %v6207_v6 = vrot.slane %v725_v1, %v6151_v49  ;;  %v6227_v13 = vrot.slane %v732_v54, %v6151_v49 }
  0x2f   : > { %3418 = vmatprep.subr.bf16.mxu1 %v5122_v29  ;;  %v5158_v63 = vld [vmem:[%s7811_s1 + $0x344] ss:$16 sps:$4 sm:$0xff]   ;;  %v5161_v3 = vld [vmem:[%s7811_s1 + $0x340] ss:$16 sps:$4 sm:$0xff]  }
  0x30   : > { %v6177_v60 = vrot.slane %v740_v58, %v6151_v49  ;;  %v5162_v4 = vld [vmem:[%s7811_s1 + $0x124] ss:$16 sps:$4 sm:$0xff]   ;;  %v5166_v7 = vld [vmem:[%s7811_s1 + $0x120] ss:$16 sps:$4 sm:$0xff]   ;;  %v741_v11 = vcombine.high %v6207_v6, %v6207_v6  ;;  %v6243_v18 = vcombine.high %v6227_v13, %v6227_v13 }
  0x31   : > { %3378 = vmatpush1.bf16.msra.mxu0 %v5124_v30  ;;  %v5164_v5 = vld [vmem:[%s7811_s1 + $0x324] ss:$16 sps:$4 sm:$0xff]   ;;  %v5167_v8 = vld [vmem:[%s7811_s1 + $0x320] ss:$16 sps:$4 sm:$0xff]  }
  0x32   : > { %3419 = vmatpush1.bf16.msra.mxu1 %v5125_v31  ;;  %3379 = vmatprep.subr.bf16.mxu0 %v5126_v32  ;;  %v6190_v0 = vcombine.high %v6177_v60, %v6177_v60  ;;  %v5168_v9 = vld [vmem:[%s7811_s1 + $0x104] ss:$16 sps:$4 sm:$0xff]   ;;  %v5172_v12 = vld [vmem:[%s7811_s1 + $0x100] ss:$16 sps:$4 sm:$0xff]   ;;  %v6239_v17 = vrot.slane %v741_v11, %v6151_v49 }
  0x33   : > { %3420 = vmatprep.subr.bf16.mxu1 %v5128_v33  ;;  %3395 = vmatprep.mubr.bf16.mxu0 %v6177_v60  ;;  %v5170_v10 = vld [vmem:[%s7811_s1 + $0x304] ss:$16 sps:$4 sm:$0xff]   ;;  %v5173_v14 = vld [vmem:[%s7811_s1 + $0x300] ss:$16 sps:$4 sm:$0xff]  }
  0x34   : > { %3436 = vmatprep.mubr.bf16.mxu1 %v6190_v0  ;;  %v5176_v15 = vld [vmem:[%s7811_s1 + $0x4e4] ss:$16 sps:$4 sm:$0xff]   ;;  %v5174_v19 = vld [vmem:[%s7811_s1 + $0x4e0] ss:$16 sps:$4 sm:$0xff]   ;;  %v6259_v23 = vcombine.high %v6239_v17, %v6239_v17 }
  0x35   : > { %3380 = vmatpush2.bf16.msra.mxu0 %v5130_v34  ;;  %v5179_v16 = vld [vmem:[%s7811_s1 + $0x6e4] ss:$16 sps:$4 sm:$0xff]   ;;  %v5177_v20 = vld [vmem:[%s7811_s1 + $0x6e0] ss:$16 sps:$4 sm:$0xff]  }
  0x36   : > { %3421 = vmatpush2.bf16.msra.mxu1 %v5131_v35  ;;  %3381 = vmatprep.subr.bf16.mxu0 %v5132_v39  ;;  %v5182_v21 = vld [vmem:[%s7811_s1 + $0x4c4] ss:$16 sps:$4 sm:$0xff]   ;;  %v5180_v24 = vld [vmem:[%s7811_s1 + $0x4c0] ss:$16 sps:$4 sm:$0xff]  }
  0x37   : > { %3422 = vmatprep.subr.bf16.mxu1 %v5134_v40  ;;  %v5185_v22 = vld [vmem:[%s7811_s1 + $0x6c4] ss:$16 sps:$4 sm:$0xff]   ;;  %v5183_v25 = vld [vmem:[%s7811_s1 + $0x6c0] ss:$16 sps:$4 sm:$0xff]  }
  0x38   : > { %v5188_v26 = vld [vmem:[%s7811_s1 + $0x4a4] ss:$16 sps:$4 sm:$0xff]   ;;  %v5186_v28 = vld [vmem:[%s7811_s1 + $0x4a0] ss:$16 sps:$4 sm:$0xff]  }
  0x39   : > { %3382 = vmatpush2.bf16.msra.mxu0 %v5136_v41  ;;  %v5191_v27 = vld [vmem:[%s7811_s1 + $0x6a4] ss:$16 sps:$4 sm:$0xff]   ;;  %v5189_v29 = vld [vmem:[%s7811_s1 + $0x6a0] ss:$16 sps:$4 sm:$0xff]  }
  0x3a   : > { %3423 = vmatpush2.bf16.msra.mxu1 %v5137_v44  ;;  %3383 = vmatprep.subr.bf16.mxu0 %v5138_v45  ;;  %v5194_v30 = vld [vmem:[%s7811_s1 + $0x484] ss:$16 sps:$4 sm:$0xff]   ;;  %v5192_v32 = vld [vmem:[%s7811_s1 + $0x480] ss:$16 sps:$4 sm:$0xff]  }
  0x3b   : > { %3424 = vmatprep.subr.bf16.mxu1 %v5140_v46  ;;  %v5197_v31 = vld [vmem:[%s7811_s1 + $0x684] ss:$16 sps:$4 sm:$0xff]   ;;  %v5195_v33 = vld [vmem:[%s7811_s1 + $0x680] ss:$16 sps:$4 sm:$0xff]  }
  0x3c   : > { %v5200_v34 = vld [vmem:[%s7811_s1 + $0x464] ss:$16 sps:$4 sm:$0xff]   ;;  %v5198_v36 = vld [vmem:[%s7811_s1 + $0x460] ss:$16 sps:$4 sm:$0xff]  }
  0x3d   : > { %3384 = vmatpush2.bf16.msra.mxu0 %v5142_v47  ;;  %v5203_v35 = vld [vmem:[%s7811_s1 + $0x664] ss:$16 sps:$4 sm:$0xff]   ;;  %v5201_v37 = vld [vmem:[%s7811_s1 + $0x660] ss:$16 sps:$4 sm:$0xff]  }
  0x3e   : > { %3425 = vmatpush2.bf16.msra.mxu1 %v5143_v48  ;;  %3385 = vmatprep.subr.bf16.mxu0 %v5144_v50  ;;  %v5206_v38 = vld [vmem:[%s7811_s1 + $0x444] ss:$16 sps:$4 sm:$0xff]   ;;  %v5204_v40 = vld [vmem:[%s7811_s1 + $0x440] ss:$16 sps:$4 sm:$0xff]  }
  0x3f   : > { %3426 = vmatprep.subr.bf16.mxu1 %v5146_v51  ;;  %v5209_v39 = vld [vmem:[%s7811_s1 + $0x644] ss:$16 sps:$4 sm:$0xff]   ;;  %v5207_v41 = vld [vmem:[%s7811_s1 + $0x640] ss:$16 sps:$4 sm:$0xff]  }
  0x40   : > { %v5212_v42 = vld [vmem:[%s7811_s1 + $0x424] ss:$16 sps:$4 sm:$0xff]   ;;  %v5210_v45 = vld [vmem:[%s7811_s1 + $0x420] ss:$16 sps:$4 sm:$0xff]  }
  0x41   : > { %3386 = vmatpush2.bf16.msra.mxu0 %v5148_v53  ;;  %v5215_v44 = vld [vmem:[%s7811_s1 + $0x624] ss:$16 sps:$4 sm:$0xff]   ;;  %v5213_v46 = vld [vmem:[%s7811_s1 + $0x620] ss:$16 sps:$4 sm:$0xff]  }
  0x42   : > { %3427 = vmatpush2.bf16.msra.mxu1 %v5149_v55  ;;  %3387 = vmatprep.subr.bf16.mxu0 %v5150_v56  ;;  %v5218_v47 = vld [vmem:[%s7811_s1 + $0x404] ss:$16 sps:$4 sm:$0xff]   ;;  %v5216_v50 = vld [vmem:[%s7811_s1 + $0x400] ss:$16 sps:$4 sm:$0xff]  }
  0x43   : > { %3428 = vmatprep.subr.bf16.mxu1 %v5152_v57  ;;  %v5221_v48 = vld [vmem:[%s7811_s1 + $0x604] ss:$16 sps:$4 sm:$0xff]   ;;  %v5219_v51 = vld [vmem:[%s7811_s1 + $0x600] ss:$16 sps:$4 sm:$0xff]  }
  0x44   : > { %v5224_v52 = vld [vmem:[%s7811_s1 + $0x5e4] ss:$16 sps:$4 sm:$0xff]   ;;  %v5222_v54 = vld [vmem:[%s7811_s1 + $0x5e0] ss:$16 sps:$4 sm:$0xff]  }
  0x45   : > { %3388 = vmatpush2.bf16.msra.mxu0 %v5154_v59  ;;  %v5227_v53 = vld [vmem:[%s7811_s1 + $0x7e4] ss:$16 sps:$4 sm:$0xff]   ;;  %v5225_v55 = vld [vmem:[%s7811_s1 + $0x7e0] ss:$16 sps:$4 sm:$0xff]  }
  0x46   : > { %3429 = vmatpush2.bf16.msra.mxu1 %v5155_v61  ;;  %3389 = vmatprep.subr.bf16.mxu0 %v5156_v62  ;;  %v5230_v56 = vld [vmem:[%s7811_s1 + $0x5c4] ss:$16 sps:$4 sm:$0xff]   ;;  %v5228_v58 = vld [vmem:[%s7811_s1 + $0x5c0] ss:$16 sps:$4 sm:$0xff]  }
  0x47   : > { %3430 = vmatprep.subr.bf16.mxu1 %v5158_v63  ;;  %v5233_v57 = vld [vmem:[%s7811_s1 + $0x7c4] ss:$16 sps:$4 sm:$0xff]   ;;  %v5231_v59 = vld [vmem:[%s7811_s1 + $0x7c0] ss:$16 sps:$4 sm:$0xff]  }
  0x48   : > { %v5236_v61 = vld [vmem:[%s7811_s1 + $0x5a4] ss:$16 sps:$4 sm:$0xff]   ;;  %v5234_v63 = vld [vmem:[%s7811_s1 + $0x5a0] ss:$16 sps:$4 sm:$0xff]  }
  0x49   : > { %3390 = vmatpush2.bf16.msra.mxu0 %v5160_v2  ;;  %v5239_v62 = vld [vmem:[%s7811_s1 + $0x7a4] ss:$16 sps:$4 sm:$0xff]   ;;  %v5237_v1 = vld [vmem:[%s7811_s1 + $0x7a0] ss:$16 sps:$4 sm:$0xff]  }
  0x4a   : > { %3431 = vmatpush2.bf16.msra.mxu1 %v5161_v3  ;;  %3391 = vmatprep.subr.bf16.mxu0 %v5162_v4  ;;  %v5242_v2 = vld [vmem:[%s7811_s1 + $0x584] ss:$16 sps:$4 sm:$0xff]   ;;  %v5240_v4 = vld [vmem:[%s7811_s1 + $0x580] ss:$16 sps:$4 sm:$0xff]  }
  0x4b   : > { %3432 = vmatprep.subr.bf16.mxu1 %v5164_v5  ;;  %v5245_v3 = vld [vmem:[%s7811_s1 + $0x784] ss:$16 sps:$4 sm:$0xff]   ;;  %v5243_v5 = vld [vmem:[%s7811_s1 + $0x780] ss:$16 sps:$4 sm:$0xff]  }
  0x4c   : > { %v5254_v11 = vld [vmem:[%s7811_s1 + $0x544] ss:$16 sps:$4 sm:$0xff]  }
  0x4d   : > { %3392 = vmatpush2.bf16.msra.mxu0 %v5166_v7  ;;  %v5248_v7 = vld [vmem:[%s7811_s1 + $0x564] ss:$16 sps:$4 sm:$0xff]  }
  0x4e   : > { %3433 = vmatpush2.bf16.msra.mxu1 %v5167_v8  ;;  %3393 = vmatprep.subr.bf16.mxu0 %v5168_v9  ;;  %v5251_v8 = vld [vmem:[%s7811_s1 + $0x764] ss:$16 sps:$4 sm:$0xff]   ;;  %v5246_v9 = vld [vmem:[%s7811_s1 + $0x560] ss:$16 sps:$4 sm:$0xff]  }
  0x4f   : > { %3434 = vmatprep.subr.bf16.mxu1 %v5170_v10  ;;  %v5249_v10 = vld [vmem:[%s7811_s1 + $0x760] ss:$16 sps:$4 sm:$0xff]  }
  0x51   : > { %3394 = vmatpush2.bf16.msra.mxu0 %v5172_v12  ;;  %v5257_v12 = vld [vmem:[%s7811_s1 + $0x744] ss:$16 sps:$4 sm:$0xff]  }
  0x52   : > { %3435 = vmatpush2.bf16.msra.mxu1 %v5173_v14  ;;  %3445 = vmatprep.subr.bf16.mxu0 %v5176_v15  ;;  %v5252_v14 = vld [vmem:[%s7811_s1 + $0x540] ss:$16 sps:$4 sm:$0xff]  }
  0x53   : > { %3486 = vmatprep.subr.bf16.mxu1 %v5179_v16  ;;  %v5255_v15 = vld [vmem:[%s7811_s1 + $0x740] ss:$16 sps:$4 sm:$0xff]   ;;  %v5260_v16 = vld [vmem:[%s7811_s1 + $0x524] ss:$16 sps:$4 sm:$0xff]  }
  0x54   : > { %3396 = vmatmul.mubr.bf16.vlgmr.msra.gmra.mxu0 %v6227_v13 }
  0x55   : > { %3437 = vmatmul.mubr.bf16.vlgmr.msra.gmra.mxu1 %v6243_v18  ;;  %3446 = vmatpush1.bf16.msra.mxu0 %v5174_v19  ;;  %v5263_v19 = vld [vmem:[%s7811_s1 + $0x724] ss:$16 sps:$4 sm:$0xff]  }
  0x56   : > { %3487 = vmatpush1.bf16.msra.mxu1 %v5177_v20  ;;  %3447 = vmatprep.subr.bf16.mxu0 %v5182_v21  ;;  %v5258_v20 = vld [vmem:[%s7811_s1 + $0x520] ss:$16 sps:$4 sm:$0xff]  }
  0x57   : > { %3488 = vmatprep.subr.bf16.mxu1 %v5185_v22  ;;  %3477 = vmatprep.mubr.bf16.mxu0 %v6239_v17  ;;  %v5261_v21 = vld [vmem:[%s7811_s1 + $0x720] ss:$16 sps:$4 sm:$0xff]   ;;  %v5266_v22 = vld [vmem:[%s7811_s1 + $0x504] ss:$16 sps:$4 sm:$0xff]  }
  0x58   : > { %3518 = vmatprep.mubr.bf16.mxu1 %v6259_v23 }
  0x59   : > { %3448 = vmatpush1.bf16.msra.mxu0 %v5180_v24  ;;  %v5269_v24 = vld [vmem:[%s7811_s1 + $0x704] ss:$16 sps:$4 sm:$0xff]  }
  0x5a   : > { %3489 = vmatpush1.bf16.msra.mxu1 %v5183_v25  ;;  %3449 = vmatprep.subr.bf16.mxu0 %v5188_v26  ;;  %v5264_v25 = vld [vmem:[%s7811_s1 + $0x500] ss:$16 sps:$4 sm:$0xff]   ;;  %v6438_v26 = vrot.slane %v6207_v6, %v6151_v49 }
  0x5b   : > { %3490 = vmatprep.subr.bf16.mxu1 %v5191_v27  ;;  %v5267_v27 = vld [vmem:[%s7811_s1 + $0x700] ss:$16 sps:$4 sm:$0xff]  }
  0x5c   : > { %v6451_v6 = vcombine.high %v6438_v26, %v6438_v26 }
  0x5d   : > { %3450 = vmatpush1.bf16.msra.mxu0 %v5186_v28  ;;  %v5273_v28 = vld [vmem:[%s7811_s1 + $0x8e4] ss:$16 sps:$4 sm:$0xff]  }
  0x5e   : > { %3491 = vmatpush1.bf16.msra.mxu1 %v5189_v29  ;;  %3451 = vmatprep.subr.bf16.mxu0 %v5194_v30  ;;  %v5276_v29 = vld [vmem:[%s7811_s1 + $0xae4] ss:$16 sps:$4 sm:$0xff]   ;;  %v5271_v30 = vld [vmem:[%s7811_s1 + $0x8e0] ss:$16 sps:$4 sm:$0xff]  }
  0x5f   : > { %3492 = vmatprep.subr.bf16.mxu1 %v5197_v31  ;;  %v5274_v31 = vld [vmem:[%s7811_s1 + $0xae0] ss:$16 sps:$4 sm:$0xff]  }
  0x61   : > { %3452 = vmatpush1.bf16.msra.mxu0 %v5192_v32  ;;  %v6460_v32 = vld [vmem:[%s6148_s23 + $0x8] sm:$0xff] }
  0x62   : > { %3493 = vmatpush1.bf16.msra.mxu1 %v5195_v33  ;;  %3453 = vmatprep.subr.bf16.mxu0 %v5200_v34  ;;  %v5279_v33 = vld [vmem:[%s7811_s1 + $0x8c4] ss:$16 sps:$4 sm:$0xff]  }
  0x63   : > { %3494 = vmatprep.subr.bf16.mxu1 %v5203_v35  ;;  %v5282_v34 = vld [vmem:[%s7811_s1 + $0xac4] ss:$16 sps:$4 sm:$0xff]   ;;  %v6470_v35 = vrot.slane %v6460_v32, %v6151_v49 }
  0x65   : > { %3454 = vmatpush1.bf16.msra.mxu0 %v5198_v36  ;;  %v789_v36 = vcombine.high %v6470_v35, %v6470_v35 }
  0x66   : > { %3495 = vmatpush1.bf16.msra.mxu1 %v5201_v37  ;;  %3455 = vmatprep.subr.bf16.mxu0 %v5206_v38  ;;  %v5277_v37 = vld [vmem:[%s7811_s1 + $0x8c0] ss:$16 sps:$4 sm:$0xff]  }
  0x67   : > { %3496 = vmatprep.subr.bf16.mxu1 %v5209_v39  ;;  %v5280_v38 = vld [vmem:[%s7811_s1 + $0xac0] ss:$16 sps:$4 sm:$0xff]   ;;  %v5285_v39 = vld [vmem:[%s7811_s1 + $0x8a4] ss:$16 sps:$4 sm:$0xff]  }
  0x69   : > { %3456 = vmatpush1.bf16.msra.mxu0 %v5204_v40  ;;  %v5288_v40 = vld [vmem:[%s7811_s1 + $0xaa4] ss:$16 sps:$4 sm:$0xff]  }
  0x6a   : > { %3497 = vmatpush1.bf16.msra.mxu1 %v5207_v41  ;;  %3457 = vmatprep.subr.bf16.mxu0 %v5212_v42  ;;  %v6489_v41 = vrot.slane %v789_v36, %v6151_v49  ;;  %v5349_v36 = vld [vmem:[%s7811_s1 + $0x940] ss:$16 sps:$4 sm:$0xff]  }
  0x6b   : > { %3498 = vmatprep.subr.bf16.mxu1 %v5215_v44  ;;  %v5283_v44 = vld [vmem:[%s7811_s1 + $0x8a0] ss:$16 sps:$4 sm:$0xff]  }
  0x6c   : > { %v6494_v42 = vcombine.high %v6489_v41, %v6489_v41 }
  0x6d   : > { %3458 = vmatpush1.bf16.msra.mxu0 %v5210_v45  ;;  %v5286_v45 = vld [vmem:[%s7811_s1 + $0xaa0] ss:$16 sps:$4 sm:$0xff]  }
  0x6e   : > { %3499 = vmatpush1.bf16.msra.mxu1 %v5213_v46  ;;  %3459 = vmatprep.subr.bf16.mxu0 %v5218_v47  ;;  %v5291_v46 = vld [vmem:[%s7811_s1 + $0x884] ss:$16 sps:$4 sm:$0xff]  }
  0x6f   : > { %3500 = vmatprep.subr.bf16.mxu1 %v5221_v48  ;;  %v5294_v47 = vld [vmem:[%s7811_s1 + $0xa84] ss:$16 sps:$4 sm:$0xff]   ;;  %v5289_v48 = vld [vmem:[%s7811_s1 + $0x880] ss:$16 sps:$4 sm:$0xff]  }
  0x71   : > { %3460 = vmatpush1.bf16.msra.mxu0 %v5216_v50  ;;  %v5292_v50 = vld [vmem:[%s7811_s1 + $0xa80] ss:$16 sps:$4 sm:$0xff]  }
  0x72   : > { %3501 = vmatpush1.bf16.msra.mxu1 %v5219_v51  ;;  %3461 = vmatprep.subr.bf16.mxu0 %v5224_v52  ;;  %v5297_v51 = vld [vmem:[%s7811_s1 + $0x864] ss:$16 sps:$4 sm:$0xff]  }
  0x73   : > { %3502 = vmatprep.subr.bf16.mxu1 %v5227_v53  ;;  %v5300_v52 = vld [vmem:[%s7811_s1 + $0xa64] ss:$16 sps:$4 sm:$0xff]   ;;  %v5295_v53 = vld [vmem:[%s7811_s1 + $0x860] ss:$16 sps:$4 sm:$0xff]  }
  0x75   : > { %3462 = vmatpush2.bf16.msra.mxu0 %v5222_v54  ;;  %v5298_v54 = vld [vmem:[%s7811_s1 + $0xa60] ss:$16 sps:$4 sm:$0xff]  }
  0x76   : > { %3503 = vmatpush2.bf16.msra.mxu1 %v5225_v55  ;;  %3463 = vmatprep.subr.bf16.mxu0 %v5230_v56  ;;  %v5303_v55 = vld [vmem:[%s7811_s1 + $0x844] ss:$16 sps:$4 sm:$0xff]  }
  0x77   : > { %3504 = vmatprep.subr.bf16.mxu1 %v5233_v57  ;;  %v5306_v56 = vld [vmem:[%s7811_s1 + $0xa44] ss:$16 sps:$4 sm:$0xff]   ;;  %v5301_v57 = vld [vmem:[%s7811_s1 + $0x840] ss:$16 sps:$4 sm:$0xff]  }
  0x79   : > { %3464 = vmatpush2.bf16.msra.mxu0 %v5228_v58  ;;  %v5304_v58 = vld [vmem:[%s7811_s1 + $0xa40] ss:$16 sps:$4 sm:$0xff]  }
  0x7a   : > { %3505 = vmatpush2.bf16.msra.mxu1 %v5231_v59  ;;  %3465 = vmatprep.subr.bf16.mxu0 %v5236_v61  ;;  %v5309_v59 = vld [vmem:[%s7811_s1 + $0x824] ss:$16 sps:$4 sm:$0xff]  }
  0x7b   : > { %3506 = vmatprep.subr.bf16.mxu1 %v5239_v62  ;;  %v5312_v61 = vld [vmem:[%s7811_s1 + $0xa24] ss:$16 sps:$4 sm:$0xff]   ;;  %v5307_v62 = vld [vmem:[%s7811_s1 + $0x820] ss:$16 sps:$4 sm:$0xff]  }
  0x7d   : > { %3466 = vmatpush2.bf16.msra.mxu0 %v5234_v63  ;;  %v5310_v63 = vld [vmem:[%s7811_s1 + $0xa20] ss:$16 sps:$4 sm:$0xff]  }
  0x7e   : > { %3507 = vmatpush2.bf16.msra.mxu1 %v5237_v1  ;;  %3467 = vmatprep.subr.bf16.mxu0 %v5242_v2  ;;  %v5315_v1 = vld [vmem:[%s7811_s1 + $0x804] ss:$16 sps:$4 sm:$0xff]  }
  0x7f   : > { %3508 = vmatprep.subr.bf16.mxu1 %v5245_v3  ;;  %v5318_v2 = vld [vmem:[%s7811_s1 + $0xa04] ss:$16 sps:$4 sm:$0xff]   ;;  %v5313_v3 = vld [vmem:[%s7811_s1 + $0x800] ss:$16 sps:$4 sm:$0xff]  }
  0x81   : > { %3468 = vmatpush2.bf16.msra.mxu0 %v5240_v4  ;;  %v5316_v4 = vld [vmem:[%s7811_s1 + $0xa00] ss:$16 sps:$4 sm:$0xff]  }
  0x82   : > { %3509 = vmatpush2.bf16.msra.mxu1 %v5243_v5  ;;  %3469 = vmatprep.subr.bf16.mxu0 %v5248_v7  ;;  %v5321_v5 = vld [vmem:[%s7811_s1 + $0x9e4] ss:$16 sps:$4 sm:$0xff]  }
  0x83   : > { %3510 = vmatprep.subr.bf16.mxu1 %v5251_v8  ;;  %v5324_v7 = vld [vmem:[%s7811_s1 + $0xbe4] ss:$16 sps:$4 sm:$0xff]   ;;  %v5319_v8 = vld [vmem:[%s7811_s1 + $0x9e0] ss:$16 sps:$4 sm:$0xff]  }
  0x85   : > { %3470 = vmatpush2.bf16.msra.mxu0 %v5246_v9  ;;  %v5322_v9 = vld [vmem:[%s7811_s1 + $0xbe0] ss:$16 sps:$4 sm:$0xff]  }
  0x86   : > { %3511 = vmatpush2.bf16.msra.mxu1 %v5249_v10  ;;  %3471 = vmatprep.subr.bf16.mxu0 %v5254_v11  ;;  %v5327_v10 = vld [vmem:[%s7811_s1 + $0x9c4] ss:$16 sps:$4 sm:$0xff]  }
  0x87   : > { %3512 = vmatprep.subr.bf16.mxu1 %v5257_v12  ;;  %v5330_v11 = vld [vmem:[%s7811_s1 + $0xbc4] ss:$16 sps:$4 sm:$0xff]   ;;  %v5325_v12 = vld [vmem:[%s7811_s1 + $0x9c0] ss:$16 sps:$4 sm:$0xff]  }
  0x89   : > { %3472 = vmatpush2.bf16.msra.mxu0 %v5252_v14  ;;  %v5328_v14 = vld [vmem:[%s7811_s1 + $0xbc0] ss:$16 sps:$4 sm:$0xff]  }
  0x8a   : > { %3513 = vmatpush2.bf16.msra.mxu1 %v5255_v15  ;;  %3473 = vmatprep.subr.bf16.mxu0 %v5260_v16  ;;  %v5333_v15 = vld [vmem:[%s7811_s1 + $0x9a4] ss:$16 sps:$4 sm:$0xff]  }
  0x8b   : > { %3514 = vmatprep.subr.bf16.mxu1 %v5263_v19  ;;  %v5336_v16 = vld [vmem:[%s7811_s1 + $0xba4] ss:$16 sps:$4 sm:$0xff]   ;;  %v5331_v19 = vld [vmem:[%s7811_s1 + $0x9a0] ss:$16 sps:$4 sm:$0xff]  }
  0x8d   : > { %3474 = vmatpush2.bf16.msra.mxu0 %v5258_v20  ;;  %v5334_v20 = vld [vmem:[%s7811_s1 + $0xba0] ss:$16 sps:$4 sm:$0xff]  }
  0x8e   : > { %3515 = vmatpush2.bf16.msra.mxu1 %v5261_v21  ;;  %3475 = vmatprep.subr.bf16.mxu0 %v5266_v22  ;;  %v5339_v21 = vld [vmem:[%s7811_s1 + $0x984] ss:$16 sps:$4 sm:$0xff]  }
  0x8f   : > { %3516 = vmatprep.subr.bf16.mxu1 %v5269_v24  ;;  %v5342_v22 = vld [vmem:[%s7811_s1 + $0xb84] ss:$16 sps:$4 sm:$0xff]   ;;  %v5337_v24 = vld [vmem:[%s7811_s1 + $0x980] ss:$16 sps:$4 sm:$0xff]  }
  0x91   : > { %3476 = vmatpush2.bf16.msra.mxu0 %v5264_v25  ;;  %v5340_v25 = vld [vmem:[%s7811_s1 + $0xb80] ss:$16 sps:$4 sm:$0xff]  }
  0x92   : > { %3517 = vmatpush2.bf16.msra.mxu1 %v5267_v27  ;;  %3527 = vmatprep.subr.bf16.mxu0 %v5273_v28  ;;  %v5345_v27 = vld [vmem:[%s7811_s1 + $0x964] ss:$16 sps:$4 sm:$0xff]  }
  0x93   : > { %3568 = vmatprep.subr.bf16.mxu1 %v5276_v29  ;;  %v5348_v28 = vld [vmem:[%s7811_s1 + $0xb64] ss:$16 sps:$4 sm:$0xff]   ;;  %v5343_v29 = vld [vmem:[%s7811_s1 + $0x960] ss:$16 sps:$4 sm:$0xff]  }
  0x94   : > { %3478 = vmatmul.mubr.bf16.vlgmr.msra.gmra.mxu0 %v6438_v26 }
  0x95   : > { %3519 = vmatmul.mubr.bf16.vlgmr.msra.gmra.mxu1 %v6451_v6  ;;  %3528 = vmatpush1.bf16.msra.mxu0 %v5271_v30  ;;  %v5346_v30 = vld [vmem:[%s7811_s1 + $0xb60] ss:$16 sps:$4 sm:$0xff]  }
  0x96   : > { %3569 = vmatpush1.bf16.msra.mxu1 %v5274_v31  ;;  %3529 = vmatprep.subr.bf16.mxu0 %v5279_v33  ;;  %v5351_v31 = vld [vmem:[%s7811_s1 + $0x944] ss:$16 sps:$4 sm:$0xff]  }
  0x97   : > { %3570 = vmatprep.subr.bf16.mxu1 %v5282_v34  ;;  %3559 = vmatprep.mubr.bf16.mxu0 %v6489_v41  ;;  %v5354_v33 = vld [vmem:[%s7811_s1 + $0xb44] ss:$16 sps:$4 sm:$0xff]   ;;  %v774_v34 = vcombine.high %v6460_v32, %v6460_v32 }
  0x98   : > { %3600 = vmatprep.mubr.bf16.mxu1 %v6494_v42  ;;  %v5360_v32 = vld [vmem:[%s7811_s1 + $0xb24] ss:$16 sps:$4 sm:$0xff]  }
  0x99   : > { %3530 = vmatpush1.bf16.msra.mxu0 %v5277_v37  ;;  %v5352_v37 = vld [vmem:[%s7811_s1 + $0xb40] ss:$16 sps:$4 sm:$0xff]  }
  0x9a   : > { %3571 = vmatpush1.bf16.msra.mxu1 %v5280_v38  ;;  %3531 = vmatprep.subr.bf16.mxu0 %v5285_v39  ;;  %v5357_v38 = vld [vmem:[%s7811_s1 + $0x924] ss:$16 sps:$4 sm:$0xff]   ;;  %v6644_v39 = vrot.slane %v774_v34, %v6151_v49  ;;  %v5419_v34 = vld [vmem:[%s7811_s1 + $0xf80] ss:$16 sps:$4 sm:$0xff]  }
  0x9b   : > { %3572 = vmatprep.subr.bf16.mxu1 %v5288_v40  ;;  %v5355_v40 = vld [vmem:[%s7811_s1 + $0x920] ss:$16 sps:$4 sm:$0xff]  }
  0x9d   : > { %3532 = vmatpush1.bf16.msra.mxu0 %v5283_v44  ;;  %v5358_v44 = vld [vmem:[%s7811_s1 + $0xb20] ss:$16 sps:$4 sm:$0xff]  }
  0x9e   : > { %3573 = vmatpush1.bf16.msra.mxu1 %v5286_v45  ;;  %3533 = vmatprep.subr.bf16.mxu0 %v5291_v46  ;;  %v5363_v45 = vld [vmem:[%s7811_s1 + $0x904] ss:$16 sps:$4 sm:$0xff]  }
  0x9f   : > { %3574 = vmatprep.subr.bf16.mxu1 %v5294_v47  ;;  %v5366_v46 = vld [vmem:[%s7811_s1 + $0xb04] ss:$16 sps:$4 sm:$0xff]   ;;  %v790_v47 = vcombine.high %v6644_v39, %v6644_v39 }
  0xa1   : > { %3534 = vmatpush1.bf16.msra.mxu0 %v5289_v48  ;;  %v5361_v48 = vld [vmem:[%s7811_s1 + $0x900] ss:$16 sps:$4 sm:$0xff]  }
  0xa2   : > { %3575 = vmatpush1.bf16.msra.mxu1 %v5292_v50  ;;  %3535 = vmatprep.subr.bf16.mxu0 %v5297_v51  ;;  %v6665_v50 = vrot.slane %v6470_v35, %v6151_v49  ;;  %v5364_v51 = vld [vmem:[%s7811_s1 + $0xb00] ss:$16 sps:$4 sm:$0xff]  }
  0xa3   : > { %3576 = vmatprep.subr.bf16.mxu1 %v5300_v52  ;;  %v5370_v52 = vld [vmem:[%s7811_s1 + $0xce4] ss:$16 sps:$4 sm:$0xff]  }
  0xa4   : > { %v6681_v35 = vcombine.high %v6665_v50, %v6665_v50 }
  0xa5   : > { %3536 = vmatpush1.bf16.msra.mxu0 %v5295_v53  ;;  %v5373_v53 = vld [vmem:[%s7811_s1 + $0xee4] ss:$16 sps:$4 sm:$0xff]  }
  0xa6   : > { %3577 = vmatpush1.bf16.msra.mxu1 %v5298_v54  ;;  %3537 = vmatprep.subr.bf16.mxu0 %v5303_v55  ;;  %v6677_v54 = vrot.slane %v790_v47, %v6151_v49  ;;  %v5368_v55 = vld [vmem:[%s7811_s1 + $0xce0] ss:$16 sps:$4 sm:$0xff]   ;;  %v5436_v47 = vld [vmem:[%s7811_s1 + $0xd84] ss:$16 sps:$4 sm:$0xff]  }
  0xa7   : > { %3578 = vmatprep.subr.bf16.mxu1 %v5306_v56  ;;  %v5371_v56 = vld [vmem:[%s7811_s1 + $0xee0] ss:$16 sps:$4 sm:$0xff]  }
  0xa9   : > { %3538 = vmatpush1.bf16.msra.mxu0 %v5301_v57  ;;  %v5376_v57 = vld [vmem:[%s7811_s1 + $0xcc4] ss:$16 sps:$4 sm:$0xff]  }
  0xaa   : > { %3579 = vmatpush1.bf16.msra.mxu1 %v5304_v58  ;;  %3539 = vmatprep.subr.bf16.mxu0 %v5309_v59  ;;  %v5379_v58 = vld [vmem:[%s7811_s1 + $0xec4] ss:$16 sps:$4 sm:$0xff]   ;;  %v6697_v59 = vcombine.high %v6677_v54, %v6677_v54 }
  0xab   : > { %3580 = vmatprep.subr.bf16.mxu1 %v5312_v61  ;;  %v5374_v61 = vld [vmem:[%s7811_s1 + $0xcc0] ss:$16 sps:$4 sm:$0xff]  }
  0xad   : > { %3540 = vmatpush1.bf16.msra.mxu0 %v5307_v62  ;;  %v5377_v62 = vld [vmem:[%s7811_s1 + $0xec0] ss:$16 sps:$4 sm:$0xff]  }
  0xae   : > { %3581 = vmatpush1.bf16.msra.mxu1 %v5310_v63  ;;  %3541 = vmatprep.subr.bf16.mxu0 %v5315_v1  ;;  %v5382_v63 = vld [vmem:[%s7811_s1 + $0xca4] ss:$16 sps:$4 sm:$0xff]  }
  0xaf   : > { %3582 = vmatprep.subr.bf16.mxu1 %v5318_v2  ;;  %v5385_v1 = vld [vmem:[%s7811_s1 + $0xea4] ss:$16 sps:$4 sm:$0xff]   ;;  %v5380_v2 = vld [vmem:[%s7811_s1 + $0xca0] ss:$16 sps:$4 sm:$0xff]  }
  0xb1   : > { %3542 = vmatpush1.bf16.msra.mxu0 %v5313_v3  ;;  %v5383_v3 = vld [vmem:[%s7811_s1 + $0xea0] ss:$16 sps:$4 sm:$0xff]  }
  0xb2   : > { %3583 = vmatpush1.bf16.msra.mxu1 %v5316_v4  ;;  %3543 = vmatprep.subr.bf16.mxu0 %v5321_v5  ;;  %v5388_v4 = vld [vmem:[%s7811_s1 + $0xc84] ss:$16 sps:$4 sm:$0xff]  }
  0xb3   : > { %3584 = vmatprep.subr.bf16.mxu1 %v5324_v7  ;;  %v5391_v5 = vld [vmem:[%s7811_s1 + $0xe84] ss:$16 sps:$4 sm:$0xff]   ;;  %v5386_v7 = vld [vmem:[%s7811_s1 + $0xc80] ss:$16 sps:$4 sm:$0xff]  }
  0xb5   : > { %3544 = vmatpush2.bf16.msra.mxu0 %v5319_v8  ;;  %v5389_v8 = vld [vmem:[%s7811_s1 + $0xe80] ss:$16 sps:$4 sm:$0xff]  }
  0xb6   : > { %3585 = vmatpush2.bf16.msra.mxu1 %v5322_v9  ;;  %3545 = vmatprep.subr.bf16.mxu0 %v5327_v10  ;;  %v5394_v9 = vld [vmem:[%s7811_s1 + $0xc64] ss:$16 sps:$4 sm:$0xff]  }
  0xb7   : > { %3586 = vmatprep.subr.bf16.mxu1 %v5330_v11  ;;  %v5397_v10 = vld [vmem:[%s7811_s1 + $0xe64] ss:$16 sps:$4 sm:$0xff]   ;;  %v5392_v11 = vld [vmem:[%s7811_s1 + $0xc60] ss:$16 sps:$4 sm:$0xff]  }
  0xb9   : > { %3546 = vmatpush2.bf16.msra.mxu0 %v5325_v12  ;;  %v5395_v12 = vld [vmem:[%s7811_s1 + $0xe60] ss:$16 sps:$4 sm:$0xff]  }
  0xba   : > { %3587 = vmatpush2.bf16.msra.mxu1 %v5328_v14  ;;  %3547 = vmatprep.subr.bf16.mxu0 %v5333_v15  ;;  %v5400_v14 = vld [vmem:[%s7811_s1 + $0xc44] ss:$16 sps:$4 sm:$0xff]  }
  0xbb   : > { %3588 = vmatprep.subr.bf16.mxu1 %v5336_v16  ;;  %v5403_v15 = vld [vmem:[%s7811_s1 + $0xe44] ss:$16 sps:$4 sm:$0xff]   ;;  %v5398_v16 = vld [vmem:[%s7811_s1 + $0xc40] ss:$16 sps:$4 sm:$0xff]  }
  0xbd   : > { %3548 = vmatpush2.bf16.msra.mxu0 %v5331_v19  ;;  %v5401_v19 = vld [vmem:[%s7811_s1 + $0xe40] ss:$16 sps:$4 sm:$0xff]  }
  0xbe   : > { %3589 = vmatpush2.bf16.msra.mxu1 %v5334_v20  ;;  %3549 = vmatprep.subr.bf16.mxu0 %v5339_v21  ;;  %v5406_v20 = vld [vmem:[%s7811_s1 + $0xc24] ss:$16 sps:$4 sm:$0xff]  }
  0xbf   : > { %3590 = vmatprep.subr.bf16.mxu1 %v5342_v22  ;;  %v5409_v21 = vld [vmem:[%s7811_s1 + $0xe24] ss:$16 sps:$4 sm:$0xff]   ;;  %v5404_v22 = vld [vmem:[%s7811_s1 + $0xc20] ss:$16 sps:$4 sm:$0xff]  }
  0xc1   : > { %3550 = vmatpush2.bf16.msra.mxu0 %v5337_v24  ;;  %v5407_v24 = vld [vmem:[%s7811_s1 + $0xe20] ss:$16 sps:$4 sm:$0xff]  }
  0xc2   : > { %3591 = vmatpush2.bf16.msra.mxu1 %v5340_v25  ;;  %3551 = vmatprep.subr.bf16.mxu0 %v5345_v27  ;;  %v5412_v25 = vld [vmem:[%s7811_s1 + $0xc04] ss:$16 sps:$4 sm:$0xff]  }
  0xc3   : > { %3592 = vmatprep.subr.bf16.mxu1 %v5348_v28  ;;  %v5415_v27 = vld [vmem:[%s7811_s1 + $0xe04] ss:$16 sps:$4 sm:$0xff]   ;;  %v5410_v28 = vld [vmem:[%s7811_s1 + $0xc00] ss:$16 sps:$4 sm:$0xff]  }
  0xc5   : > { %3552 = vmatpush2.bf16.msra.mxu0 %v5343_v29  ;;  %v5413_v29 = vld [vmem:[%s7811_s1 + $0xe00] ss:$16 sps:$4 sm:$0xff]  }
  0xc6   : > { %3593 = vmatpush2.bf16.msra.mxu1 %v5346_v30  ;;  %3553 = vmatprep.subr.bf16.mxu0 %v5351_v31  ;;  %v5418_v30 = vld [vmem:[%s7811_s1 + $0xde4] ss:$16 sps:$4 sm:$0xff]  }
  0xc7   : > { %3594 = vmatprep.subr.bf16.mxu1 %v5354_v33  ;;  %v5421_v31 = vld [vmem:[%s7811_s1 + $0xf84] ss:$16 sps:$4 sm:$0xff]   ;;  %v5416_v33 = vld [vmem:[%s7811_s1 + $0xde0] ss:$16 sps:$4 sm:$0xff]  }
  0xc9   : > { %3554 = vmatpush2.bf16.msra.mxu0 %v5349_v36  ;;  %v5424_v36 = vld [vmem:[%s7811_s1 + $0xdc4] ss:$16 sps:$4 sm:$0xff]  }
  0xca   : > { %3595 = vmatpush2.bf16.msra.mxu1 %v5352_v37  ;;  %3555 = vmatprep.subr.bf16.mxu0 %v5357_v38  ;;  %v5427_v37 = vld [vmem:[%s7811_s1 + $0xf64] ss:$16 sps:$4 sm:$0xff]   ;;  %v5422_v38 = vld [vmem:[%s7811_s1 + $0xdc0] ss:$16 sps:$4 sm:$0xff]  }
  0xcb   : > { %3596 = vmatprep.subr.bf16.mxu1 %v5360_v32  ;;  %v5425_v32 = vld [vmem:[%s7811_s1 + $0xf60] ss:$16 sps:$4 sm:$0xff]  }
  0xcd   : > { %3556 = vmatpush2.bf16.msra.mxu0 %v5355_v40  ;;  %v5430_v40 = vld [vmem:[%s7811_s1 + $0xda4] ss:$16 sps:$4 sm:$0xff]  }
  0xce   : > { %3597 = vmatpush2.bf16.msra.mxu1 %v5358_v44  ;;  %3557 = vmatprep.subr.bf16.mxu0 %v5363_v45  ;;  %v5433_v44 = vld [vmem:[%s7811_s1 + $0xf44] ss:$16 sps:$4 sm:$0xff]   ;;  %v5428_v45 = vld [vmem:[%s7811_s1 + $0xda0] ss:$16 sps:$4 sm:$0xff]  }
  0xcf   : > { %3598 = vmatprep.subr.bf16.mxu1 %v5366_v46  ;;  %v5431_v46 = vld [vmem:[%s7811_s1 + $0xf40] ss:$16 sps:$4 sm:$0xff]  }
  0xd1   : > { %3558 = vmatpush2.bf16.msra.mxu0 %v5361_v48  ;;  %v5439_v48 = vld [vmem:[%s7811_s1 + $0xf24] ss:$16 sps:$4 sm:$0xff]  }
  0xd2   : > { %3599 = vmatpush2.bf16.msra.mxu1 %v5364_v51  ;;  %3609 = vmatprep.subr.bf16.mxu0 %v5370_v52  ;;  %v5434_v51 = vld [vmem:[%s7811_s1 + $0xd80] ss:$16 sps:$4 sm:$0xff]  }
  0xd3   : > { %3650 = vmatprep.subr.bf16.mxu1 %v5373_v53  ;;  %v5437_v52 = vld [vmem:[%s7811_s1 + $0xf20] ss:$16 sps:$4 sm:$0xff]   ;;  %v5442_v53 = vld [vmem:[%s7811_s1 + $0xd64] ss:$16 sps:$4 sm:$0xff]  }
  0xd4   : > { %3560 = vmatmul.mubr.bf16.vlgmr.msra.gmra.mxu0 %v6665_v50 }
  0xd5   : > { %3601 = vmatmul.mubr.bf16.vlgmr.msra.gmra.mxu1 %v6681_v35  ;;  %3610 = vmatpush1.bf16.msra.mxu0 %v5368_v55  ;;  %v5445_v55 = vld [vmem:[%s7811_s1 + $0xf04] ss:$16 sps:$4 sm:$0xff]  }
  0xd6   : > { %3651 = vmatpush1.bf16.msra.mxu1 %v5371_v56  ;;  %3611 = vmatprep.subr.bf16.mxu0 %v5376_v57  ;;  %v5440_v56 = vld [vmem:[%s7811_s1 + $0xd60] ss:$16 sps:$4 sm:$0xff]   ;;  %v6841_v57 = vrot.slane %v6644_v39, %v6151_v49 }
  0xd7   : > { %3652 = vmatprep.subr.bf16.mxu1 %v5379_v58  ;;  %4955 = vmatprep.mubr.msk.bf16.mxu1 %vm3359_vm0, %v6697_v59  ;;  %v5443_v58 = vld [vmem:[%s7811_s1 + $0xf00] ss:$16 sps:$4 sm:$0xff]  }
  0xd8   : > { %3641 = vmatprep.mubr.bf16.mxu0 %v6677_v54  ;;  %v5446_v49 = vld [vmem:[%s7811_s1 + $0xd40] ss:$16 sps:$4 sm:$0xff]   ;;  %v6857_v39 = vcombine.high %v6841_v57, %v6841_v57 }
  0xd9   : > { %3612 = vmatpush1.bf16.msra.mxu0 %v5374_v61  ;;  %v5448_v61 = vld [vmem:[%s7811_s1 + $0xd44] ss:$16 sps:$4 sm:$0xff]  }
  0xda   : > { %3653 = vmatpush1.bf16.msra.mxu1 %v5377_v62  ;;  %3613 = vmatprep.subr.bf16.mxu0 %v5382_v63  ;;  %v5451_v62 = vld [vmem:[%s7811_s1 + $0xec] ss:$16 sps:$4 sm:$0xff]   ;;  %v5449_v63 = vld [vmem:[%s7811_s1 + $0xe8] ss:$16 sps:$4 sm:$0xff]  }
  0xdb   : > { %3654 = vmatprep.subr.bf16.mxu1 %v5385_v1  ;;  %v5454_v1 = vld [vmem:[%s7811_s1 + $0xd24] ss:$16 sps:$4 sm:$0xff]  }
  0xdd   : > { %3614 = vmatpush1.bf16.msra.mxu0 %v5380_v2  ;;  %v5457_v2 = vld [vmem:[%s7811_s1 + $0xcc] ss:$16 sps:$4 sm:$0xff]  }
  0xde   : > { %3655 = vmatpush1.bf16.msra.mxu1 %v5383_v3  ;;  %3615 = vmatprep.subr.bf16.mxu0 %v5388_v4  ;;  %v5452_v3 = vld [vmem:[%s7811_s1 + $0xd20] ss:$16 sps:$4 sm:$0xff]   ;;  %v5455_v4 = vld [vmem:[%s7811_s1 + $0xc8] ss:$16 sps:$4 sm:$0xff]  }
  0xdf   : > { %3656 = vmatprep.subr.bf16.mxu1 %v5391_v5  ;;  %v5460_v5 = vld [vmem:[%s7811_s1 + $0xd04] ss:$16 sps:$4 sm:$0xff]  }
  0xe1   : > { %3616 = vmatpush1.bf16.msra.mxu0 %v5386_v7  ;;  %v5463_v7 = vld [vmem:[%s7811_s1 + $0xac] ss:$16 sps:$4 sm:$0xff]  }
  0xe2   : > { %3657 = vmatpush1.bf16.msra.mxu1 %v5389_v8  ;;  %3617 = vmatprep.subr.bf16.mxu0 %v5394_v9  ;;  %v5458_v8 = vld [vmem:[%s7811_s1 + $0xd00] ss:$16 sps:$4 sm:$0xff]   ;;  %v5461_v9 = vld [vmem:[%s7811_s1 + $0xa8] ss:$16 sps:$4 sm:$0xff]  }
  0xe3   : > { %3658 = vmatprep.subr.bf16.mxu1 %v5397_v10  ;;  %v722_v10 = vld [vmem:[%s7812_s2] sm:$0xf] }
  0xe5   : > { %3618 = vmatpush1.bf16.msra.mxu0 %v5392_v11  ;;  %v3341_v11 = vsub.s32 0, %v6128_v43 }
  0xe6   : > { %3659 = vmatpush1.bf16.msra.mxu1 %v5395_v12  ;;  %3619 = vmatprep.subr.bf16.mxu0 %v5400_v14  ;;  %v5469_v12 = vld [vmem:[%s7811_s1 + $0x2ec] ss:$16 sps:$4 sm:$0xff]   ;;  %v3345_v14 = vsub.s32 1, %v6128_v43 }
  0xe7   : > { %3660 = vmatprep.subr.bf16.mxu1 %v5403_v15  ;;  %v5464_v15 = vld [vmem:[%s7811_s1 + $0x88] ss:$16 sps:$4 sm:$0xff]  }
  0xe9   : > { %3620 = vmatpush1.bf16.msra.mxu0 %v5398_v16  ;;  %v3342_v16 = vrot.slane %v722_v10, %v3341_v11  ;;  %v5517_v11 = vld [vmem:[%s7811_s1 + $0x3ec] ss:$16 sps:$4 sm:$0xff]  }
  0xea   : > { %3661 = vmatpush1.bf16.msra.mxu1 %v5401_v19  ;;  %3621 = vmatprep.subr.bf16.mxu0 %v5406_v20  ;;  %v5467_v19 = vld [vmem:[%s7811_s1 + $0x2e8] ss:$16 sps:$4 sm:$0xff]   ;;  %v5472_v20 = vld [vmem:[%s7811_s1 + $0x6c] ss:$16 sps:$4 sm:$0xff]  }
  0xeb   : > { %3662 = vmatprep.subr.bf16.mxu1 %v5409_v21  ;;  %v5475_v21 = vld [vmem:[%s7811_s1 + $0x2cc] ss:$16 sps:$4 sm:$0xff]  }
  0xed   : > { %3622 = vmatpush1.bf16.msra.mxu0 %v5404_v22  ;;  %v3346_v22 = vrot.slane %v722_v10, %v3345_v14  ;;  %v5514_v10 = vld [vmem:[%s7811_s1 + $0x18c] ss:$16 sps:$4 sm:$0xff]  }
  0xee   : > { %3663 = vmatpush1.bf16.msra.mxu1 %v5407_v24  ;;  %3623 = vmatprep.subr.bf16.mxu0 %v5412_v25  ;;  %v5520_v14 = vld [vmem:[%s7811_s1 + $0x16c] ss:$16 sps:$4 sm:$0xff]  }
  0xef   : > { %3664 = vmatprep.subr.bf16.mxu1 %v5415_v27  ;;  %v5470_v27 = vld [vmem:[%s7811_s1 + $0x68] ss:$16 sps:$4 sm:$0xff]  }
  0xf1   : > { %3624 = vmatpush1.bf16.msra.mxu0 %v5410_v28  ;;  %v5473_v28 = vld [vmem:[%s7811_s1 + $0x2c8] ss:$16 sps:$4 sm:$0xff]  }
  0xf2   : > { %3665 = vmatpush1.bf16.msra.mxu1 %v5413_v29  ;;  %3625 = vmatprep.subr.bf16.mxu0 %v5418_v30 }
  0xf3   : > { %3672 = vmatprep.subr.bf16.mxu1 %v5421_v31 }
  0xf5   : > { %3626 = vmatpush2.bf16.msra.mxu0 %v5416_v33  ;;  %v5478_v33 = vld [vmem:[%s7811_s1 + $0x4c] ss:$16 sps:$4 sm:$0xff]  }
  0xf6   : > { %3673 = vmatpush2.bf16.msra.mxu1 %v5419_v34  ;;  %3627 = vmatprep.subr.bf16.mxu0 %v5424_v36  ;;  %v5481_v34 = vld [vmem:[%s7811_s1 + $0x2ac] ss:$16 sps:$4 sm:$0xff]  }
  0xf7   : > { %3674 = vmatprep.subr.bf16.mxu1 %v5427_v37 }
  0xf9   : > { %3628 = vmatpush2.bf16.msra.mxu0 %v5422_v38  ;;  %v5476_v38 = vld [vmem:[%s7811_s1 + $0x48] ss:$16 sps:$4 sm:$0xff]  }
  0xfa   : > { %3675 = vmatpush2.bf16.msra.mxu1 %v5425_v32  ;;  %3629 = vmatprep.subr.bf16.mxu0 %v5430_v40  ;;  %v5479_v32 = vld [vmem:[%s7811_s1 + $0x2a8] ss:$16 sps:$4 sm:$0xff]  }
  0xfb   : > { %3676 = vmatprep.subr.bf16.mxu1 %v5433_v44 }
  0xfd   : > { %3630 = vmatpush2.bf16.msra.mxu0 %v5428_v45 }
  0xfe   : > { %3677 = vmatpush2.bf16.msra.mxu1 %v5431_v46  ;;  %3631 = vmatprep.subr.bf16.mxu0 %v5436_v47 }
  0xff   : > { %3678 = vmatprep.subr.bf16.mxu1 %v5439_v48  ;;  %v5484_v48 = vld [vmem:[%s7811_s1 + $0x2c] ss:$16 sps:$4 sm:$0xff]  }
 0x101   : > { %3632 = vmatpush2.bf16.msra.mxu0 %v5434_v51  ;;  %v5487_v51 = vld [vmem:[%s7811_s1 + $0x28c] ss:$16 sps:$4 sm:$0xff]  }
 0x102   : > { %3679 = vmatpush2.bf16.msra.mxu1 %v5437_v52  ;;  %3633 = vmatprep.subr.bf16.mxu0 %v5442_v53  ;;  %v5485_v52 = vld [vmem:[%s7811_s1 + $0x288] ss:$16 sps:$4 sm:$0xff]   ;;  %v5490_v53 = vld [vmem:[%s7811_s1 + $0xc] ss:$16 sps:$4 sm:$0xff]  }
 0x103   : > { %3680 = vmatprep.subr.bf16.mxu1 %v5445_v55  ;;  %v5493_v55 = vld [vmem:[%s7811_s1 + $0x26c] ss:$16 sps:$4 sm:$0xff]  }
 0x105   : > { %3634 = vmatpush2.bf16.msra.mxu0 %v5440_v56  ;;  %v5488_v56 = vld [vmem:[%s7811_s1 + $0x8] ss:$16 sps:$4 sm:$0xff]  }
 0x106   : > { %3681 = vmatpush2.bf16.msra.mxu1 %v5443_v58  ;;  %3635 = vmatprep.subr.bf16.mxu0 %v5448_v61  ;;  %v5491_v58 = vld [vmem:[%s7811_s1 + $0x268] ss:$16 sps:$4 sm:$0xff]   ;;  %v5496_v61 = vld [vmem:[%s7811_s1 + $0x1ec] ss:$16 sps:$4 sm:$0xff]  }
 0x107   : > { %3691 = vmatprep.subr.bf16.mxu1 %v5451_v62  ;;  %v5499_v62 = vld [vmem:[%s7811_s1 + $0x24c] ss:$16 sps:$4 sm:$0xff]  }
 0x109   : > { %3683 = vmatmul.mubr.bf16.vlgmr.msra.gmra.mxu1 %v6857_v39  ;;  %3636 = vmatpush2.bf16.msra.mxu0 %v5446_v49  ;;  %v5494_v49 = vld [vmem:[%s7811_s1 + $0x1e8] ss:$16 sps:$4 sm:$0xff]  }
 0x10a   : > { %3692 = vmatpush1.bf16.msra.mxu1 %v5449_v63  ;;  %3637 = vmatprep.subr.bf16.mxu0 %v5454_v1  ;;  %v5497_v63 = vld [vmem:[%s7811_s1 + $0x248] ss:$16 sps:$4 sm:$0xff]   ;;  %v5502_v1 = vld [vmem:[%s7811_s1 + $0x1cc] ss:$16 sps:$4 sm:$0xff]  }
 0x10b   : > { %3693 = vmatprep.subr.bf16.mxu1 %v5457_v2  ;;  %3723 = vmatprep.mubr.bf16.mxu1 %v6177_v60  ;;  %v5466_v60 = vld [vmem:[%s7811_s1 + $0x8c] ss:$16 sps:$4 sm:$0xff]  }
 0x10c   : > { %v5505_v2 = vld [vmem:[%s7811_s1 + $0x22c] ss:$16 sps:$4 sm:$0xff]  }
 0x10d   : > { %3638 = vmatpush2.bf16.msra.mxu0 %v5452_v3  ;;  %v5500_v3 = vld [vmem:[%s7811_s1 + $0x1c8] ss:$16 sps:$4 sm:$0xff]  }
 0x10e   : > { %3694 = vmatpush1.bf16.msra.mxu1 %v5455_v4  ;;  %3639 = vmatprep.subr.bf16.mxu0 %v5460_v5  ;;  %v5503_v4 = vld [vmem:[%s7811_s1 + $0x228] ss:$16 sps:$4 sm:$0xff]   ;;  %v5508_v5 = vld [vmem:[%s7811_s1 + $0x1ac] ss:$16 sps:$4 sm:$0xff]  }
 0x10f   : > { %3695 = vmatprep.subr.bf16.mxu1 %v5463_v7  ;;  %v5511_v7 = vld [vmem:[%s7811_s1 + $0x20c] ss:$16 sps:$4 sm:$0xff]  }
 0x111   : > { %3640 = vmatpush2.bf16.msra.mxu0 %v5458_v8  ;;  %v5506_v8 = vld [vmem:[%s7811_s1 + $0x1a8] ss:$16 sps:$4 sm:$0xff]  }
 0x112   : > { %3696 = vmatpush1.bf16.msra.mxu1 %v5461_v9  ;;  %3732 = vmatprep.subr.bf16.mxu0 %v5469_v12  ;;  %v5509_v9 = vld [vmem:[%s7811_s1 + $0x208] ss:$16 sps:$4 sm:$0xff]  }
 0x113   : > { %3697 = vmatprep.subr.bf16.mxu1 %v5466_v60  ;;  %v5512_v60 = vld [vmem:[%s7811_s1 + $0x188] ss:$16 sps:$4 sm:$0xff]  }
 0x114   : > { %v3397_v24 = vpop.f32.mrf.mxu0  ;;  %3642 = vmatmul.mubr.bf16.vlgmr.msra.gmra.mxu0 %v6841_v57  ;;  %v5515_v12 = vld [vmem:[%s7811_s1 + $0x3e8] ss:$16 sps:$4 sm:$0xff]  }
 0x115   : > { %v3438_v25 = vpop.f32.mrf.mxu1  ;;  %v3398_v29 = vadd.f32 %v3397_v24, %v3342_v16  ;;  %3733 = vmatpush1.bf16.msra.mxu0 %v5467_v19  ;;  %3764 = vmatprep.mubr.bf16.mxu0 %v6190_v0  ;;  %v5482_v0 = vld [vmem:[%s7811_s1 + $0x28] ss:$16 sps:$4 sm:$0xff]  }
 0x116   : > { %3698 = vmatpush1.bf16.msra.mxu1 %v5464_v15  ;;  %v3399_v30 = vpop.f32.mrf.mxu0  ;;  %3734 = vmatprep.subr.bf16.mxu0 %v5475_v21  ;;  %v5523_v15 = vld [vmem:[%s7811_s1 + $0x3cc] ss:$16 sps:$4 sm:$0xff]   ;;  %v5518_v16 = vld [vmem:[%s7811_s1 + $0x168] ss:$16 sps:$4 sm:$0xff]  }
 0x117   : > { %v3440_v31 = vpop.f32.mrf.mxu1  ;;  %3699 = vmatprep.subr.bf16.mxu1 %v5472_v20  ;;  %v6924_v36 = vadd.f32 %v3438_v25, %v3398_v29  ;;  %v3400_v37 = vadd.f32 %v3399_v30, %v3346_v22  ;;  %v5521_v19 = vld [vmem:[%s7811_s1 + $0x3c8] ss:$16 sps:$4 sm:$0xff]   ;;  %v5526_v20 = vld [vmem:[%s7811_s1 + $0x14c] ss:$16 sps:$4 sm:$0xff]  }
 0x118   : > { %v3401_v40 = vpop.f32.mrf.mxu0  ;;  %v5529_v21 = vld [vmem:[%s7811_s1 + $0x3ac] ss:$16 sps:$4 sm:$0xff]   ;;  %v5524_v22 = vld [vmem:[%s7811_s1 + $0x148] ss:$16 sps:$4 sm:$0xff]  }
 0x119   : > { %v3442_v44 = vpop.f32.mrf.mxu1  ;;  %v6933_v45 = vadd.f32 %v3440_v31, %v3400_v37  ;;  %3735 = vmatpush1.bf16.msra.mxu0 %v5473_v28  ;;  %v5527_v24 = vld [vmem:[%s7811_s1 + $0x3a8] ss:$16 sps:$4 sm:$0xff]   ;;  %v5532_v25 = vld [vmem:[%s7811_s1 + $0x12c] ss:$16 sps:$4 sm:$0xff]  }
 0x11a   : > { %3700 = vmatpush1.bf16.msra.mxu1 %v5470_v27  ;;  %v3402_v46 = vpop.f32.mrf.mxu0  ;;  %3736 = vmatprep.subr.bf16.mxu0 %v5481_v34  ;;  %v5535_v27 = vld [vmem:[%s7811_s1 + $0x38c] ss:$16 sps:$4 sm:$0xff]   ;;  %v5530_v28 = vld [vmem:[%s7811_s1 + $0x128] ss:$16 sps:$4 sm:$0xff]  }
 0x11b   : > { %v3443_v47 = vpop.f32.mrf.mxu1  ;;  %3701 = vmatprep.subr.bf16.mxu1 %v5478_v33  ;;  %v5533_v29 = vld [vmem:[%s7811_s1 + $0x388] ss:$16 sps:$4 sm:$0xff]   ;;  %v5538_v30 = vld [vmem:[%s7811_s1 + $0x10c] ss:$16 sps:$4 sm:$0xff]  }
 0x11c   : > { %v5541_v31 = vld [vmem:[%s7811_s1 + $0x36c] ss:$16 sps:$4 sm:$0xff]   ;;  %v5536_v33 = vld [vmem:[%s7811_s1 + $0x108] ss:$16 sps:$4 sm:$0xff]  }
 0x11d   : > { %3737 = vmatpush1.bf16.msra.mxu0 %v5479_v32  ;;  %v5539_v34 = vld [vmem:[%s7811_s1 + $0x368] ss:$16 sps:$4 sm:$0xff]   ;;  %v5544_v37 = vld [vmem:[%s7811_s1 + $0x34c] ss:$16 sps:$4 sm:$0xff]  }
 0x11e   : > { %3702 = vmatpush1.bf16.msra.mxu1 %v5476_v38  ;;  %3738 = vmatprep.subr.bf16.mxu0 %v5487_v51  ;;  %v5547_v38 = vld [vmem:[%s7811_s1 + $0x4ec] ss:$16 sps:$4 sm:$0xff]   ;;  %v5542_v32 = vld [vmem:[%s7811_s1 + $0x348] ss:$16 sps:$4 sm:$0xff]  }
 0x11f   : > { %3703 = vmatprep.subr.bf16.mxu1 %v5484_v48  ;;  %v5545_v40 = vld [vmem:[%s7811_s1 + $0x4e8] ss:$16 sps:$4 sm:$0xff]   ;;  %v5550_v44 = vld [vmem:[%s7811_s1 + $0x32c] ss:$16 sps:$4 sm:$0xff]  }
 0x120   : > { %v5553_v46 = vld [vmem:[%s7811_s1 + $0x4cc] ss:$16 sps:$4 sm:$0xff]   ;;  %v5548_v47 = vld [vmem:[%s7811_s1 + $0x328] ss:$16 sps:$4 sm:$0xff]  }
 0x121   : > { %3739 = vmatpush1.bf16.msra.mxu0 %v5485_v52  ;;  %v5551_v48 = vld [vmem:[%s7811_s1 + $0x4c8] ss:$16 sps:$4 sm:$0xff]   ;;  %v5556_v51 = vld [vmem:[%s7811_s1 + $0x30c] ss:$16 sps:$4 sm:$0xff]  }
 0x122   : > { %3704 = vmatpush1.bf16.msra.mxu1 %v5482_v0  ;;  %3740 = vmatprep.subr.bf16.mxu0 %v5493_v55  ;;  %v5559_v0 = vld [vmem:[%s7811_s1 + $0x4ac] ss:$16 sps:$4 sm:$0xff]   ;;  %v5554_v52 = vld [vmem:[%s7811_s1 + $0x308] ss:$16 sps:$4 sm:$0xff]  }
 0x123   : > { %3705 = vmatprep.subr.bf16.mxu1 %v5490_v53  ;;  %v5562_v53 = vld [vmem:[%s7811_s1 + $0x48c] ss:$16 sps:$4 sm:$0xff]  }
 0x124   : > { %v5565_v55 = vld [vmem:[%s7811_s1 + $0x6ec] ss:$16 sps:$4 sm:$0xff]  }
 0x125   : > { %3741 = vmatpush1.bf16.msra.mxu0 %v5491_v58  ;;  %v5568_v58 = vld [vmem:[%s7811_s1 + $0x46c] ss:$16 sps:$4 sm:$0xff]  }
 0x126   : > { %3706 = vmatpush1.bf16.msra.mxu1 %v5488_v56  ;;  %3742 = vmatprep.subr.bf16.mxu0 %v5499_v62  ;;  %v5560_v56 = vld [vmem:[%s7811_s1 + $0x488] ss:$16 sps:$4 sm:$0xff]  }
 0x127   : > { %3707 = vmatprep.subr.bf16.mxu1 %v5496_v61  ;;  %v5571_v61 = vld [vmem:[%s7811_s1 + $0x6cc] ss:$16 sps:$4 sm:$0xff]   ;;  %v5566_v62 = vld [vmem:[%s7811_s1 + $0x468] ss:$16 sps:$4 sm:$0xff]  }
 0x129   : > { %3743 = vmatpush1.bf16.msra.mxu0 %v5497_v63 }
 0x12a   : > { %3708 = vmatpush2.bf16.msra.mxu1 %v5494_v49  ;;  %3744 = vmatprep.subr.bf16.mxu0 %v5505_v2  ;;  %v5569_v49 = vld [vmem:[%s7811_s1 + $0x6c8] ss:$16 sps:$4 sm:$0xff]  }
 0x12b   : > { %3709 = vmatprep.subr.bf16.mxu1 %v5502_v1 }
 0x12d   : > { %3745 = vmatpush1.bf16.msra.mxu0 %v5503_v4 }
 0x12e   : > { %3710 = vmatpush2.bf16.msra.mxu1 %v5500_v3  ;;  %3746 = vmatprep.subr.bf16.mxu0 %v5511_v7  ;;  %v5577_v7 = vld [vmem:[%s7811_s1 + $0x6ac] ss:$16 sps:$4 sm:$0xff]  }
 0x12f   : > { %3711 = vmatprep.subr.bf16.mxu1 %v5508_v5  ;;  %v5574_v5 = vld [vmem:[%s7811_s1 + $0x44c] ss:$16 sps:$4 sm:$0xff]  }
 0x131   : > { %3747 = vmatpush1.bf16.msra.mxu0 %v5509_v9  ;;  %v5575_v9 = vld [vmem:[%s7811_s1 + $0x6a8] ss:$16 sps:$4 sm:$0xff]  }
 0x132   : > { %3712 = vmatpush2.bf16.msra.mxu1 %v5506_v8  ;;  %3748 = vmatprep.subr.bf16.mxu0 %v5517_v11 }
 0x133   : > { %3713 = vmatprep.subr.bf16.mxu1 %v5514_v10 }
 0x135   : > { %3749 = vmatpush2.bf16.msra.mxu0 %v5515_v12 }
 0x136   : > { %3714 = vmatpush2.bf16.msra.mxu1 %v5512_v60  ;;  %3750 = vmatprep.subr.bf16.mxu0 %v5523_v15  ;;  %v5583_v15 = vld [vmem:[%s7811_s1 + $0x68c] ss:$16 sps:$4 sm:$0xff]  }
 0x137   : > { %3715 = vmatprep.subr.bf16.mxu1 %v5520_v14 }
 0x139   : > { %3751 = vmatpush2.bf16.msra.mxu0 %v5521_v19  ;;  %v5586_v19 = vld [vmem:[%s7811_s1 + $0x40c] ss:$16 sps:$4 sm:$0xff]  }
 0x13a   : > { %3716 = vmatpush2.bf16.msra.mxu1 %v5518_v16  ;;  %3752 = vmatprep.subr.bf16.mxu0 %v5529_v21  ;;  %v5581_v16 = vld [vmem:[%s7811_s1 + $0x688] ss:$16 sps:$4 sm:$0xff]  }
 0x13b   : > { %3717 = vmatprep.subr.bf16.mxu1 %v5526_v20  ;;  %v5589_v20 = vld [vmem:[%s7811_s1 + $0x66c] ss:$16 sps:$4 sm:$0xff]   ;;  %v5584_v21 = vld [vmem:[%s7811_s1 + $0x408] ss:$16 sps:$4 sm:$0xff]  }
 0x13d   : > { %3753 = vmatpush2.bf16.msra.mxu0 %v5527_v24  ;;  %v5592_v24 = vld [vmem:[%s7811_s1 + $0x5ec] ss:$16 sps:$4 sm:$0xff]  }
 0x13e   : > { %3718 = vmatpush2.bf16.msra.mxu1 %v5524_v22  ;;  %3754 = vmatprep.subr.bf16.mxu0 %v5535_v27  ;;  %v5587_v22 = vld [vmem:[%s7811_s1 + $0x668] ss:$16 sps:$4 sm:$0xff]  }
 0x13f   : > { %3719 = vmatprep.subr.bf16.mxu1 %v5532_v25  ;;  %v5595_v25 = vld [vmem:[%s7811_s1 + $0x64c] ss:$16 sps:$4 sm:$0xff]   ;;  %v5590_v27 = vld [vmem:[%s7811_s1 + $0x5e8] ss:$16 sps:$4 sm:$0xff]  }
 0x141   : > { %3755 = vmatpush2.bf16.msra.mxu0 %v5533_v29  ;;  %v5598_v29 = vld [vmem:[%s7811_s1 + $0x5cc] ss:$16 sps:$4 sm:$0xff]  }
 0x142   : > { %3720 = vmatpush2.bf16.msra.mxu1 %v5530_v28  ;;  %3756 = vmatprep.subr.bf16.mxu0 %v5541_v31  ;;  %v5593_v28 = vld [vmem:[%s7811_s1 + $0x648] ss:$16 sps:$4 sm:$0xff]  }
 0x143   : > { %3721 = vmatprep.subr.bf16.mxu1 %v5538_v30  ;;  %v5601_v30 = vld [vmem:[%s7811_s1 + $0x62c] ss:$16 sps:$4 sm:$0xff]   ;;  %v5596_v31 = vld [vmem:[%s7811_s1 + $0x5c8] ss:$16 sps:$4 sm:$0xff]  }
 0x145   : > { %3757 = vmatpush2.bf16.msra.mxu0 %v5539_v34  ;;  %v5604_v34 = vld [vmem:[%s7811_s1 + $0x5ac] ss:$16 sps:$4 sm:$0xff]  }
 0x146   : > { %3722 = vmatpush2.bf16.msra.mxu1 %v5536_v33  ;;  %3758 = vmatprep.subr.bf16.mxu0 %v5544_v37  ;;  %v5599_v33 = vld [vmem:[%s7811_s1 + $0x628] ss:$16 sps:$4 sm:$0xff]   ;;  %v5607_v37 = vld [vmem:[%s7811_s1 + $0x60c] ss:$16 sps:$4 sm:$0xff]  }
 0x147   : > { %3773 = vmatprep.subr.bf16.mxu1 %v5547_v38  ;;  %v5602_v38 = vld [vmem:[%s7811_s1 + $0x5a8] ss:$16 sps:$4 sm:$0xff]  }
 0x149   : > { %3724 = vmatmul.mubr.bf16.vlgmr.msra.gmra.mxu1 %v6227_v13  ;;  %3759 = vmatpush2.bf16.msra.mxu0 %v5542_v32  ;;  %v5557_v13 = vld [vmem:[%s7811_s1 + $0x4a8] ss:$16 sps:$4 sm:$0xff]  }
 0x14a   : > { %3774 = vmatpush1.bf16.msra.mxu1 %v5545_v40  ;;  %3760 = vmatprep.subr.bf16.mxu0 %v5550_v44  ;;  %v5605_v32 = vld [vmem:[%s7811_s1 + $0x608] ss:$16 sps:$4 sm:$0xff]   ;;  %v5610_v40 = vld [vmem:[%s7811_s1 + $0x58c] ss:$16 sps:$4 sm:$0xff]  }
 0x14b   : > { %3775 = vmatprep.subr.bf16.mxu1 %v5553_v46  ;;  %3805 = vmatprep.mubr.bf16.mxu1 %v6239_v17  ;;  %v5563_v17 = vld [vmem:[%s7811_s1 + $0x6e8] ss:$16 sps:$4 sm:$0xff]   ;;  %v5613_v44 = vld [vmem:[%s7811_s1 + $0x7ec] ss:$16 sps:$4 sm:$0xff]  }
 0x14c   : > { %v5608_v46 = vld [vmem:[%s7811_s1 + $0x588] ss:$16 sps:$4 sm:$0xff]  }
 0x14d   : > { %3761 = vmatpush2.bf16.msra.mxu0 %v5548_v47  ;;  %v5611_v47 = vld [vmem:[%s7811_s1 + $0x7e8] ss:$16 sps:$4 sm:$0xff]  }
 0x14e   : > { %3776 = vmatpush1.bf16.msra.mxu1 %v5551_v48  ;;  %3762 = vmatprep.subr.bf16.mxu0 %v5556_v51  ;;  %v5616_v48 = vld [vmem:[%s7811_s1 + $0x56c] ss:$16 sps:$4 sm:$0xff]  }
 0x14f   : > { %3777 = vmatprep.subr.bf16.mxu1 %v5559_v0  ;;  %v5619_v51 = vld [vmem:[%s7811_s1 + $0x7cc] ss:$16 sps:$4 sm:$0xff]   ;;  %v5614_v0 = vld [vmem:[%s7811_s1 + $0x568] ss:$16 sps:$4 sm:$0xff]  }
 0x151   : > { %3763 = vmatpush2.bf16.msra.mxu0 %v5554_v52  ;;  %v5617_v52 = vld [vmem:[%s7811_s1 + $0x7c8] ss:$16 sps:$4 sm:$0xff]  }
 0x152   : > { %3778 = vmatpush1.bf16.msra.mxu1 %v5557_v13  ;;  %3814 = vmatprep.subr.bf16.mxu0 %v5565_v55  ;;  %v5622_v13 = vld [vmem:[%s7811_s1 + $0x54c] ss:$16 sps:$4 sm:$0xff]   ;;  %v5620_v55 = vld [vmem:[%s7811_s1 + $0x548] ss:$16 sps:$4 sm:$0xff]  }
 0x153   : > { %3779 = vmatprep.subr.bf16.mxu1 %v5562_v53  ;;  %v5625_v53 = vld [vmem:[%s7811_s1 + $0x7ac] ss:$16 sps:$4 sm:$0xff]  }
 0x154   : > { %v3479_v63 = vpop.f32.mrf.mxu0  ;;  %3765 = vmatmul.mubr.bf16.vlgmr.msra.gmra.mxu0 %v6243_v18 }
 0x155   : > { %v3520_v1 = vpop.f32.mrf.mxu1  ;;  %v3480_v2 = vadd.f32 %v3479_v63, %v6924_v36  ;;  %3815 = vmatpush1.bf16.msra.mxu0 %v5563_v17  ;;  %v5572_v36 = vld [vmem:[%s7811_s1 + $0x448] ss:$16 sps:$4 sm:$0xff]   ;;  %3846 = vmatprep.mubr.bf16.mxu0 %v6259_v23  ;;  %v5628_v17 = vld [vmem:[%s7811_s1 + $0x52c] ss:$16 sps:$4 sm:$0xff]  }
 0x156   : > { %3780 = vmatpush1.bf16.msra.mxu1 %v5560_v56  ;;  %v3481_v3 = vpop.f32.mrf.mxu0  ;;  %3816 = vmatprep.subr.bf16.mxu0 %v5571_v61  ;;  %v5578_v23 = vld [vmem:[%s7811_s1 + $0x428] ss:$16 sps:$4 sm:$0xff]   ;;  %v5637_v63 = vld [vmem:[%s7811_s1 + $0x76c] ss:$16 sps:$4 sm:$0xff]  }
 0x157   : > { %v3522_v4 = vpop.f32.mrf.mxu1  ;;  %3781 = vmatprep.subr.bf16.mxu1 %v5568_v58  ;;  %v7125_v8 = vadd.f32 %v3520_v1, %v3480_v2  ;;  %v3482_v18 = vadd.f32 %v3481_v3, %v6933_v45  ;;  %v5580_v45 = vld [vmem:[%s7811_s1 + $0x42c] ss:$16 sps:$4 sm:$0xff]   ;;  %v5623_v56 = vld [vmem:[%s7811_s1 + $0x7a8] ss:$16 sps:$4 sm:$0xff]  }
 0x158   : > { %v3483_v10 = vpop.f32.mrf.mxu0  ;;  %v5631_v58 = vld [vmem:[%s7811_s1 + $0x78c] ss:$16 sps:$4 sm:$0xff]   ;;  %v5626_v61 = vld [vmem:[%s7811_s1 + $0x528] ss:$16 sps:$4 sm:$0xff]  }
 0x159   : > { %v3524_v11 = vpop.f32.mrf.mxu1  ;;  %v7135_v60 = vadd.f32 %v3522_v4, %v3482_v18  ;;  %3817 = vmatpush1.bf16.msra.mxu0 %v5569_v49  ;;  %v5634_v49 = vld [vmem:[%s7811_s1 + $0x50c] ss:$16 sps:$4 sm:$0xff]   ;;  %v5632_v1 = vld [vmem:[%s7811_s1 + $0x508] ss:$16 sps:$4 sm:$0xff]  }
 0x15a   : > { %3782 = vmatpush1.bf16.msra.mxu1 %v5566_v62  ;;  %v3484_v12 = vpop.f32.mrf.mxu0  ;;  %3818 = vmatprep.subr.bf16.mxu0 %v5577_v7  ;;  %v5629_v62 = vld [vmem:[%s7811_s1 + $0x788] ss:$16 sps:$4 sm:$0xff]   ;;  %v5640_v3 = vld [vmem:[%s7811_s1 + $0x74c] ss:$16 sps:$4 sm:$0xff]  }
 0x15b   : > { %v3525_v14 = vpop.f32.mrf.mxu1  ;;  %3783 = vmatprep.subr.bf16.mxu1 %v5574_v5  ;;  %v5635_v2 = vld [vmem:[%s7811_s1 + $0x768] ss:$16 sps:$4 sm:$0xff]   ;;  %v5643_v4 = vld [vmem:[%s7811_s1 + $0x8ec] ss:$16 sps:$4 sm:$0xff]  }
 0x15c   : > { %v5638_v5 = vld [vmem:[%s7811_s1 + $0x748] ss:$16 sps:$4 sm:$0xff]   ;;  %v5646_v18 = vld [vmem:[%s7811_s1 + $0x72c] ss:$16 sps:$4 sm:$0xff]  }
 0x15d   : > { %3819 = vmatpush1.bf16.msra.mxu0 %v5575_v9  ;;  %v5641_v7 = vld [vmem:[%s7811_s1 + $0x8e8] ss:$16 sps:$4 sm:$0xff]   ;;  %v5652_v11 = vld [vmem:[%s7811_s1 + $0x70c] ss:$16 sps:$4 sm:$0xff]  }
 0x15e   : > { %3784 = vmatpush1.bf16.msra.mxu1 %v5572_v36  ;;  %3820 = vmatprep.subr.bf16.mxu0 %v5583_v15  ;;  %v5649_v36 = vld [vmem:[%s7811_s1 + $0x8cc] ss:$16 sps:$4 sm:$0xff]   ;;  %v5644_v9 = vld [vmem:[%s7811_s1 + $0x728] ss:$16 sps:$4 sm:$0xff]  }
 0x15f   : > { %3785 = vmatprep.subr.bf16.mxu1 %v5580_v45  ;;  %v5647_v10 = vld [vmem:[%s7811_s1 + $0x8c8] ss:$16 sps:$4 sm:$0xff]   ;;  %v5658_v45 = vld [vmem:[%s7811_s1 + $0x88c] ss:$16 sps:$4 sm:$0xff]  }
 0x160   : > { %v5650_v12 = vld [vmem:[%s7811_s1 + $0x708] ss:$16 sps:$4 sm:$0xff]  }
 0x161   : > { %3821 = vmatpush1.bf16.msra.mxu0 %v5581_v16  ;;  %v5653_v14 = vld [vmem:[%s7811_s1 + $0x8a8] ss:$16 sps:$4 sm:$0xff]   ;;  %v5664_v16 = vld [vmem:[%s7811_s1 + $0x86c] ss:$16 sps:$4 sm:$0xff]  }
 0x162   : > { %3786 = vmatpush1.bf16.msra.mxu1 %v5578_v23  ;;  %3822 = vmatprep.subr.bf16.mxu0 %v5589_v20  ;;  %v5656_v15 = vld [vmem:[%s7811_s1 + $0x888] ss:$16 sps:$4 sm:$0xff]  }
 0x163   : > { %3787 = vmatprep.subr.bf16.mxu1 %v5586_v19  ;;  %v5659_v23 = vld [vmem:[%s7811_s1 + $0xae8] ss:$16 sps:$4 sm:$0xff]   ;;  %v5667_v19 = vld [vmem:[%s7811_s1 + $0xacc] ss:$16 sps:$4 sm:$0xff]  }
 0x165   : > { %3823 = vmatpush1.bf16.msra.mxu0 %v5587_v22 }
 0x166   : > { %3788 = vmatpush1.bf16.msra.mxu1 %v5584_v21  ;;  %3824 = vmatprep.subr.bf16.mxu0 %v5595_v25  ;;  %v5665_v25 = vld [vmem:[%s7811_s1 + $0xac8] ss:$16 sps:$4 sm:$0xff]  }
 0x167   : > { %3789 = vmatprep.subr.bf16.mxu1 %v5592_v24  ;;  %v5662_v24 = vld [vmem:[%s7811_s1 + $0x868] ss:$16 sps:$4 sm:$0xff]  }
 0x169   : > { %3825 = vmatpush1.bf16.msra.mxu0 %v5593_v28 }
 0x16a   : > { %3790 = vmatpush2.bf16.msra.mxu1 %v5590_v27  ;;  %3826 = vmatprep.subr.bf16.mxu0 %v5601_v30 }
 0x16b   : > { %3791 = vmatprep.subr.bf16.mxu1 %v5598_v29 }
 0x16d   : > { %3827 = vmatpush1.bf16.msra.mxu0 %v5599_v33 }
 0x16e   : > { %3792 = vmatpush2.bf16.msra.mxu1 %v5596_v31  ;;  %3828 = vmatprep.subr.bf16.mxu0 %v5607_v37  ;;  %v5668_v37 = vld [vmem:[%s7811_s1 + $0x848] ss:$16 sps:$4 sm:$0xff]  }
 0x16f   : > { %3793 = vmatprep.subr.bf16.mxu1 %v5604_v34 }
 0x171   : > { %3829 = vmatpush1.bf16.msra.mxu0 %v5605_v32 }
 0x172   : > { %3794 = vmatpush2.bf16.msra.mxu1 %v5602_v38  ;;  %3830 = vmatprep.subr.bf16.mxu0 %v5613_v44  ;;  %v5671_v38 = vld [vmem:[%s7811_s1 + $0xaa8] ss:$16 sps:$4 sm:$0xff]  }
 0x173   : > { %3795 = vmatprep.subr.bf16.mxu1 %v5610_v40  ;;  %v5674_v44 = vld [vmem:[%s7811_s1 + $0x828] ss:$16 sps:$4 sm:$0xff]  }
 0x175   : > { %3831 = vmatpush2.bf16.msra.mxu0 %v5611_v47  ;;  %v5682_v47 = vld [vmem:[%s7811_s1 + $0x80c] ss:$16 sps:$4 sm:$0xff]  }
 0x176   : > { %3796 = vmatpush2.bf16.msra.mxu1 %v5608_v46  ;;  %3832 = vmatprep.subr.bf16.mxu0 %v5619_v51  ;;  %v5677_v46 = vld [vmem:[%s7811_s1 + $0xa88] ss:$16 sps:$4 sm:$0xff]  }
 0x177   : > { %3797 = vmatprep.subr.bf16.mxu1 %v5616_v48  ;;  %v5685_v48 = vld [vmem:[%s7811_s1 + $0xa6c] ss:$16 sps:$4 sm:$0xff]   ;;  %v5680_v51 = vld [vmem:[%s7811_s1 + $0x808] ss:$16 sps:$4 sm:$0xff]  }
 0x179   : > { %3833 = vmatpush2.bf16.msra.mxu0 %v5617_v52  ;;  %v5688_v52 = vld [vmem:[%s7811_s1 + $0x9ec] ss:$16 sps:$4 sm:$0xff]  }
 0x17a   : > { %3798 = vmatpush2.bf16.msra.mxu1 %v5614_v0  ;;  %3834 = vmatprep.subr.bf16.mxu0 %v5625_v53  ;;  %v5683_v0 = vld [vmem:[%s7811_s1 + $0xa68] ss:$16 sps:$4 sm:$0xff]  }
 0x17b   : > { %3799 = vmatprep.subr.bf16.mxu1 %v5622_v13  ;;  %v5691_v13 = vld [vmem:[%s7811_s1 + $0xa4c] ss:$16 sps:$4 sm:$0xff]   ;;  %v5686_v53 = vld [vmem:[%s7811_s1 + $0x9e8] ss:$16 sps:$4 sm:$0xff]  }
 0x17d   : > { %3835 = vmatpush2.bf16.msra.mxu0 %v5623_v56  ;;  %v5694_v56 = vld [vmem:[%s7811_s1 + $0x9cc] ss:$16 sps:$4 sm:$0xff]  }
 0x17e   : > { %3800 = vmatpush2.bf16.msra.mxu1 %v5620_v55  ;;  %3836 = vmatprep.subr.bf16.mxu0 %v5631_v58  ;;  %v5689_v55 = vld [vmem:[%s7811_s1 + $0xa48] ss:$16 sps:$4 sm:$0xff]  }
 0x17f   : > { %3801 = vmatprep.subr.bf16.mxu1 %v5628_v17  ;;  %v5697_v17 = vld [vmem:[%s7811_s1 + $0xa2c] ss:$16 sps:$4 sm:$0xff]   ;;  %v5692_v58 = vld [vmem:[%s7811_s1 + $0x9c8] ss:$16 sps:$4 sm:$0xff]  }
 0x181   : > { %3837 = vmatpush2.bf16.msra.mxu0 %v5629_v62  ;;  %v5700_v62 = vld [vmem:[%s7811_s1 + $0x9ac] ss:$16 sps:$4 sm:$0xff]  }
 0x182   : > { %3802 = vmatpush2.bf16.msra.mxu1 %v5626_v61  ;;  %3838 = vmatprep.subr.bf16.mxu0 %v5637_v63  ;;  %v5695_v61 = vld [vmem:[%s7811_s1 + $0xa28] ss:$16 sps:$4 sm:$0xff]  }
 0x183   : > { %3803 = vmatprep.subr.bf16.mxu1 %v5634_v49  ;;  %v5703_v49 = vld [vmem:[%s7811_s1 + $0xa0c] ss:$16 sps:$4 sm:$0xff]   ;;  %v5698_v63 = vld [vmem:[%s7811_s1 + $0x9a8] ss:$16 sps:$4 sm:$0xff]  }
 0x185   : > { %3839 = vmatpush2.bf16.msra.mxu0 %v5635_v2  ;;  %v5706_v2 = vld [vmem:[%s7811_s1 + $0x98c] ss:$16 sps:$4 sm:$0xff]  }
 0x186   : > { %3804 = vmatpush2.bf16.msra.mxu1 %v5632_v1  ;;  %3840 = vmatprep.subr.bf16.mxu0 %v5640_v3  ;;  %v5701_v1 = vld [vmem:[%s7811_s1 + $0xa08] ss:$16 sps:$4 sm:$0xff]   ;;  %v5709_v3 = vld [vmem:[%s7811_s1 + $0xbec] ss:$16 sps:$4 sm:$0xff]  }
 0x187   : > { %3855 = vmatprep.subr.bf16.mxu1 %v5643_v4  ;;  %v5704_v4 = vld [vmem:[%s7811_s1 + $0x988] ss:$16 sps:$4 sm:$0xff]  }
 0x189   : > { %3806 = vmatmul.mubr.bf16.vlgmr.msra.gmra.mxu1 %v6438_v26  ;;  %3841 = vmatpush2.bf16.msra.mxu0 %v5638_v5  ;;  %v5655_v26 = vld [vmem:[%s7811_s1 + $0x8ac] ss:$16 sps:$4 sm:$0xff]   ;;  %v5707_v5 = vld [vmem:[%s7811_s1 + $0xbe8] ss:$16 sps:$4 sm:$0xff]  }
 0x18a   : > { %3856 = vmatpush1.bf16.msra.mxu1 %v5641_v7  ;;  %3842 = vmatprep.subr.bf16.mxu0 %v5646_v18  ;;  %v5712_v7 = vld [vmem:[%s7811_s1 + $0x96c] ss:$16 sps:$4 sm:$0xff]  }
 0x18b   : > { %3857 = vmatprep.subr.bf16.mxu1 %v5649_v36  ;;  %3887 = vmatprep.mubr.bf16.mxu1 %v6489_v41  ;;  %v5661_v41 = vld [vmem:[%s7811_s1 + $0xaec] ss:$16 sps:$4 sm:$0xff]   ;;  %v5710_v36 = vld [vmem:[%s7811_s1 + $0x968] ss:$16 sps:$4 sm:$0xff]  }
 0x18c   : > { %v5715_v18 = vld [vmem:[%s7811_s1 + $0xbcc] ss:$16 sps:$4 sm:$0xff]  }
 0x18d   : > { %3843 = vmatpush2.bf16.msra.mxu0 %v5644_v9  ;;  %v5713_v9 = vld [vmem:[%s7811_s1 + $0xbc8] ss:$16 sps:$4 sm:$0xff]  }
 0x18e   : > { %3858 = vmatpush1.bf16.msra.mxu1 %v5647_v10  ;;  %3844 = vmatprep.subr.bf16.mxu0 %v5652_v11  ;;  %v5718_v10 = vld [vmem:[%s7811_s1 + $0x94c] ss:$16 sps:$4 sm:$0xff]  }
 0x18f   : > { %3859 = vmatprep.subr.bf16.mxu1 %v5655_v26  ;;  %v5721_v11 = vld [vmem:[%s7811_s1 + $0xbac] ss:$16 sps:$4 sm:$0xff]   ;;  %v5716_v26 = vld [vmem:[%s7811_s1 + $0x948] ss:$16 sps:$4 sm:$0xff]  }
 0x191   : > { %3845 = vmatpush2.bf16.msra.mxu0 %v5650_v12  ;;  %v5719_v12 = vld [vmem:[%s7811_s1 + $0xba8] ss:$16 sps:$4 sm:$0xff]  }
 0x192   : > { %3860 = vmatpush1.bf16.msra.mxu1 %v5653_v14  ;;  %3896 = vmatprep.subr.bf16.mxu0 %v5661_v41  ;;  %v5724_v14 = vld [vmem:[%s7811_s1 + $0x92c] ss:$16 sps:$4 sm:$0xff]   ;;  %v5722_v41 = vld [vmem:[%s7811_s1 + $0x928] ss:$16 sps:$4 sm:$0xff]  }
 0x193   : > { %3861 = vmatprep.subr.bf16.mxu1 %v5658_v45  ;;  %v5727_v45 = vld [vmem:[%s7811_s1 + $0xb8c] ss:$16 sps:$4 sm:$0xff]  }
 0x194   : > { %v3561_v20 = vpop.f32.mrf.mxu0  ;;  %3847 = vmatmul.mubr.bf16.vlgmr.msra.gmra.mxu0 %v6451_v6  ;;  %v5670_v6 = vld [vmem:[%s7811_s1 + $0x84c] ss:$16 sps:$4 sm:$0xff]  }
 0x195   : > { %v3602_v21 = vpop.f32.mrf.mxu1  ;;  %v3562_v22 = vadd.f32 %v3561_v20, %v7125_v8  ;;  %3897 = vmatpush1.bf16.msra.mxu0 %v5659_v23  ;;  %v5673_v8 = vld [vmem:[%s7811_s1 + $0xaac] ss:$16 sps:$4 sm:$0xff]   ;;  %3928 = vmatprep.mubr.bf16.mxu0 %v6494_v42  ;;  %v5731_v20 = vld [vmem:[%s7811_s1 + $0xb68] ss:$16 sps:$4 sm:$0xff]  }
 0x196   : > { %3862 = vmatpush1.bf16.msra.mxu1 %v5656_v15  ;;  %v3563_v27 = vpop.f32.mrf.mxu0  ;;  %3898 = vmatprep.subr.bf16.mxu0 %v5667_v19  ;;  %v5676_v42 = vld [vmem:[%s7811_s1 + $0x82c] ss:$16 sps:$4 sm:$0xff]   ;;  %v5725_v15 = vld [vmem:[%s7811_s1 + $0xb88] ss:$16 sps:$4 sm:$0xff]  }
 0x197   : > { %v3604_v28 = vpop.f32.mrf.mxu1  ;;  %3863 = vmatprep.subr.bf16.mxu1 %v5664_v16  ;;  %v7327_v29 = vadd.f32 %v3602_v21, %v3562_v22  ;;  %v3564_v30 = vadd.f32 %v3563_v27, %v7135_v60  ;;  %v5679_v60 = vld [vmem:[%s7811_s1 + $0xa8c] ss:$16 sps:$4 sm:$0xff]   ;;  %v5728_v19 = vld [vmem:[%s7811_s1 + $0x908] ss:$16 sps:$4 sm:$0xff]  }
 0x198   : > { %v3565_v31 = vpop.f32.mrf.mxu0  ;;  %v5730_v23 = vld [vmem:[%s7811_s1 + $0x90c] ss:$16 sps:$4 sm:$0xff]  }
 0x199   : > { %v3606_v33 = vpop.f32.mrf.mxu1  ;;  %v7331_v34 = vadd.f32 %v3604_v28, %v3564_v30  ;;  %3899 = vmatpush1.bf16.msra.mxu0 %v5665_v25  ;;  %v5733_v16 = vld [vmem:[%s7811_s1 + $0xb6c] ss:$16 sps:$4 sm:$0xff]   ;;  %v5737_v25 = vld [vmem:[%s7811_s1 + $0xce8] ss:$16 sps:$4 sm:$0xff]  }
 0x19a   : > { %3864 = vmatpush1.bf16.msra.mxu1 %v5662_v24  ;;  %v3566_v32 = vpop.f32.mrf.mxu0  ;;  %3900 = vmatprep.subr.bf16.mxu0 %v5673_v8  ;;  %v5736_v21 = vld [vmem:[%s7811_s1 + $0xb4c] ss:$16 sps:$4 sm:$0xff]   ;;  %v5734_v24 = vld [vmem:[%s7811_s1 + $0xb48] ss:$16 sps:$4 sm:$0xff]  }
 0x19b   : > { %v3607_v40 = vpop.f32.mrf.mxu1  ;;  %3865 = vmatprep.subr.bf16.mxu1 %v5670_v6  ;;  %v5739_v22 = vld [vmem:[%s7811_s1 + $0xcec] ss:$16 sps:$4 sm:$0xff]   ;;  %v5740_v8 = vld [vmem:[%s7811_s1 + $0xb28] ss:$16 sps:$4 sm:$0xff]  }
 0x19c   : > { %v5742_v27 = vld [vmem:[%s7811_s1 + $0xb2c] ss:$16 sps:$4 sm:$0xff]   ;;  %v5743_v30 = vld [vmem:[%s7811_s1 + $0xcc8] ss:$16 sps:$4 sm:$0xff]  }
 0x19d   : > { %3901 = vmatpush1.bf16.msra.mxu0 %v5671_v38  ;;  %v5745_v28 = vld [vmem:[%s7811_s1 + $0xccc] ss:$16 sps:$4 sm:$0xff]   ;;  %v5746_v38 = vld [vmem:[%s7811_s1 + $0xb08] ss:$16 sps:$4 sm:$0xff]  }
 0x19e   : > { %3866 = vmatpush1.bf16.msra.mxu1 %v5668_v37  ;;  %3902 = vmatprep.subr.bf16.mxu0 %v5679_v60  ;;  %v5748_v33 = vld [vmem:[%s7811_s1 + $0xb0c] ss:$16 sps:$4 sm:$0xff]   ;;  %v5749_v32 = vld [vmem:[%s7811_s1 + $0xca8] ss:$16 sps:$4 sm:$0xff]  }
 0x19f   : > { %3867 = vmatprep.subr.bf16.mxu1 %v5676_v42  ;;  %v5754_v42 = vld [vmem:[%s7811_s1 + $0xc8c] ss:$16 sps:$4 sm:$0xff]   ;;  %v5752_v60 = vld [vmem:[%s7811_s1 + $0xc88] ss:$16 sps:$4 sm:$0xff]  }
 0x1a1   : > { %3903 = vmatpush1.bf16.msra.mxu0 %v5677_v46  ;;  %v5760_v46 = vld [vmem:[%s7811_s1 + $0xc6c] ss:$16 sps:$4 sm:$0xff]  }
 0x1a2   : > { %3868 = vmatpush1.bf16.msra.mxu1 %v5674_v44  ;;  %3904 = vmatprep.subr.bf16.mxu0 %v5685_v48  ;;  %v5755_v44 = vld [vmem:[%s7811_s1 + $0xee8] ss:$16 sps:$4 sm:$0xff]  }
 0x1a3   : > { %3869 = vmatprep.subr.bf16.mxu1 %v5682_v47  ;;  %v5763_v47 = vld [vmem:[%s7811_s1 + $0xecc] ss:$16 sps:$4 sm:$0xff]  }
 0x1a5   : > { %3905 = vmatpush1.bf16.msra.mxu0 %v5683_v0  ;;  %v5758_v0 = vld [vmem:[%s7811_s1 + $0xc68] ss:$16 sps:$4 sm:$0xff]  }
 0x1a6   : > { %3870 = vmatpush1.bf16.msra.mxu1 %v5680_v51  ;;  %3906 = vmatprep.subr.bf16.mxu0 %v5691_v13 }
 0x1a7   : > { %3871 = vmatprep.subr.bf16.mxu1 %v5688_v52  ;;  %v5761_v52 = vld [vmem:[%s7811_s1 + $0xec8] ss:$16 sps:$4 sm:$0xff]  }
 0x1a9   : > { %3907 = vmatpush1.bf16.msra.mxu0 %v5689_v55 }
 0x1aa   : > { %3872 = vmatpush2.bf16.msra.mxu1 %v5686_v53  ;;  %3908 = vmatprep.subr.bf16.mxu0 %v5697_v17  ;;  %v5767_v17 = vld [vmem:[%s7811_s1 + $0xea8] ss:$16 sps:$4 sm:$0xff]  }
 0x1ab   : > { %3873 = vmatprep.subr.bf16.mxu1 %v5694_v56  ;;  %v5764_v56 = vld [vmem:[%s7811_s1 + $0xc48] ss:$16 sps:$4 sm:$0xff]  }
 0x1ad   : > { %3909 = vmatpush1.bf16.msra.mxu0 %v5695_v61  ;;  %v5772_v61 = vld [vmem:[%s7811_s1 + $0xc2c] ss:$16 sps:$4 sm:$0xff]  }
 0x1ae   : > { %3874 = vmatpush2.bf16.msra.mxu1 %v5692_v58  ;;  %3910 = vmatprep.subr.bf16.mxu0 %v5703_v49  ;;  %v5773_v49 = vld [vmem:[%s7811_s1 + $0xe88] ss:$16 sps:$4 sm:$0xff]  }
 0x1af   : > { %3875 = vmatprep.subr.bf16.mxu1 %v5700_v62  ;;  %v5770_v62 = vld [vmem:[%s7811_s1 + $0xc28] ss:$16 sps:$4 sm:$0xff]  }
 0x1b1   : > { %3911 = vmatpush1.bf16.msra.mxu0 %v5701_v1  ;;  %v5781_v1 = vld [vmem:[%s7811_s1 + $0xe6c] ss:$16 sps:$4 sm:$0xff]  }
 0x1b2   : > { %3876 = vmatpush2.bf16.msra.mxu1 %v5698_v63  ;;  %3912 = vmatprep.subr.bf16.mxu0 %v5709_v3  ;;  %v5778_v63 = vld [vmem:[%s7811_s1 + $0xc0c] ss:$16 sps:$4 sm:$0xff]   ;;  %v5779_v3 = vld [vmem:[%s7811_s1 + $0xe68] ss:$16 sps:$4 sm:$0xff]  }
 0x1b3   : > { %3877 = vmatprep.subr.bf16.mxu1 %v5706_v2  ;;  %v5776_v2 = vld [vmem:[%s7811_s1 + $0xc08] ss:$16 sps:$4 sm:$0xff]  }
 0x1b5   : > { %3913 = vmatpush2.bf16.msra.mxu0 %v5707_v5  ;;  %v5787_v5 = vld [vmem:[%s7811_s1 + $0xe4c] ss:$16 sps:$4 sm:$0xff]  }
 0x1b6   : > { %3878 = vmatpush2.bf16.msra.mxu1 %v5704_v4  ;;  %3914 = vmatprep.subr.bf16.mxu0 %v5715_v18  ;;  %v5784_v4 = vld [vmem:[%s7811_s1 + $0xdec] ss:$16 sps:$4 sm:$0xff]   ;;  %v5785_v18 = vld [vmem:[%s7811_s1 + $0xe48] ss:$16 sps:$4 sm:$0xff]  }
 0x1b7   : > { %3879 = vmatprep.subr.bf16.mxu1 %v5712_v7  ;;  %v5782_v7 = vld [vmem:[%s7811_s1 + $0xde8] ss:$16 sps:$4 sm:$0xff]  }
 0x1b9   : > { %3915 = vmatpush2.bf16.msra.mxu0 %v5713_v9  ;;  %v5793_v9 = vld [vmem:[%s7811_s1 + $0xe2c] ss:$16 sps:$4 sm:$0xff]  }
 0x1ba   : > { %3880 = vmatpush2.bf16.msra.mxu1 %v5710_v36  ;;  %3916 = vmatprep.subr.bf16.mxu0 %v5721_v11  ;;  %v5790_v36 = vld [vmem:[%s7811_s1 + $0xdcc] ss:$16 sps:$4 sm:$0xff]   ;;  %v5791_v11 = vld [vmem:[%s7811_s1 + $0xe28] ss:$16 sps:$4 sm:$0xff]  }
 0x1bb   : > { %3881 = vmatprep.subr.bf16.mxu1 %v5718_v10  ;;  %v5788_v10 = vld [vmem:[%s7811_s1 + $0xdc8] ss:$16 sps:$4 sm:$0xff]  }
 0x1bd   : > { %3917 = vmatpush2.bf16.msra.mxu0 %v5719_v12  ;;  %v5799_v12 = vld [vmem:[%s7811_s1 + $0xe0c] ss:$16 sps:$4 sm:$0xff]  }
 0x1be   : > { %3882 = vmatpush2.bf16.msra.mxu1 %v5716_v26  ;;  %3918 = vmatprep.subr.bf16.mxu0 %v5727_v45  ;;  %v5796_v26 = vld [vmem:[%s7811_s1 + $0xdac] ss:$16 sps:$4 sm:$0xff]   ;;  %v5797_v45 = vld [vmem:[%s7811_s1 + $0xe08] ss:$16 sps:$4 sm:$0xff]  }
 0x1bf   : > { %3883 = vmatprep.subr.bf16.mxu1 %v5724_v14  ;;  %v5794_v14 = vld [vmem:[%s7811_s1 + $0xda8] ss:$16 sps:$4 sm:$0xff]  }
 0x1c1   : > { %3919 = vmatpush2.bf16.msra.mxu0 %v5725_v15  ;;  %v5805_v15 = vld [vmem:[%s7811_s1 + $0xf8c] ss:$16 sps:$4 sm:$0xff]  }
 0x1c2   : > { %3884 = vmatpush2.bf16.msra.mxu1 %v5722_v41  ;;  %3920 = vmatprep.subr.bf16.mxu0 %v5733_v16  ;;  %v5802_v41 = vld [vmem:[%s7811_s1 + $0xd8c] ss:$16 sps:$4 sm:$0xff]   ;;  %v5803_v16 = vld [vmem:[%s7811_s1 + $0xf88] ss:$16 sps:$4 sm:$0xff]  }
 0x1c3   : > { %3885 = vmatprep.subr.bf16.mxu1 %v5730_v23  ;;  %v5800_v23 = vld [vmem:[%s7811_s1 + $0xd88] ss:$16 sps:$4 sm:$0xff]  }
 0x1c5   : > { %3921 = vmatpush2.bf16.msra.mxu0 %v5731_v20  ;;  %v5811_v20 = vld [vmem:[%s7811_s1 + $0xf6c] ss:$16 sps:$4 sm:$0xff]  }
 0x1c6   : > { %3886 = vmatpush2.bf16.msra.mxu1 %v5728_v19  ;;  %3922 = vmatprep.subr.bf16.mxu0 %v5736_v21  ;;  %v5808_v19 = vld [vmem:[%s7811_s1 + $0xd6c] ss:$16 sps:$4 sm:$0xff]   ;;  %v5806_v21 = vld [vmem:[%s7811_s1 + $0xd68] ss:$16 sps:$4 sm:$0xff]  }
 0x1c7   : > { %3937 = vmatprep.subr.bf16.mxu1 %v5739_v22  ;;  %v5809_v22 = vld [vmem:[%s7811_s1 + $0xf68] ss:$16 sps:$4 sm:$0xff]  }
 0x1c9   : > { %v3684_v6 = vpop.f32.mrf.mxu1  ;;  %3888 = vmatmul.mubr.bf16.vlgmr.msra.gmra.mxu1 %v6665_v50  ;;  %3923 = vmatpush2.bf16.msra.mxu0 %v5734_v24  ;;  %v5751_v50 = vld [vmem:[%s7811_s1 + $0xcac] ss:$16 sps:$4 sm:$0xff]  }
 0x1ca   : > { %3938 = vmatpush1.bf16.msra.mxu1 %v5737_v25  ;;  %3924 = vmatprep.subr.bf16.mxu0 %v5742_v27  ;;  %v5814_v24 = vld [vmem:[%s7811_s1 + $0xd4c] ss:$16 sps:$4 sm:$0xff]   ;;  %v5812_v27 = vld [vmem:[%s7811_s1 + $0xd48] ss:$16 sps:$4 sm:$0xff]  }
 0x1cb   : > { %v7484_v31 = vpop.f32.mrf.mxu1  ;;  %3939 = vmatprep.subr.bf16.mxu1 %v5745_v28  ;;  %3969 = vmatprep.mubr.bf16.mxu1 %v6677_v54  ;;  %v5757_v54 = vld [vmem:[%s7811_s1 + $0xeec] ss:$16 sps:$4 sm:$0xff]   ;;  %v5815_v28 = vld [vmem:[%s7811_s1 + $0xf48] ss:$16 sps:$4 sm:$0xff]  }
 0x1cc   : > { %v5817_v25 = vld [vmem:[%s7811_s1 + $0xf4c] ss:$16 sps:$4 sm:$0xff]  }
 0x1cd   : > { %v3688_v37 = vpop.f32.mrf.mxu1  ;;  %3925 = vmatpush2.bf16.msra.mxu0 %v5740_v8  ;;  %v5823_v8 = vld [vmem:[%s7811_s1 + $0xf2c] ss:$16 sps:$4 sm:$0xff]  }
 0x1ce   : > { %3940 = vmatpush1.bf16.msra.mxu1 %v5743_v30  ;;  %3926 = vmatprep.subr.bf16.mxu0 %v5748_v33  ;;  %v5818_v33 = vld [vmem:[%s7811_s1 + $0xd28] ss:$16 sps:$4 sm:$0xff]   ;;  %v5826_v37 = vld [vmem:[%s7811_s1 + $0xd0c] ss:$16 sps:$4 sm:$0xff]  }
 0x1cf   : > { %v3689_v40 = vpop.f32.mrf.mxu1  ;;  %3941 = vmatprep.subr.bf16.mxu1 %v5751_v50  ;;  %v5821_v50 = vld [vmem:[%s7811_s1 + $0xf28] ss:$16 sps:$4 sm:$0xff]  }
 0x1d0   : > { %v5827_v40 = vld [vmem:[%s7811_s1 + $0xf08] ss:$16 sps:$4 sm:$0xff]  }
 0x1d1   : > { %3927 = vmatpush2.bf16.msra.mxu0 %v5746_v38 }
 0x1d2   : > { %3942 = vmatpush1.bf16.msra.mxu1 %v5749_v32  ;;  %3978 = vmatprep.subr.bf16.mxu0 %v5757_v54  ;;  %v5824_v32 = vld [vmem:[%s7811_s1 + $0xd08] ss:$16 sps:$4 sm:$0xff]  }
 0x1d3   : > { %3943 = vmatprep.subr.bf16.mxu1 %v5754_v42  ;;  %v5830_v42 = vld [vmem:[%s7813_s3 + $0x78] sm:$0xff]  }
 0x1d4   : > { %v3643_v48 = vpop.f32.mrf.mxu0  ;;  %3929 = vmatmul.mubr.bf16.vlgmr.msra.gmra.mxu0 %v6681_v35  ;;  %v5766_v35 = vld [vmem:[%s7811_s1 + $0xc4c] ss:$16 sps:$4 sm:$0xff]  }
 0x1d5   : > { %v3644_v51 = vadd.f32 %v3643_v48, %v7327_v29  ;;  %3979 = vmatpush1.bf16.msra.mxu0 %v5755_v44  ;;  %v5769_v29 = vld [vmem:[%s7811_s1 + $0xeac] ss:$16 sps:$4 sm:$0xff]   ;;  %4956 = vmatprep.mubr.msk.bf16.mxu0 %vm3359_vm0, %v6697_v59 }
 0x1d6   : > { %3944 = vmatpush1.bf16.msra.mxu1 %v5752_v60  ;;  %v7525_v13 = vpop.f32.mrf.mxu0  ;;  %3980 = vmatprep.subr.bf16.mxu0 %v5763_v47  ;;  %v5775_v59 = vld [vmem:[%s7811_s1 + $0xe8c] ss:$16 sps:$4 sm:$0xff]   ;;  %v5832_v60 = vld [vmem:[%s7813_s3 + $0x70] sm:$0xff]  }
 0x1d7   : > { %3945 = vmatprep.subr.bf16.mxu1 %v5760_v46  ;;  %v7533_v53 = vadd.f32 %v3684_v6, %v3644_v51  ;;  %v5820_v6 = vld [vmem:[%s7811_s1 + $0xd2c] ss:$16 sps:$4 sm:$0xff]   ;;  %v3646_v30 = vadd.f32 %v7525_v13, %v7331_v34  ;;  %v5833_v47 = vld [vmem:[%s7813_s3 + $0x30] sm:$0xff]   ;;  %v3353_v13 = vsub.s32 3, %v6128_v43 }
 0x1d8   : > { %v3647_v55 = vpop.f32.mrf.mxu0  ;;  %v5829_v34 = vld [vmem:[%s7811_s1 + $0xf0c] ss:$16 sps:$4 sm:$0xff]  }
 0x1d9   : > { %3981 = vmatpush1.bf16.msra.mxu0 %v5761_v52  ;;  %v3687_v38 = vadd.f32 %v7484_v31, %v3646_v30  ;;  %v5831_v31 = vld [vmem:[%s7813_s3 + $0x38] sm:$0xff]   ;;  %v5834_v51 = vld [vmem:[%s7813_s3 + $0x68] sm:$0xff]  }
 0x1da   : > { %3946 = vmatpush1.bf16.msra.mxu1 %v5758_v0  ;;  %v3648_v58 = vpop.f32.mrf.mxu0  ;;  %3982 = vmatprep.subr.bf16.mxu0 %v5769_v29  ;;  %v3349_v0 = vsub.s32 2, %v6128_v43  ;;  %v5866_v29 = vld [vmem:[%s7812_s2] sm:$0xf] }
 0x1db   : > { %3947 = vmatprep.subr.bf16.mxu1 %v5766_v35  ;;  %v4020_v54 = vmax.f32 %v3687_v38, 0.0  ;;  %v5836_v35 = vld [vmem:[%s7813_s3 + $0x60] sm:$0xff]  }
 0x1dc   : > { %v3350_v55 = vrot.slane %v5866_v29, %v3349_v0  ;;  %v5837_v43 = vld [vmem:[%s7813_s3 + $0x20] sm:$0xff]  }
 0x1dd   : > { %3983 = vmatpush1.bf16.msra.mxu0 %v5767_v17  ;;  %v4024_v44 = vpack.c.bf16 %v4020_v54, %v4020_v54  ;;  %v5838_v17 = vld [vmem:[%s7813_s3 + $0x58] sm:$0xff]  }
 0x1de   : > { %3948 = vmatpush1.bf16.msra.mxu1 %v5764_v56  ;;  %3984 = vmatprep.subr.bf16.mxu0 %v5775_v59  ;;  %v3354_v56 = vrot.slane %v5866_v29, %v3353_v13 }
 0x1df   : > { %3949 = vmatprep.subr.bf16.mxu1 %v5772_v61 }
 0x1e1   : > { %3985 = vmatpush1.bf16.msra.mxu0 %v5773_v49  ;;  %v5839_v49 = vld [vmem:[%s7813_s3 + $0x18] sm:$0xff]  }
 0x1e2   : > { %3950 = vmatpush1.bf16.msra.mxu1 %v5770_v62  ;;  %3986 = vmatprep.subr.bf16.mxu0 %v5781_v1  ;;  %v5840_v1 = vld [vmem:[%s7813_s3 + $0x50] sm:$0xff]  }
 0x1e3   : > { %3951 = vmatprep.subr.bf16.mxu1 %v5778_v63 }
 0x1e5   : > { %3987 = vmatpush1.bf16.msra.mxu0 %v5779_v3 }
 0x1e6   : > { %3952 = vmatpush1.bf16.msra.mxu1 %v5776_v2  ;;  %3988 = vmatprep.subr.bf16.mxu0 %v5787_v5  ;;  %v5842_v5 = vld [vmem:[%s7813_s3 + $0x48] sm:$0xff]  }
 0x1e7   : > { %3953 = vmatprep.subr.bf16.mxu1 %v5784_v4  ;;  %v5841_v4 = vld [vmem:[%s7813_s3 + $0x10] sm:$0xff]  }
 0x1e9   : > { %3989 = vmatpush1.bf16.msra.mxu0 %v5785_v18  ;;  %v5846_v18 = vld [vmem:[%s7813_s3 + $0xf8] ss:$0 sps:$4 sm:$0x33]  }
 0x1ea   : > { %3954 = vmatpush2.bf16.msra.mxu1 %v5782_v7  ;;  %3990 = vmatprep.subr.bf16.mxu0 %v5793_v9  ;;  %v5848_v9 = vld [vmem:[%s7813_s3 + $0xf0] sm:$0xff]  }
 0x1eb   : > { %3955 = vmatprep.subr.bf16.mxu1 %v5790_v36  ;;  %v5847_v36 = vld [vmem:[%s7813_s3 + $0xb8] sm:$0xff]  }
 0x1ed   : > { %3991 = vmatpush1.bf16.msra.mxu0 %v5791_v11  ;;  %v5849_v11 = vld [vmem:[%s7813_s3 + $0xb0] sm:$0xff]  }
 0x1ee   : > { %3956 = vmatpush2.bf16.msra.mxu1 %v5788_v10  ;;  %3992 = vmatprep.subr.bf16.mxu0 %v5799_v12  ;;  %v5843_v10 = vld [vmem:[%s7813_s3 + $0x8] sm:$0xff]  }
 0x1ef   : > { %3957 = vmatprep.subr.bf16.mxu1 %v5796_v26  ;;  %v5844_v26 = vld [vmem:[%s7813_s3 + $0x40] sm:$0xff]   ;;  %v5850_v12 = vld [vmem:[%s7813_s3 + $0xe8] sm:$0xff]  }
 0x1f1   : > { %3993 = vmatpush1.bf16.msra.mxu0 %v5797_v45  ;;  %v5851_v45 = vld [vmem:[%s7813_s3 + $0xa8] sm:$0xff]  }
 0x1f2   : > { %3958 = vmatpush2.bf16.msra.mxu1 %v5794_v14  ;;  %4000 = vmatprep.subr.bf16.mxu0 %v5805_v15  ;;  %v5845_v14 = vld [vmem:[%s7813_s3] sm:$0xff]  }
 0x1f3   : > { %3959 = vmatprep.subr.bf16.mxu1 %v5802_v41  ;;  %v4019_v41 = vmax.f32 %v7533_v53, 0.0  ;;  %v5852_v15 = vld [vmem:[%s7813_s3 + $0xe0] sm:$0xff]   ;;  %v5855_v53 = vld [vmem:[%s7813_s3 + $0x98] sm:$0xff]  }
 0x1f5   : > { %4001 = vmatpush2.bf16.msra.mxu0 %v5803_v16  ;;  %v4023_v16 = vpack.c.bf16 %v4019_v41, %v4019_v41 }
 0x1f6   : > { %3960 = vmatpush2.bf16.msra.mxu1 %v5800_v23  ;;  %4002 = vmatprep.subr.bf16.mxu0 %v5811_v20  ;;  %v5853_v23 = vld [vmem:[%s7813_s3 + $0xa0] sm:$0xff]   ;;  %v5856_v20 = vld [vmem:[%s7813_s3 + $0xd0] sm:$0xff]  }
 0x1f7   : > { %3961 = vmatprep.subr.bf16.mxu1 %v5808_v19  ;;  %v5854_v19 = vld [vmem:[%s7813_s3 + $0xd8] sm:$0xff]  }
 0x1f9   : > { %4003 = vmatpush2.bf16.msra.mxu0 %v5809_v22 }
 0x1fa   : > { %3962 = vmatpush2.bf16.msra.mxu1 %v5806_v21  ;;  %4004 = vmatprep.subr.bf16.mxu0 %v5817_v25  ;;  %v5857_v21 = vld [vmem:[%s7813_s3 + $0x90] sm:$0xff]  }
 0x1fb   : > { %3963 = vmatprep.subr.bf16.mxu1 %v5814_v24 }
 0x1fd   : > { %4005 = vmatpush2.bf16.msra.mxu0 %v5815_v28 }
 0x1fe   : > { %3964 = vmatpush2.bf16.msra.mxu1 %v5812_v27  ;;  %4006 = vmatprep.subr.bf16.mxu0 %v5823_v8  ;;  %v5858_v27 = vld [vmem:[%s7813_s3 + $0xc8] sm:$0xff]  }
 0x1ff   : > { %3965 = vmatprep.subr.bf16.mxu1 %v5820_v6  ;;  %v5859_v6 = vld [vmem:[%s7813_s3 + $0x88] sm:$0xff]  }
 0x201   : > { %4007 = vmatpush2.bf16.msra.mxu0 %v5821_v50  ;;  %v5861_v50 = vld [vmem:[%s7813_s3 + $0x80] sm:$0xff]  }
 0x202   : > { %3966 = vmatpush2.bf16.msra.mxu1 %v5818_v33  ;;  %4008 = vmatprep.subr.bf16.mxu0 %v5829_v34  ;;  %v5860_v33 = vld [vmem:[%s7813_s3 + $0xc0] sm:$0xff]  }
 0x203   : > { %3967 = vmatprep.subr.bf16.mxu1 %v5826_v37 }
 0x205   : > { %4009 = vmatpush2.bf16.msra.mxu0 %v5827_v40 }
 0x206   : > { %3968 = vmatpush2.bf16.msra.mxu1 %v5824_v32  ;;  %4993 = vmatprep.subr.bf16.mxu0 %v5830_v42 }
 0x207   : > { %5037 = vmatprep.subr.msk.bf16.mxu1 %vm4284_vm1, %v5846_v18 }
 0x208   : > { %4011 = vmatmul.mubr.bf16.vlgmr.msra.gmra.mxu0 %v6857_v39 }
 0x209   : > { %v3725_v46 = vpop.f32.mrf.mxu1  ;;  %3970 = vmatmul.mubr.bf16.vlgmr.msra.gmra.mxu1 %v6841_v57  ;;  %4994 = vmatpush3.bf16.msra.mxu0 %v5831_v31  ;;  %v5835_v57 = vld [vmem:[%s7813_s3 + $0x28] sm:$0xff]  }
 0x20a   : > { %4320 = vmatprep.mubr.bf16.mxu0 %v4024_v44  ;;  %4995 = vmatprep.subr.bf16.mxu0 %v5832_v60  ;;  %v3726_v58 = vadd.f32 %v3725_v46, %v3350_v55 }
 0x20b   : > { %v3727_v48 = vpop.f32.mrf.mxu1  ;;  %5016 = vmatpush3.bf16.msra.mxu1 %v5847_v36 }
 0x20c   : > { %v3728_v59 = vadd.f32 %v3727_v48, %v3354_v56  ;;  %5017 = vmatprep.subr.bf16.mxu1 %v5848_v9  ;;  %v4090_v9 = vld [vmem:[%s7814_s4] sm:$0x1] }
 0x20d   : > { %v3729_v52 = vpop.f32.mrf.mxu1  ;;  %4996 = vmatpush3.bf16.msra.mxu0 %v5833_v47 }
 0x20e   : > { %4997 = vmatprep.subr.bf16.mxu0 %v5834_v51 }
 0x20f   : > { %v3730_v39 = vpop.f32.mrf.mxu1  ;;  %5018 = vmatpush3.bf16.msra.mxu1 %v5849_v11 }
 0x210   : > { %5019 = vmatprep.subr.bf16.mxu1 %v5850_v12 }
 0x211   : > { %4998 = vmatpush3.bf16.msra.mxu0 %v5835_v57 }
 0x212   : > { %4999 = vmatprep.subr.bf16.mxu0 %v5836_v35 }
 0x213   : > { %5020 = vmatpush3.bf16.msra.mxu1 %v5851_v45 }
 0x214   : > { %v3766_v61 = vpop.f32.mrf.mxu0  ;;  %5021 = vmatprep.subr.bf16.mxu1 %v5852_v15 }
 0x215   : > { %v3767_v62 = vadd.f32 %v3766_v61, %v3726_v58  ;;  %5000 = vmatpush3.bf16.msra.mxu0 %v5837_v43 }
 0x216   : > { %v3768_v63 = vpop.f32.mrf.mxu0  ;;  %5001 = vmatprep.subr.bf16.mxu0 %v5838_v17 }
 0x217   : > { %v3769_v2 = vadd.f32 %v3768_v63, %v3728_v59  ;;  %5022 = vmatpush3.bf16.msra.mxu1 %v5853_v23 }
 0x218   : > { %v3770_v3 = vpop.f32.mrf.mxu0  ;;  %5023 = vmatprep.subr.bf16.mxu1 %v5854_v19 }
 0x219   : > { %5002 = vmatpush3.bf16.msra.mxu0 %v5839_v49 }
 0x21a   : > { %v3771_v7 = vpop.f32.mrf.mxu0  ;;  %5003 = vmatprep.subr.bf16.mxu0 %v5840_v1 }
 0x21b   : > { %5024 = vmatpush3.bf16.msra.mxu1 %v5855_v53 }
 0x21c   : > { %5025 = vmatprep.subr.bf16.mxu1 %v5856_v20 }
 0x21d   : > { %5004 = vmatpush3.bf16.msra.mxu0 %v5841_v4 }
 0x21e   : > { %5005 = vmatprep.subr.bf16.mxu0 %v5842_v5 }
 0x21f   : > { %5026 = vmatpush3.bf16.msra.mxu1 %v5857_v21 }
 0x220   : > { %5027 = vmatprep.subr.bf16.mxu1 %v5858_v27 }
 0x221   : > { %5006 = vmatpush3.bf16.msra.mxu0 %v5843_v10 }
 0x222   : > { %5007 = vmatprep.subr.bf16.mxu0 %v5844_v26 }
 0x223   : > { %5028 = vmatpush3.bf16.msra.mxu1 %v5859_v6 }
 0x224   : > { %5029 = vmatprep.subr.bf16.mxu1 %v5860_v33 }
 0x225   : > { %5008 = vmatpush3.bf16.msra.mxu0 %v5845_v14 }
 0x227   : > { %5030 = vmatpush3.bf16.msra.mxu1 %v5861_v50 }
 0x228   : > { %4321 = vmatmul.mubr.bf16.vlgmr.msra.gmra.mxu0 %v4023_v16 }
 0x249   : > { %v3807_v22 = vpop.f32.mrf.mxu1 }
 0x24a   : > { %v3808_v24 = vadd.f32 %v3807_v22, %v3767_v62 }
 0x24b   : > { %v3809_v25 = vpop.f32.mrf.mxu1 }
 0x24c   : > { %v3810_v28 = vadd.f32 %v3809_v25, %v3769_v2 }
 0x24d   : > { %v3811_v8 = vpop.f32.mrf.mxu1 }
 0x24f   : > { %v3812_v30 = vpop.f32.mrf.mxu1 }
 0x254   : > { %v3848_v37 = vpop.f32.mrf.mxu0 }
 0x255   : > { %v3849_v34 = vadd.f32 %v3848_v37, %v3808_v24 }
 0x256   : > { %v3850_v38 = vpop.f32.mrf.mxu0 }
 0x257   : > { %v3851_v32 = vadd.f32 %v3850_v38, %v3810_v28 }
 0x258   : > { %v3852_v40 = vpop.f32.mrf.mxu0 }
 0x25a   : > { %v3853_v42 = vpop.f32.mrf.mxu0 }
 0x289   : > { %v3889_v54 = vpop.f32.mrf.mxu1 }
 0x28a   : > { %v3890_v0 = vadd.f32 %v3889_v54, %v3849_v34 }
 0x28b   : > { %v3891_v31 = vpop.f32.mrf.mxu1 }
 0x28c   : > { %v3892_v52 = vadd.f32 %v3891_v31, %v3851_v32 }
 0x28d   : > { %v3893_v60 = vpop.f32.mrf.mxu1 }
 0x28f   : > { %v3894_v44 = vpop.f32.mrf.mxu1 }
 0x294   : > { %v3930_v46 = vpop.f32.mrf.mxu0 }
 0x295   : > { %v3931_v13 = vadd.f32 %v3930_v46, %v3890_v0 }
 0x296   : > { %v3932_v47 = vpop.f32.mrf.mxu0 }
 0x297   : > { %v3933_v35 = vadd.f32 %v3932_v47, %v3892_v52 }
 0x298   : > { %v3934_v48 = vpop.f32.mrf.mxu0 }
 0x29a   : > { %v3935_v51 = vpop.f32.mrf.mxu0 }
 0x2c8   : > { %v4012_v39 = vpop.f32.mrf.mxu0 }
 0x2c9   : > { %v3971_v57 = vpop.f32.mrf.mxu1 }
 0x2ca   : > { %v3972_v29 = vadd.f32 %v3971_v57, %v3931_v13  ;;  %v4014_v56 = vpop.f32.mrf.mxu0 }
 0x2cb   : > { %v3973_v55 = vpop.f32.mrf.mxu1 }
 0x2cc   : > { %v4013_v43 = vadd.f32 %v4012_v39, %v3972_v29  ;;  %v3974_v17 = vadd.f32 %v3973_v55, %v3933_v35  ;;  %v4016_v61 = vpop.f32.mrf.mxu0 }
 0x2cd   : > { %v3975_v58 = vpop.f32.mrf.mxu1 }
 0x2ce   : > { %v4015_v59 = vadd.f32 %v4014_v56, %v3974_v17  ;;  %v4021_v62 = vmax.f32 %v4013_v43, 0.0  ;;  %v4017_v63 = vpop.f32.mrf.mxu0 }
 0x2cf   : > { %v3976_v49 = vpop.f32.mrf.mxu1 }
 0x2d0   : > { %v4022_v1 = vmax.f32 %v4015_v59, 0.0  ;;  %v4025_v3 = vpack.c.bf16 %v4021_v62, %v4021_v62 }
 0x2d2   : > { %v4026_v2 = vpack.c.bf16 %v4022_v1, %v4022_v1 }
 0x2d4   : > { %4989 = vmatprep.mubr.msk.bf16.mxu1 %vm4280_vm2, %v4026_v2 }
 0x2d5   : > { %4361 = vmatmul.mubr.bf16.vlgmr.msra.gmra.mxu1 %v4025_v3 }
 0x2e8   : > { %v5009_v4 = vpop.f32.mrf.mxu0 }
 0x2ea   : > { %v5010_v5 = vpop.f32.mrf.mxu0 }
 0x2eb   : > { %v5011_v7 = vadd.f32 %v5010_v5, %v5009_v4 }
 0x2ec   : > { %v5012_v18 = vpop.f32.mrf.mxu0 }
 0x2ed   : > { %v4323_v26 = vadd.f32 %v5011_v7, %v4090_v9 }
 0x2ee   : > { %v5013_v36 = vpop.f32.mrf.mxu0 }
 0x395   : > { %v5031_v10 = vpop.f32.mrf.mxu1 }
 0x397   : > { %v5032_v11 = vpop.f32.mrf.mxu1 }
 0x398   : > { %v5033_v12 = vadd.f32 %v5032_v11, %v5031_v10 }
 0x399   : > { %v5034_v14 = vpop.f32.mrf.mxu1 }
 0x39a   : > { %v4363_v45 = vadd.f32 %v5033_v12, %v4323_v26 }
 0x39b   : > { %v5035_v41 = vpop.f32.mrf.mxu1 }
 0x39c   : > { %v4369_v15 = vsel %vm4368_vm3, %v4363_v45, -inf }
 0x39d   : > { %4370 = vmax.xlane.f32.xlu0 %v4369_v15 }
 0x426   : > { %v4371_v23 = vpop.xlane.xlu0 %4370 }
 0x427   : > { %v4372_v16 = vsub.f32 %v4363_v45, %v4371_v23 }
 0x429   : > { %v4373_v19 = vmul.f32 1.442695, %v4372_v16 }
 0x42b   : > { %5862 = vpow2.f32 %v4373_v19 }
 0x438   : > { %v5863_v53 = vpop.eup %5862 }
 0x439   : > { %v4375_v20 = vsel %vm4368_vm3, %v5863_v53, 0.0 }
 0x43a   : > { %4376 = vadd.xlane.f32.xlu0 %v4375_v20 }
 0x4c3   : > { %v4377_v21 = vpop.xlane.xlu0 %4376 }
 0x4c4   : > { %5864 = vlog2.f32 %v4377_v21 }
 0x4d1   : > { %v5865_v22 = vpop.eup %5864 }
 0x4d2   : > { %v4379_v24 = vmul.f32 0.6931472, %v5865_v22 }
 0x4d4   : > { %v4380_v25 = vsub.f32 %v4372_v16, %v4379_v24 }
 0x4d6   : > { %4381 = vst.msk [vmem:[%s214_s30] sm:$0x1] %vm4368_vm3, %v4380_v25 }
 0x4d7   : > { %5880 = shalt.err (!%p5877_p3)
}
 0x4d8   : > { %s5881_s14 = scalar_lea.hbm %s4393_s9, 16  ;;  %s5885_s23 = scalar_lea.hbm %s7815_s5, 32 }
 0x4d9   : > { %p5882_p4 = scmp.ne.s32.totalorder %s4393_s9, %s5881_s14  ;;  %p5886_p9 = scmp.lt.s32.totalorder %s4393_s9, %s7815_s5 }
 0x4da   : > { %p5887_p10 = scmp.lt.s32.totalorder %s5885_s23, %s5881_s14 }
 0x4db   : > { %p5883_p7 = pnand %p5882_p4, %p5999_p5 }
 0x4dc   : > { %p5888_p11 = por %p5887_p10, %p5886_p9 }
 0x4dd   : > { %p5884_p8 = pneg %p5883_p7 }
 0x4df   : > { %p5889_p12 = pnand %p5888_p11, %p5884_p8 }
 0x4e1   : > { %5892 = shalt.err (!%p5889_p12)
}
 0x4e2   : > { %5038 = dma.vmem_to_hbm [thread:$0]  (%p5999_p5), %s4396_s6, 16, %s4393_s9, %s4383_s10  }
 0x4e3 PF: > { %p5044_p13 = scmp.ge.s32.totalorder %s5927_s21, 2  ;;  %s4407_s26 = sand.u32 1, %s5915_s18  }
 0x4e4   : > { %s4408_s30 = scalar_lea.sflag [#allocation3], %s4407_s26 }
 0x4e5   : > { %p5041_p0 = pnand %p5044_p13, %p6003_p6 }
 0x4e7   : > { %p5042_p1 = pneg %p5041_p0 }
 0x4e9   : > { %5910 = dma.done.wait (%p5042_p1), %s4408_s30, 16  }
 0x4ea   : > { %5912 = vsyncadd (%p5042_p1), %s4408_s30, 4294967280  ;;  %p15_p2 = scmp.ge.s32.totalorder %s5986_s24, 4   ;;  %s7818_s18 = smov %s5919_s19 }
 0x4eb   : > { %s7819_s19 = smov %s5923_s20  ;;  %s7820_s20 = smov %s5997_s27 }
 0x4ec   : > { %s7821_s21 = smov %s5986_s24  ;;  %17 = sbr.rel (!%p15_p2) target bundleno = 3 (0x3), region = 75 }
 0x4f1   :  { %4412 = vsyncpa [#allocation3], 1 }
 0x4f2   :  { %4414 = vsyncpa [#allocation3 + $0x1], 1 }

</bundles_post_ra>
